<compile_context>
chip_gen: v7x
topology: tpu7x:2x2x1
jax: 0.10.0
libtpu: 0.0.40
codegen_flags: <defaults>
</compile_context>

<pallas_src>
import math
import jax
import jax.numpy as jnp
from jax.experimental import pallas as pl
from jax.experimental.pallas import tpu as pltpu

# ----------------------------- small config -----------------------------
B = 2            # batch
N = 4            # max_navigable
CH = 8           # conv_hidden (FiLM channels, stand-in for resnet output channels)
HS = WS = 4      # spatial size of the (stand-in) resnet feature maps
NB = 2           # num_resblocks
ANG = 8          # angular feature dim
F = CH + ANG     # img_feat_input_dim (== feature_size)
D = 32           # img_fc_dim[-1]
HID = 32         # rnn_hidden_size
S = 8            # seq len == max_len
BN_EPS = 1e-5

# ------------------------ lane-dense output slab layout ------------------------
SLAB = 256                           # multiple of 128 -> unmasked stores
OFF_H1 = 0
OFF_C1 = HID
OFF_WCTX = 2 * HID
OFF_CTX_ATTN = 3 * HID               # 96
OFF_IMG_ATTN = OFF_CTX_ATTN + S      # 104
OFF_LOGIT = OFF_IMG_ATTN + N         # 108
OFF_VALUE = OFF_LOGIT + N            # 112
OFF_NAVFEAT = 128                    # navigable_feat flattened (N*F = 64)


def _softmax(x):
    m = jnp.max(x, axis=-1, keepdims=True)
    e = jnp.exp(x - m)
    return e / jnp.sum(e, axis=-1, keepdims=True)


# ========================= single fused kernel =========================
def fused_kernel(maps_ref, ang_ref, pre_ref, h0_ref, c0_ref, ctx_ref, ctx_mask_ref,
                 nav_mask_ref, pe_ref,
                 filmgen_w_ref, filmgen_b_ref, conv_w_ref, conv_b_ref,
                 proj_w_ref, proj_b_ref, h0fc_w_ref, h0fc_b_ref,
                 h1fc_w_ref, h1fc_b_ref,
                 w_ih_ref, w_hh_ref, b_ih_ref, b_hh_ref,
                 logit_w_ref, logit_b_ref, h2_w_ref, h2_b_ref,
                 critic_w_ref, critic_b_ref,
                 out_ref):
    f32 = jnp.float32
    h0 = h0_ref[...]                               # (B, HID)
    c0 = c0_ref[...]                               # (B, HID)

    # ---------------- FiLM generator: h_0 -> per-block (gamma, beta) ----------------
    bg = jnp.dot(h0, filmgen_w_ref[...],
                 preferred_element_type=f32) + filmgen_b_ref[...]   # (B, NB*2*CH)

    # ---------------- FiLM res blocks: one im2col matmul per block ------------------
    x = maps_ref[...]                               # (B*N, HS, WS, CH)  NHWC
    conv_w = conv_w_ref[...]                        # (NB, 9*CH, CH)  rows ordered (dy,dx,cin)
    conv_b = conv_b_ref[...]                        # (NB, 1, CH)
    bn_scale = 1.0 / math.sqrt(1.0 + BN_EPS)        # identity eval BatchNorm

    zrow = jnp.zeros((B * N, 1, WS, CH), f32)
    zcol = jnp.zeros((B * N, HS + 2, 1, CH), f32)
    for blk in range(NB):                           # NB=2, static unroll
        # zero-pad via concat (vreg-resident; no VMEM scratch, no unaligned ref slices)
        xp = jnp.concatenate([zrow, x, zrow], axis=1)        # (BN, HS+2, WS,   CH)
        xp = jnp.concatenate([zcol, xp, zcol], axis=2)       # (BN, HS+2, WS+2, CH)
        patches = [xp[:, dy:dy + HS, dx:dx + WS, :]
                   for dy in range(3) for dx in range(3)]
        cols = jnp.concatenate(patches, axis=-1)             # (BN, HS, WS, 9*CH)
        cols = cols.reshape(B * N * HS * WS, 9 * CH)         # (128, 72)
        y = jnp.dot(cols, conv_w[blk],
                    preferred_element_type=f32) + conv_b[blk]  # (128, CH) one MXU push
        y = (y * bn_scale).reshape(B, N * HS * WS, CH)
        g = bg[:, blk * 2 * CH: blk * 2 * CH + CH]           # gamma (B, CH)
        bta = bg[:, blk * 2 * CH + CH: (blk + 1) * 2 * CH]   # beta  (B, CH)
        y = g[:, None, :] * y + bta[:, None, :]              # FiLM
        x = (jnp.maximum(y, 0.0) + x.reshape(B, N * HS * WS, CH)
             ).reshape(B * N, HS, WS, CH)                    # ReLU + residual

    pooled = jnp.mean(x.reshape(B * N, HS * WS, CH), axis=1).reshape(B, N, CH)

    # navigable_feat = cat(pooled resnet/FiLM feature, angular feature)
    nav_feat = jnp.concatenate([pooled, ang_ref[...]], axis=-1)     # (B, N, F)
    nav_mask = nav_mask_ref[...]                                    # (B, N) 1 = valid

    # ---------------- proj_navigable_mlp (nav rows + pre row in ONE matmul) ---------
    rows = jnp.concatenate([nav_feat.reshape(B * N, F), pre_ref[...]], axis=0)  # (BN+B, F)
    proj = jnp.maximum(jnp.dot(rows, proj_w_ref[...],
                               preferred_element_type=f32) + proj_b_ref[...], 0.0)
    pn = proj[:B * N].reshape(B, N, D) * nav_mask[:, :, None]       # proj_masking
    proj_pre = proj[B * N:]                                         # (B, D)

    # ---------------- attention queries: h1_fc + h0_fc merged into one matmul -------
    qw = jnp.concatenate([h1fc_w_ref[...], h0fc_w_ref[...]], axis=1)    # (HID, HID+D)
    qb = jnp.concatenate([h1fc_b_ref[...], h0fc_b_ref[...]], axis=1)
    q = jnp.dot(h0, qw, preferred_element_type=f32) + qb
    h1fc = q[:, :HID]                                                    # (B, HID)
    h0fc = q[:, HID:]                                                    # (B, D)

    # ---------------- soft attention over instruction context -----------------------
    pctx = ctx_ref[...] + pe_ref[...][None, :, :]                   # positional encoding
    ctx_scores = jnp.sum(pctx * h1fc[:, None, :], axis=-1)          # (B, S)
    ctx_scores = jnp.where(ctx_mask_ref[...] > 0, ctx_scores, -1e30)
    ctx_attn = _softmax(ctx_scores)
    weighted_ctx = jnp.sum(ctx_attn[:, :, None] * pctx, axis=1)     # (B, HID)

    # ---------------- soft attention over navigable views ---------------------------
    img_scores = jnp.sum(pn * h0fc[:, None, :], axis=-1)            # (B, N)
    img_scores = jnp.where(nav_mask > 0, img_scores, -1e30)
    img_attn = _softmax(img_scores)
    weighted_img = jnp.sum(img_attn[:, :, None] * pn, axis=1)       # (B, D)

    # ---------------- LSTM cell: one merged (B,128)x(128,128) matmul ----------------
    lstm_in = jnp.concatenate([proj_pre, weighted_img, weighted_ctx, h0], axis=1)
    w_full = jnp.concatenate([w_ih_ref[...], w_hh_ref[...]], axis=0)     # (2D+2HID, 4HID)
    gates = (jnp.dot(lstm_in, w_full, preferred_element_type=f32)
             + b_ih_ref[...] + b_hh_ref[...])                            # (B, 4HID)
    i_g = jax.nn.sigmoid(gates[:, 0:HID])
    f_g = jax.nn.sigmoid(gates[:, HID:2 * HID])
    g_g = jnp.tanh(gates[:, 2 * HID:3 * HID])
    o_g = jax.nn.sigmoid(gates[:, 3 * HID:4 * HID])
    c1 = f_g * c0 + i_g * g_g
    h1 = o_g * jnp.tanh(c1)                    # dropout = identity (eval)

    # ---------------- logit head: logit_fc(cat(weighted_ctx, h1)) then bmm ----------
    h_tilde = (jnp.dot(jnp.concatenate([weighted_ctx, h1], axis=1), logit_w_ref[...],
                       preferred_element_type=f32) + logit_b_ref[...])   # (B, D)
    logit = jnp.sum(pn * h_tilde[:, None, :], axis=-1)                   # (B, N)

    # ---------------- value head ----------------
    cv = (jnp.dot(jnp.concatenate([h0, weighted_img], axis=1), h2_w_ref[...],
                  preferred_element_type=f32) + h2_b_ref[...])           # (B, HID)
    h1_value = jax.nn.sigmoid(cv) * jnp.tanh(c1)
    # critic (out_dim=1): VPU multiply + lane reduce instead of a near-empty MXU pass.
    crit_in = jnp.concatenate([ctx_attn, h1_value], axis=1)              # (B, S+HID)
    value = jnp.tanh(jnp.sum(crit_in * critic_w_ref[...], axis=-1, keepdims=True)
                     + critic_b_ref[...])                                # (B, 1)

    # ---------------- pack everything into one lane-dense slab ----------------------
    nav_flat = jnp.concatenate([nav_feat[:, n, :] for n in range(N)], axis=1)  # (B, N*F)
    pad1 = jnp.zeros((B, OFF_NAVFEAT - (OFF_VALUE + 1)), f32)
    pad2 = jnp.zeros((B, SLAB - (OFF_NAVFEAT + N * F)), f32)
    out_ref[...] = jnp.concatenate(
        [h1, c1, weighted_ctx, ctx_attn, img_attn, logit, value, pad1, nav_flat, pad2],
        axis=1)


def run_fused(maps_nhwc, ang, pre_feat, h0, c0, ctx, ctx_mask, nav_mask, p):
    vmem = lambda: pl.BlockSpec(memory_space=pltpu.MemorySpace.VMEM)
    ins = (maps_nhwc, ang, pre_feat, h0, c0, ctx, ctx_mask, nav_mask, p['pe'],
           p['filmgen_w'], p['filmgen_b'], p['conv_w'], p['conv_b'],
           p['proj_w'], p['proj_b'], p['h0fc_w'], p['h0fc_b'],
           p['h1fc_w'], p['h1fc_b'],
           p['w_ih'], p['w_hh'], p['b_ih'], p['b_hh'],
           p['logit_w'], p['logit_b'], p['h2_w'], p['h2_b'],
           p['critic_w'], p['critic_b'])
    return pl.pallas_call(
        fused_kernel,
        out_shape=jax.ShapeDtypeStruct((B, SLAB), jnp.float32),
        in_specs=[vmem() for _ in ins],
        out_specs=vmem(),
    )(*ins)


# ============================== forward wrapper ==============================
def self_monitoring_forward(params, nav_feat_maps, navigable_ang_feat, pre_feat,
                            question, h_0, c_0, ctx, pre_ctx_attend,
                            navigable_index=None, ctx_mask=None):
    del question, pre_ctx_attend          # unused by the reference forward as well
    batch = nav_feat_maps.shape[0]

    # create_mask(batch, max_navigable, index_length) — 1 for valid slots.
    lengths = jnp.array([len(ix) + 1 for ix in navigable_index], jnp.int32)
    navigable_mask = (jnp.arange(N)[None, :] < lengths[:, None]).astype(jnp.float32)

    # layout glue: PyTorch NCHW (B,N,C,H,W) -> NHWC (B*N,H,W,C) for the fused kernel.
    # TODO(synk): index_map cannot permute the minor dims, so this 4 KiB transpose
    # stays as (XLA-fused) wrapper glue instead of being absorbed into the kernel.
    maps = jnp.transpose(nav_feat_maps, (0, 1, 3, 4, 2)).reshape(batch * N, HS, WS, CH)

    slab = run_fused(maps, navigable_ang_feat, pre_feat, h_0, c_0, ctx, ctx_mask,
                     navigable_mask, params)

    h_1 = slab[:, OFF_H1:OFF_H1 + HID]
    c_1 = slab[:, OFF_C1:OFF_C1 + HID]
    weighted_ctx = slab[:, OFF_WCTX:OFF_WCTX + HID]
    ctx_attn = slab[:, OFF_CTX_ATTN:OFF_CTX_ATTN + S]
    img_attn = slab[:, OFF_IMG_ATTN:OFF_IMG_ATTN + N]
    logit = slab[:, OFF_LOGIT:OFF_LOGIT + N]
    value = slab[:, OFF_VALUE:OFF_VALUE + 1]
    navigable_feat = slab[:, OFF_NAVFEAT:OFF_NAVFEAT + N * F].reshape(batch, N, F)

    return (h_1, c_1, weighted_ctx, img_attn, ctx_attn, logit, value,
            navigable_mask, navigable_feat)


# ============================== parameter init ==============================
def init_params(key):
    ks = jax.random.split(key, 12)

    def lin(k, i, o, scale=0.1):
        kw, kb = jax.random.split(k)
        return (jax.random.normal(kw, (i, o), jnp.float32) * scale,
                jax.random.normal(kb, (1, o), jnp.float32) * scale)

    p = {}
    p['proj_w'], p['proj_b'] = lin(ks[0], F, D)                    # proj_navigable_mlp
    p['h0fc_w'], p['h0fc_b'] = lin(ks[1], HID, D)                  # h0_fc
    p['h1fc_w'], p['h1fc_b'] = lin(ks[2], HID, HID)                # h1_fc
    p['w_ih'], p['b_ih'] = lin(ks[3], 2 * D + HID, 4 * HID)        # LSTMCell
    p['w_hh'], p['b_hh'] = lin(ks[4], HID, 4 * HID)
    p['logit_w'], p['logit_b'] = lin(ks[5], 2 * HID, D)            # logit_fc
    p['h2_w'], p['h2_b'] = lin(ks[6], HID + D, HID)                # h2_fc_lstm
    cw, cb = lin(ks[7], S + HID, 1)                                # critic (Linear+Tanh)
    p['critic_w'] = cw.T                                           # (1, S+HID) row for VPU dot
    p['critic_b'] = cb                                             # (1, 1)
    p['filmgen_w'], p['filmgen_b'] = lin(ks[8], HID, NB * 2 * CH)  # FiLMGenerator
    # 3x3 conv weights stored pre-im2col'd: (NB, 9*CH, CH), row order (dy, dx, cin).
    p['conv_w'] = (jax.random.normal(ks[9], (NB, 3, 3, CH, CH), jnp.float32) * 0.1
                   ).reshape(NB, 9 * CH, CH)
    p['conv_b'] = jax.random.normal(ks[10], (NB, 1, CH), jnp.float32) * 0.1

    # Standard sinusoidal positional encoding table (S, HID).
    pos = jnp.arange(S, dtype=jnp.float32)[:, None]
    div = jnp.exp(jnp.arange(0, HID, 2, dtype=jnp.float32) * (-math.log(10000.0) / HID))
    pe = jnp.zeros((S, HID), jnp.float32)
    pe = pe.at[:, 0::2].set(jnp.sin(pos * div))
    pe = pe.at[:, 1::2].set(jnp.cos(pos * div))
    p['pe'] = pe
    return p


# =================================== main ===================================
if __name__ == "__main__":
    key = jax.random.PRNGKey(0)
    k = jax.random.split(key, 8)

    # nav_imgs is represented post-backbone: (B, N, conv_hidden, H, W) feature maps.
    nav_feat_maps = jax.random.normal(k[0], (B, N, CH, HS, WS), jnp.float32)
    navigable_ang_feat = jax.random.normal(k[1], (B, N, ANG), jnp.float32)
    pre_feat = jax.random.normal(k[2], (B, F), jnp.float32)
    question = jax.random.normal(k[3], (B, HID), jnp.float32)      # unused (parity)
    h_0 = jax.random.normal(k[4], (B, HID), jnp.float32)
    c_0 = jax.random.normal(k[5], (B, HID), jnp.float32)
    ctx = jax.random.normal(k[6], (B, S, HID), jnp.float32)
    pre_ctx_attend = jnp.zeros((B, HID), jnp.float32)               # unused (parity)
    navigable_index = [[0, 1, 2], [0]]                              # lengths + 1 -> [4, 2]
    ctx_mask = jnp.array([[1.0] * S, [1.0] * 6 + [0.0] * 2], jnp.float32)  # 1 = valid token

    params = init_params(jax.random.PRNGKey(42))

    outs = self_monitoring_forward(params, nav_feat_maps, navigable_ang_feat,
                                   pre_feat, question, h_0, c_0, ctx,
                                   pre_ctx_attend,
                                   navigable_index=navigable_index,
                                   ctx_mask=ctx_mask)
    jax.block_until_ready(outs)
    print("KERNEL_OK")
</pallas_src>

<mosaic_0001>
module attributes {stable_mosaic.version = 11 : i64} {
  func.func @fused_kernel(%arg0: memref<8x4x4x8xf32, #tpu.memory_space<vmem>>, %arg1: memref<2x4x8xf32, #tpu.memory_space<vmem>>, %arg2: memref<2x16xf32, #tpu.memory_space<vmem>>, %arg3: memref<2x32xf32, #tpu.memory_space<vmem>>, %arg4: memref<2x32xf32, #tpu.memory_space<vmem>>, %arg5: memref<2x8x32xf32, #tpu.memory_space<vmem>>, %arg6: memref<2x8xf32, #tpu.memory_space<vmem>>, %arg7: memref<2x4xf32, #tpu.memory_space<vmem>>, %arg8: memref<8x32xf32, #tpu.memory_space<vmem>>, %arg9: memref<32x32xf32, #tpu.memory_space<vmem>>, %arg10: memref<1x32xf32, #tpu.memory_space<vmem>>, %arg11: memref<2x72x8xf32, #tpu.memory_space<vmem>>, %arg12: memref<2x1x8xf32, #tpu.memory_space<vmem>>, %arg13: memref<16x32xf32, #tpu.memory_space<vmem>>, %arg14: memref<1x32xf32, #tpu.memory_space<vmem>>, %arg15: memref<32x32xf32, #tpu.memory_space<vmem>>, %arg16: memref<1x32xf32, #tpu.memory_space<vmem>>, %arg17: memref<32x32xf32, #tpu.memory_space<vmem>>, %arg18: memref<1x32xf32, #tpu.memory_space<vmem>>, %arg19: memref<96x128xf32, #tpu.memory_space<vmem>>, %arg20: memref<32x128xf32, #tpu.memory_space<vmem>>, %arg21: memref<1x128xf32, #tpu.memory_space<vmem>>, %arg22: memref<1x128xf32, #tpu.memory_space<vmem>>, %arg23: memref<64x32xf32, #tpu.memory_space<vmem>>, %arg24: memref<1x32xf32, #tpu.memory_space<vmem>>, %arg25: memref<64x32xf32, #tpu.memory_space<vmem>>, %arg26: memref<1x32xf32, #tpu.memory_space<vmem>>, %arg27: memref<1x40xf32, #tpu.memory_space<vmem>>, %arg28: memref<1x1xf32, #tpu.memory_space<vmem>>, %arg29: memref<2x256xf32, #tpu.memory_space<vmem>>) attributes {dimension_semantics = [], scalar_prefetch = 0 : i64, scratch_operands = 0 : i64, tpu.core_type = #tpu.core_type<tc>} {
    %c0 = arith.constant 0 : index
    %c0_0 = arith.constant 0 : index
    %0 = vector.load %arg3[%c0, %c0_0] : memref<2x32xf32, #tpu.memory_space<vmem>>, vector<2x32xf32>
    %c0_1 = arith.constant 0 : index
    %c0_2 = arith.constant 0 : index
    %1 = vector.load %arg4[%c0_1, %c0_2] : memref<2x32xf32, #tpu.memory_space<vmem>>, vector<2x32xf32>
    %c0_3 = arith.constant 0 : index
    %c0_4 = arith.constant 0 : index
    %2 = vector.load %arg9[%c0_3, %c0_4] : memref<32x32xf32, #tpu.memory_space<vmem>>, vector<32x32xf32>
    %cst = arith.constant dense<0.000000e+00> : vector<2x32xf32>
    %3 = tpu.matmul %0, %2, %cst {dimension_numbers = #tpu.dot_dimension_numbers<[1], [0], [0], [1], [0, 0, 1, 1], [], []>} : vector<2x32xf32>, vector<32x32xf32>, vector<2x32xf32> -> vector<2x32xf32>
    %c0_5 = arith.constant 0 : index
    %c0_6 = arith.constant 0 : index
    %4 = vector.load %arg10[%c0_5, %c0_6] : memref<1x32xf32, #tpu.memory_space<vmem>>, vector<1x32xf32>
    %5 = vector.broadcast %4 : vector<1x32xf32> to vector<2x32xf32>
    %6 = arith.addf %3, %5 : vector<2x32xf32>
    %c0_7 = arith.constant 0 : index
    %c0_8 = arith.constant 0 : index
    %c0_9 = arith.constant 0 : index
    %c0_10 = arith.constant 0 : index
    %7 = vector.load %arg0[%c0_7, %c0_8, %c0_9, %c0_10] : memref<8x4x4x8xf32, #tpu.memory_space<vmem>>, vector<8x4x4x8xf32>
    %c0_11 = arith.constant 0 : index
    %c0_12 = arith.constant 0 : index
    %c0_13 = arith.constant 0 : index
    %8 = vector.load %arg11[%c0_11, %c0_12, %c0_13] : memref<2x72x8xf32, #tpu.memory_space<vmem>>, vector<2x72x8xf32>
    %c0_14 = arith.constant 0 : index
    %c0_15 = arith.constant 0 : index
    %c0_16 = arith.constant 0 : index
    %9 = vector.load %arg12[%c0_14, %c0_15, %c0_16] : memref<2x1x8xf32, #tpu.memory_space<vmem>>, vector<2x1x8xf32>
    %cst_17 = arith.constant 0.000000e+00 : f32
    %10 = vector.broadcast %cst_17 : f32 to vector<8x1x4x8xf32>
    %cst_18 = arith.constant 0.000000e+00 : f32
    %11 = vector.broadcast %cst_18 : f32 to vector<8x6x1x8xf32>
    %12 = tpu.concatenate %10, %7, %10 in 1 : vector<8x1x4x8xf32>, vector<8x4x4x8xf32>, vector<8x1x4x8xf32> -> vector<8x6x4x8xf32>
    %13 = tpu.concatenate %11, %12, %11 in 2 : vector<8x6x1x8xf32>, vector<8x6x4x8xf32>, vector<8x6x1x8xf32> -> vector<8x6x6x8xf32>
    %14 = vector.extract_strided_slice %13 {offsets = [0, 0, 0, 0], sizes = [8, 4, 4, 8], strides = [1, 1, 1, 1]} : vector<8x6x6x8xf32> to vector<8x4x4x8xf32>
    %15 = vector.extract_strided_slice %13 {offsets = [0, 0, 1, 0], sizes = [8, 4, 4, 8], strides = [1, 1, 1, 1]} : vector<8x6x6x8xf32> to vector<8x4x4x8xf32>
    %16 = vector.extract_strided_slice %13 {offsets = [0, 0, 2, 0], sizes = [8, 4, 4, 8], strides = [1, 1, 1, 1]} : vector<8x6x6x8xf32> to vector<8x4x4x8xf32>
    %17 = vector.extract_strided_slice %13 {offsets = [0, 1, 0, 0], sizes = [8, 4, 4, 8], strides = [1, 1, 1, 1]} : vector<8x6x6x8xf32> to vector<8x4x4x8xf32>
    %18 = vector.extract_strided_slice %13 {offsets = [0, 1, 1, 0], sizes = [8, 4, 4, 8], strides = [1, 1, 1, 1]} : vector<8x6x6x8xf32> to vector<8x4x4x8xf32>
    %19 = vector.extract_strided_slice %13 {offsets = [0, 1, 2, 0], sizes = [8, 4, 4, 8], strides = [1, 1, 1, 1]} : vector<8x6x6x8xf32> to vector<8x4x4x8xf32>
    %20 = vector.extract_strided_slice %13 {offsets = [0, 2, 0, 0], sizes = [8, 4, 4, 8], strides = [1, 1, 1, 1]} : vector<8x6x6x8xf32> to vector<8x4x4x8xf32>
    %21 = vector.extract_strided_slice %13 {offsets = [0, 2, 1, 0], sizes = [8, 4, 4, 8], strides = [1, 1, 1, 1]} : vector<8x6x6x8xf32> to vector<8x4x4x8xf32>
    %22 = vector.extract_strided_slice %13 {offsets = [0, 2, 2, 0], sizes = [8, 4, 4, 8], strides = [1, 1, 1, 1]} : vector<8x6x6x8xf32> to vector<8x4x4x8xf32>
    %23 = tpu.concatenate %14, %15, %16, %17, %18, %19, %20, %21, %22 in 3 : vector<8x4x4x8xf32>, vector<8x4x4x8xf32>, vector<8x4x4x8xf32>, vector<8x4x4x8xf32>, vector<8x4x4x8xf32>, vector<8x4x4x8xf32>, vector<8x4x4x8xf32>, vector<8x4x4x8xf32>, vector<8x4x4x8xf32> -> vector<8x4x4x72xf32>
    %24 = vector.shape_cast %23 : vector<8x4x4x72xf32> to vector<128x72xf32>
    %25 = vector.extract_strided_slice %8 {offsets = [0, 0, 0], sizes = [1, 72, 8], strides = [1, 1, 1]} : vector<2x72x8xf32> to vector<1x72x8xf32>
    %26 = vector.shape_cast %25 : vector<1x72x8xf32> to vector<72x8xf32>
    %cst_19 = arith.constant dense<0.000000e+00> : vector<128x8xf32>
    %27 = tpu.matmul %24, %26, %cst_19 {dimension_numbers = #tpu.dot_dimension_numbers<[1], [0], [0], [1], [0, 0, 1, 1], [], []>} : vector<128x72xf32>, vector<72x8xf32>, vector<128x8xf32> -> vector<128x8xf32>
    %28 = vector.extract_strided_slice %9 {offsets = [0, 0, 0], sizes = [1, 1, 8], strides = [1, 1, 1]} : vector<2x1x8xf32> to vector<1x1x8xf32>
    %29 = vector.shape_cast %28 : vector<1x1x8xf32> to vector<1x8xf32>
    %30 = vector.broadcast %29 : vector<1x8xf32> to vector<128x8xf32>
    %31 = arith.addf %27, %30 : vector<128x8xf32>
    %cst_20 = arith.constant 0.999994993 : f32
    %32 = vector.broadcast %cst_20 : f32 to vector<128x8xf32>
    %33 = arith.mulf %31, %32 : vector<128x8xf32>
    %34 = vector.shape_cast %33 : vector<128x8xf32> to vector<2x64x8xf32>
    %35 = vector.extract_strided_slice %6 {offsets = [0, 0], sizes = [2, 8], strides = [1, 1]} : vector<2x32xf32> to vector<2x8xf32>
    %36 = vector.extract_strided_slice %6 {offsets = [0, 8], sizes = [2, 8], strides = [1, 1]} : vector<2x32xf32> to vector<2x8xf32>
    %37 = vector.shape_cast %35 : vector<2x8xf32> to vector<2x1x8xf32>
    %38 = vector.broadcast %37 : vector<2x1x8xf32> to vector<2x64x8xf32>
    %39 = arith.mulf %38, %34 : vector<2x64x8xf32>
    %40 = vector.shape_cast %36 : vector<2x8xf32> to vector<2x1x8xf32>
    %41 = vector.broadcast %40 : vector<2x1x8xf32> to vector<2x64x8xf32>
    %42 = arith.addf %39, %41 : vector<2x64x8xf32>
    %cst_21 = arith.constant 0.000000e+00 : f32
    %43 = vector.broadcast %cst_21 : f32 to vector<2x64x8xf32>
    %44 = arith.maximumf %42, %43 : vector<2x64x8xf32>
    %45 = vector.shape_cast %7 : vector<8x4x4x8xf32> to vector<2x64x8xf32>
    %46 = arith.addf %44, %45 : vector<2x64x8xf32>
    %47 = vector.shape_cast %46 : vector<2x64x8xf32> to vector<8x4x4x8xf32>
    %48 = tpu.concatenate %10, %47, %10 in 1 : vector<8x1x4x8xf32>, vector<8x4x4x8xf32>, vector<8x1x4x8xf32> -> vector<8x6x4x8xf32>
    %49 = tpu.concatenate %11, %48, %11 in 2 : vector<8x6x1x8xf32>, vector<8x6x4x8xf32>, vector<8x6x1x8xf32> -> vector<8x6x6x8xf32>
    %50 = vector.extract_strided_slice %49 {offsets = [0, 0, 0, 0], sizes = [8, 4, 4, 8], strides = [1, 1, 1, 1]} : vector<8x6x6x8xf32> to vector<8x4x4x8xf32>
    %51 = vector.extract_strided_slice %49 {offsets = [0, 0, 1, 0], sizes = [8, 4, 4, 8], strides = [1, 1, 1, 1]} : vector<8x6x6x8xf32> to vector<8x4x4x8xf32>
    %52 = vector.extract_strided_slice %49 {offsets = [0, 0, 2, 0], sizes = [8, 4, 4, 8], strides = [1, 1, 1, 1]} : vector<8x6x6x8xf32> to vector<8x4x4x8xf32>
    %53 = vector.extract_strided_slice %49 {offsets = [0, 1, 0, 0], sizes = [8, 4, 4, 8], strides = [1, 1, 1, 1]} : vector<8x6x6x8xf32> to vector<8x4x4x8xf32>
    %54 = vector.extract_strided_slice %49 {offsets = [0, 1, 1, 0], sizes = [8, 4, 4, 8], strides = [1, 1, 1, 1]} : vector<8x6x6x8xf32> to vector<8x4x4x8xf32>
    %55 = vector.extract_strided_slice %49 {offsets = [0, 1, 2, 0], sizes = [8, 4, 4, 8], strides = [1, 1, 1, 1]} : vector<8x6x6x8xf32> to vector<8x4x4x8xf32>
    %56 = vector.extract_strided_slice %49 {offsets = [0, 2, 0, 0], sizes = [8, 4, 4, 8], strides = [1, 1, 1, 1]} : vector<8x6x6x8xf32> to vector<8x4x4x8xf32>
    %57 = vector.extract_strided_slice %49 {offsets = [0, 2, 1, 0], sizes = [8, 4, 4, 8], strides = [1, 1, 1, 1]} : vector<8x6x6x8xf32> to vector<8x4x4x8xf32>
    %58 = vector.extract_strided_slice %49 {offsets = [0, 2, 2, 0], sizes = [8, 4, 4, 8], strides = [1, 1, 1, 1]} : vector<8x6x6x8xf32> to vector<8x4x4x8xf32>
    %59 = tpu.concatenate %50, %51, %52, %53, %54, %55, %56, %57, %58 in 3 : vector<8x4x4x8xf32>, vector<8x4x4x8xf32>, vector<8x4x4x8xf32>, vector<8x4x4x8xf32>, vector<8x4x4x8xf32>, vector<8x4x4x8xf32>, vector<8x4x4x8xf32>, vector<8x4x4x8xf32>, vector<8x4x4x8xf32> -> vector<8x4x4x72xf32>
    %60 = vector.shape_cast %59 : vector<8x4x4x72xf32> to vector<128x72xf32>
    %61 = vector.extract_strided_slice %8 {offsets = [1, 0, 0], sizes = [1, 72, 8], strides = [1, 1, 1]} : vector<2x72x8xf32> to vector<1x72x8xf32>
    %62 = vector.shape_cast %61 : vector<1x72x8xf32> to vector<72x8xf32>
    %cst_22 = arith.constant dense<0.000000e+00> : vector<128x8xf32>
    %63 = tpu.matmul %60, %62, %cst_22 {dimension_numbers = #tpu.dot_dimension_numbers<[1], [0], [0], [1], [0, 0, 1, 1], [], []>} : vector<128x72xf32>, vector<72x8xf32>, vector<128x8xf32> -> vector<128x8xf32>
    %64 = vector.extract_strided_slice %9 {offsets = [1, 0, 0], sizes = [1, 1, 8], strides = [1, 1, 1]} : vector<2x1x8xf32> to vector<1x1x8xf32>
    %65 = vector.shape_cast %64 : vector<1x1x8xf32> to vector<1x8xf32>
    %66 = vector.broadcast %65 : vector<1x8xf32> to vector<128x8xf32>
    %67 = arith.addf %63, %66 : vector<128x8xf32>
    %cst_23 = arith.constant 0.999994993 : f32
    %68 = vector.broadcast %cst_23 : f32 to vector<128x8xf32>
    %69 = arith.mulf %67, %68 : vector<128x8xf32>
    %70 = vector.shape_cast %69 : vector<128x8xf32> to vector<2x64x8xf32>
    %71 = vector.extract_strided_slice %6 {offsets = [0, 16], sizes = [2, 8], strides = [1, 1]} : vector<2x32xf32> to vector<2x8xf32>
    %72 = vector.extract_strided_slice %6 {offsets = [0, 24], sizes = [2, 8], strides = [1, 1]} : vector<2x32xf32> to vector<2x8xf32>
    %73 = vector.shape_cast %71 : vector<2x8xf32> to vector<2x1x8xf32>
    %74 = vector.broadcast %73 : vector<2x1x8xf32> to vector<2x64x8xf32>
    %75 = arith.mulf %74, %70 : vector<2x64x8xf32>
    %76 = vector.shape_cast %72 : vector<2x8xf32> to vector<2x1x8xf32>
    %77 = vector.broadcast %76 : vector<2x1x8xf32> to vector<2x64x8xf32>
    %78 = arith.addf %75, %77 : vector<2x64x8xf32>
    %cst_24 = arith.constant 0.000000e+00 : f32
    %79 = vector.broadcast %cst_24 : f32 to vector<2x64x8xf32>
    %80 = arith.maximumf %78, %79 : vector<2x64x8xf32>
    %81 = vector.shape_cast %47 : vector<8x4x4x8xf32> to vector<2x64x8xf32>
    %82 = arith.addf %80, %81 : vector<2x64x8xf32>
    %83 = vector.shape_cast %82 : vector<2x64x8xf32> to vector<8x4x4x8xf32>
    %84 = vector.shape_cast %83 : vector<8x4x4x8xf32> to vector<8x16x8xf32>
    %cst_25 = arith.constant dense<0.000000e+00> : vector<8x8xf32>
    %85 = vector.multi_reduction <add>, %84, %cst_25 [1] : vector<8x16x8xf32> to vector<8x8xf32>
    %cst_26 = arith.constant 1.600000e+01 : f32
    %86 = vector.broadcast %cst_26 : f32 to vector<8x8xf32>
    %87 = arith.divf %85, %86 : vector<8x8xf32>
    %88 = vector.shape_cast %87 : vector<8x8xf32> to vector<2x4x8xf32>
    %c0_27 = arith.constant 0 : index
    %c0_28 = arith.constant 0 : index
    %c0_29 = arith.constant 0 : index
    %89 = vector.load %arg1[%c0_27, %c0_28, %c0_29] : memref<2x4x8xf32, #tpu.memory_space<vmem>>, vector<2x4x8xf32>
    %90 = tpu.concatenate %88, %89 in 2 : vector<2x4x8xf32>, vector<2x4x8xf32> -> vector<2x4x16xf32>
    %c0_30 = arith.constant 0 : index
    %c0_31 = arith.constant 0 : index
    %91 = vector.load %arg7[%c0_30, %c0_31] : memref<2x4xf32, #tpu.memory_space<vmem>>, vector<2x4xf32>
    %92 = vector.shape_cast %90 : vector<2x4x16xf32> to vector<8x16xf32>
    %c0_32 = arith.constant 0 : index
    %c0_33 = arith.constant 0 : index
    %93 = vector.load %arg2[%c0_32, %c0_33] : memref<2x16xf32, #tpu.memory_space<vmem>>, vector<2x16xf32>
    %94 = tpu.concatenate %92, %93 in 0 : vector<8x16xf32>, vector<2x16xf32> -> vector<10x16xf32>
    %c0_34 = arith.constant 0 : index
    %c0_35 = arith.constant 0 : index
    %95 = vector.load %arg13[%c0_34, %c0_35] : memref<16x32xf32, #tpu.memory_space<vmem>>, vector<16x32xf32>
    %cst_36 = arith.constant dense<0.000000e+00> : vector<10x32xf32>
    %96 = tpu.matmul %94, %95, %cst_36 {dimension_numbers = #tpu.dot_dimension_numbers<[1], [0], [0], [1], [0, 0, 1, 1], [], []>} : vector<10x16xf32>, vector<16x32xf32>, vector<10x32xf32> -> vector<10x32xf32>
    %c0_37 = arith.constant 0 : index
    %c0_38 = arith.constant 0 : index
    %97 = vector.load %arg14[%c0_37, %c0_38] : memref<1x32xf32, #tpu.memory_space<vmem>>, vector<1x32xf32>
    %98 = vector.broadcast %97 : vector<1x32xf32> to vector<10x32xf32>
    %99 = arith.addf %96, %98 : vector<10x32xf32>
    %cst_39 = arith.constant 0.000000e+00 : f32
    %100 = vector.broadcast %cst_39 : f32 to vector<10x32xf32>
    %101 = arith.maximumf %99, %100 : vector<10x32xf32>
    %102 = vector.extract_strided_slice %101 {offsets = [0, 0], sizes = [8, 32], strides = [1, 1]} : vector<10x32xf32> to vector<8x32xf32>
    %103 = vector.shape_cast %102 : vector<8x32xf32> to vector<2x4x32xf32>
    %104 = vector.shape_cast %91 : vector<2x4xf32> to vector<2x4x1xf32>
    %105 = vector.broadcast %104 : vector<2x4x1xf32> to vector<2x4x32xf32>
    %106 = arith.mulf %103, %105 : vector<2x4x32xf32>
    %107 = vector.extract_strided_slice %101 {offsets = [8, 0], sizes = [2, 32], strides = [1, 1]} : vector<10x32xf32> to vector<2x32xf32>
    %c0_40 = arith.constant 0 : index
    %c0_41 = arith.constant 0 : index
    %108 = vector.load %arg17[%c0_40, %c0_41] : memref<32x32xf32, #tpu.memory_space<vmem>>, vector<32x32xf32>
    %c0_42 = arith.constant 0 : index
    %c0_43 = arith.constant 0 : index
    %109 = vector.load %arg15[%c0_42, %c0_43] : memref<32x32xf32, #tpu.memory_space<vmem>>, vector<32x32xf32>
    %110 = tpu.concatenate %108, %109 in 1 : vector<32x32xf32>, vector<32x32xf32> -> vector<32x64xf32>
    %c0_44 = arith.constant 0 : index
    %c0_45 = arith.constant 0 : index
    %111 = vector.load %arg18[%c0_44, %c0_45] : memref<1x32xf32, #tpu.memory_space<vmem>>, vector<1x32xf32>
    %c0_46 = arith.constant 0 : index
    %c0_47 = arith.constant 0 : index
    %112 = vector.load %arg16[%c0_46, %c0_47] : memref<1x32xf32, #tpu.memory_space<vmem>>, vector<1x32xf32>
    %113 = tpu.concatenate %111, %112 in 1 : vector<1x32xf32>, vector<1x32xf32> -> vector<1x64xf32>
    %cst_48 = arith.constant dense<0.000000e+00> : vector<2x64xf32>
    %114 = tpu.matmul %0, %110, %cst_48 {dimension_numbers = #tpu.dot_dimension_numbers<[1], [0], [0], [1], [0, 0, 1, 1], [], []>} : vector<2x32xf32>, vector<32x64xf32>, vector<2x64xf32> -> vector<2x64xf32>
    %115 = vector.broadcast %113 : vector<1x64xf32> to vector<2x64xf32>
    %116 = arith.addf %114, %115 : vector<2x64xf32>
    %117 = vector.extract_strided_slice %116 {offsets = [0, 0], sizes = [2, 32], strides = [1, 1]} : vector<2x64xf32> to vector<2x32xf32>
    %118 = vector.extract_strided_slice %116 {offsets = [0, 32], sizes = [2, 32], strides = [1, 1]} : vector<2x64xf32> to vector<2x32xf32>
    %c0_49 = arith.constant 0 : index
    %c0_50 = arith.constant 0 : index
    %c0_51 = arith.constant 0 : index
    %119 = vector.load %arg5[%c0_49, %c0_50, %c0_51] : memref<2x8x32xf32, #tpu.memory_space<vmem>>, vector<2x8x32xf32>
    %c0_52 = arith.constant 0 : index
    %c0_53 = arith.constant 0 : index
    %120 = vector.load %arg8[%c0_52, %c0_53] : memref<8x32xf32, #tpu.memory_space<vmem>>, vector<8x32xf32>
    %121 = vector.shape_cast %120 : vector<8x32xf32> to vector<1x8x32xf32>
    %122 = vector.broadcast %121 : vector<1x8x32xf32> to vector<2x8x32xf32>
    %123 = arith.addf %119, %122 : vector<2x8x32xf32>
    %124 = vector.shape_cast %117 : vector<2x32xf32> to vector<2x1x32xf32>
    %125 = vector.broadcast %124 : vector<2x1x32xf32> to vector<2x8x32xf32>
    %126 = arith.mulf %123, %125 : vector<2x8x32xf32>
    %cst_54 = arith.constant dense<0.000000e+00> : vector<2x8xf32>
    %127 = vector.multi_reduction <add>, %126, %cst_54 [2] : vector<2x8x32xf32> to vector<2x8xf32>
    %c0_55 = arith.constant 0 : index
    %c0_56 = arith.constant 0 : index
    %128 = vector.load %arg6[%c0_55, %c0_56] : memref<2x8xf32, #tpu.memory_space<vmem>>, vector<2x8xf32>
    %cst_57 = arith.constant 0.000000e+00 : f32
    %129 = vector.broadcast %cst_57 : f32 to vector<2x8xf32>
    %130 = arith.cmpf ogt, %128, %129 : vector<2x8xf32>
    %cst_58 = arith.constant -1.000000e+30 : f32
    %131 = vector.broadcast %cst_58 : f32 to vector<2x8xf32>
    %132 = arith.select %130, %127, %131 : vector<2x8xi1>, vector<2x8xf32>
    %cst_59 = arith.constant dense<0xFF800000> : vector<2xf32>
    %133 = vector.multi_reduction <maximumf>, %132, %cst_59 [1] : vector<2x8xf32> to vector<2xf32>
    %134 = vector.shape_cast %133 : vector<2xf32> to vector<2x1xf32>
    %135 = vector.broadcast %134 : vector<2x1xf32> to vector<2x8xf32>
    %136 = arith.subf %132, %135 : vector<2x8xf32>
    %137 = math.exp %136 : vector<2x8xf32>
    %cst_60 = arith.constant dense<0.000000e+00> : vector<2xf32>
    %138 = vector.multi_reduction <add>, %137, %cst_60 [1] : vector<2x8xf32> to vector<2xf32>
    %139 = vector.shape_cast %138 : vector<2xf32> to vector<2x1xf32>
    %140 = vector.broadcast %139 : vector<2x1xf32> to vector<2x8xf32>
    %141 = arith.divf %137, %140 : vector<2x8xf32>
    %142 = vector.shape_cast %141 : vector<2x8xf32> to vector<2x8x1xf32>
    %143 = vector.broadcast %142 : vector<2x8x1xf32> to vector<2x8x32xf32>
    %144 = arith.mulf %143, %123 : vector<2x8x32xf32>
    %cst_61 = arith.constant dense<0.000000e+00> : vector<2x32xf32>
    %145 = vector.multi_reduction <add>, %144, %cst_61 [1] : vector<2x8x32xf32> to vector<2x32xf32>
    %146 = vector.shape_cast %118 : vector<2x32xf32> to vector<2x1x32xf32>
    %147 = vector.broadcast %146 : vector<2x1x32xf32> to vector<2x4x32xf32>
    %148 = arith.mulf %106, %147 : vector<2x4x32xf32>
    %cst_62 = arith.constant dense<0.000000e+00> : vector<2x4xf32>
    %149 = vector.multi_reduction <add>, %148, %cst_62 [2] : vector<2x4x32xf32> to vector<2x4xf32>
    %cst_63 = arith.constant 0.000000e+00 : f32
    %150 = vector.broadcast %cst_63 : f32 to vector<2x4xf32>
    %151 = arith.cmpf ogt, %91, %150 : vector<2x4xf32>
    %cst_64 = arith.constant -1.000000e+30 : f32
    %152 = vector.broadcast %cst_64 : f32 to vector<2x4xf32>
    %153 = arith.select %151, %149, %152 : vector<2x4xi1>, vector<2x4xf32>
    %cst_65 = arith.constant dense<0xFF800000> : vector<2xf32>
    %154 = vector.multi_reduction <maximumf>, %153, %cst_65 [1] : vector<2x4xf32> to vector<2xf32>
    %155 = vector.shape_cast %154 : vector<2xf32> to vector<2x1xf32>
    %156 = vector.broadcast %155 : vector<2x1xf32> to vector<2x4xf32>
    %157 = arith.subf %153, %156 : vector<2x4xf32>
    %158 = math.exp %157 : vector<2x4xf32>
    %cst_66 = arith.constant dense<0.000000e+00> : vector<2xf32>
    %159 = vector.multi_reduction <add>, %158, %cst_66 [1] : vector<2x4xf32> to vector<2xf32>
    %160 = vector.shape_cast %159 : vector<2xf32> to vector<2x1xf32>
    %161 = vector.broadcast %160 : vector<2x1xf32> to vector<2x4xf32>
    %162 = arith.divf %158, %161 : vector<2x4xf32>
    %163 = vector.shape_cast %162 : vector<2x4xf32> to vector<2x4x1xf32>
    %164 = vector.broadcast %163 : vector<2x4x1xf32> to vector<2x4x32xf32>
    %165 = arith.mulf %164, %106 : vector<2x4x32xf32>
    %cst_67 = arith.constant dense<0.000000e+00> : vector<2x32xf32>
    %166 = vector.multi_reduction <add>, %165, %cst_67 [1] : vector<2x4x32xf32> to vector<2x32xf32>
    %167 = tpu.concatenate %107, %166, %145, %0 in 1 : vector<2x32xf32>, vector<2x32xf32>, vector<2x32xf32>, vector<2x32xf32> -> vector<2x128xf32>
    %c0_68 = arith.constant 0 : index
    %c0_69 = arith.constant 0 : index
    %168 = vector.load %arg19[%c0_68, %c0_69] : memref<96x128xf32, #tpu.memory_space<vmem>>, vector<96x128xf32>
    %c0_70 = arith.constant 0 : index
    %c0_71 = arith.constant 0 : index
    %169 = vector.load %arg20[%c0_70, %c0_71] : memref<32x128xf32, #tpu.memory_space<vmem>>, vector<32x128xf32>
    %170 = tpu.concatenate %168, %169 in 0 : vector<96x128xf32>, vector<32x128xf32> -> vector<128x128xf32>
    %cst_72 = arith.constant dense<0.000000e+00> : vector<2x128xf32>
    %171 = tpu.matmul %167, %170, %cst_72 {dimension_numbers = #tpu.dot_dimension_numbers<[1], [0], [0], [1], [0, 0, 1, 1], [], []>} : vector<2x128xf32>, vector<128x128xf32>, vector<2x128xf32> -> vector<2x128xf32>
    %c0_73 = arith.constant 0 : index
    %c0_74 = arith.constant 0 : index
    %172 = vector.load %arg21[%c0_73, %c0_74] : memref<1x128xf32, #tpu.memory_space<vmem>>, vector<1x128xf32>
    %173 = vector.broadcast %172 : vector<1x128xf32> to vector<2x128xf32>
    %174 = arith.addf %171, %173 : vector<2x128xf32>
    %c0_75 = arith.constant 0 : index
    %c0_76 = arith.constant 0 : index
    %175 = vector.load %arg22[%c0_75, %c0_76] : memref<1x128xf32, #tpu.memory_space<vmem>>, vector<1x128xf32>
    %176 = vector.broadcast %175 : vector<1x128xf32> to vector<2x128xf32>
    %177 = arith.addf %174, %176 : vector<2x128xf32>
    %178 = vector.extract_strided_slice %177 {offsets = [0, 0], sizes = [2, 32], strides = [1, 1]} : vector<2x128xf32> to vector<2x32xf32>
    %179 = arith.negf %178 : vector<2x32xf32>
    %180 = math.exp %179 : vector<2x32xf32>
    %cst_77 = arith.constant 1.000000e+00 : f32
    %181 = vector.broadcast %cst_77 : f32 to vector<2x32xf32>
    %182 = arith.addf %181, %180 : vector<2x32xf32>
    %183 = arith.divf %181, %182 : vector<2x32xf32>
    %184 = vector.extract_strided_slice %177 {offsets = [0, 32], sizes = [2, 32], strides = [1, 1]} : vector<2x128xf32> to vector<2x32xf32>
    %185 = arith.negf %184 : vector<2x32xf32>
    %186 = math.exp %185 : vector<2x32xf32>
    %cst_78 = arith.constant 1.000000e+00 : f32
    %187 = vector.broadcast %cst_78 : f32 to vector<2x32xf32>
    %188 = arith.addf %187, %186 : vector<2x32xf32>
    %189 = arith.divf %187, %188 : vector<2x32xf32>
    %190 = vector.extract_strided_slice %177 {offsets = [0, 64], sizes = [2, 32], strides = [1, 1]} : vector<2x128xf32> to vector<2x32xf32>
    %191 = math.tanh %190 : vector<2x32xf32>
    %192 = vector.extract_strided_slice %177 {offsets = [0, 96], sizes = [2, 32], strides = [1, 1]} : vector<2x128xf32> to vector<2x32xf32>
    %193 = arith.negf %192 : vector<2x32xf32>
    %194 = math.exp %193 : vector<2x32xf32>
    %cst_79 = arith.constant 1.000000e+00 : f32
    %195 = vector.broadcast %cst_79 : f32 to vector<2x32xf32>
    %196 = arith.addf %195, %194 : vector<2x32xf32>
    %197 = arith.divf %195, %196 : vector<2x32xf32>
    %198 = arith.mulf %189, %1 : vector<2x32xf32>
    %199 = arith.mulf %183, %191 : vector<2x32xf32>
    %200 = arith.addf %198, %199 : vector<2x32xf32>
    %201 = math.tanh %200 : vector<2x32xf32>
    %202 = arith.mulf %197, %201 : vector<2x32xf32>
    %203 = tpu.concatenate %145, %202 in 1 : vector<2x32xf32>, vector<2x32xf32> -> vector<2x64xf32>
    %c0_80 = arith.constant 0 : index
    %c0_81 = arith.constant 0 : index
    %204 = vector.load %arg23[%c0_80, %c0_81] : memref<64x32xf32, #tpu.memory_space<vmem>>, vector<64x32xf32>
    %cst_82 = arith.constant dense<0.000000e+00> : vector<2x32xf32>
    %205 = tpu.matmul %203, %204, %cst_82 {dimension_numbers = #tpu.dot_dimension_numbers<[1], [0], [0], [1], [0, 0, 1, 1], [], []>} : vector<2x64xf32>, vector<64x32xf32>, vector<2x32xf32> -> vector<2x32xf32>
    %c0_83 = arith.constant 0 : index
    %c0_84 = arith.constant 0 : index
    %206 = vector.load %arg24[%c0_83, %c0_84] : memref<1x32xf32, #tpu.memory_space<vmem>>, vector<1x32xf32>
    %207 = vector.broadcast %206 : vector<1x32xf32> to vector<2x32xf32>
    %208 = arith.addf %205, %207 : vector<2x32xf32>
    %209 = vector.shape_cast %208 : vector<2x32xf32> to vector<2x1x32xf32>
    %210 = vector.broadcast %209 : vector<2x1x32xf32> to vector<2x4x32xf32>
    %211 = arith.mulf %106, %210 : vector<2x4x32xf32>
    %cst_85 = arith.constant dense<0.000000e+00> : vector<2x4xf32>
    %212 = vector.multi_reduction <add>, %211, %cst_85 [2] : vector<2x4x32xf32> to vector<2x4xf32>
    %213 = tpu.concatenate %0, %166 in 1 : vector<2x32xf32>, vector<2x32xf32> -> vector<2x64xf32>
    %c0_86 = arith.constant 0 : index
    %c0_87 = arith.constant 0 : index
    %214 = vector.load %arg25[%c0_86, %c0_87] : memref<64x32xf32, #tpu.memory_space<vmem>>, vector<64x32xf32>
    %cst_88 = arith.constant dense<0.000000e+00> : vector<2x32xf32>
    %215 = tpu.matmul %213, %214, %cst_88 {dimension_numbers = #tpu.dot_dimension_numbers<[1], [0], [0], [1], [0, 0, 1, 1], [], []>} : vector<2x64xf32>, vector<64x32xf32>, vector<2x32xf32> -> vector<2x32xf32>
    %c0_89 = arith.constant 0 : index
    %c0_90 = arith.constant 0 : index
    %216 = vector.load %arg26[%c0_89, %c0_90] : memref<1x32xf32, #tpu.memory_space<vmem>>, vector<1x32xf32>
    %217 = vector.broadcast %216 : vector<1x32xf32> to vector<2x32xf32>
    %218 = arith.addf %215, %217 : vector<2x32xf32>
    %219 = arith.negf %218 : vector<2x32xf32>
    %220 = math.exp %219 : vector<2x32xf32>
    %cst_91 = arith.constant 1.000000e+00 : f32
    %221 = vector.broadcast %cst_91 : f32 to vector<2x32xf32>
    %222 = arith.addf %221, %220 : vector<2x32xf32>
    %223 = arith.divf %221, %222 : vector<2x32xf32>
    %224 = math.tanh %200 : vector<2x32xf32>
    %225 = arith.mulf %223, %224 : vector<2x32xf32>
    %226 = tpu.concatenate %141, %225 in 1 : vector<2x8xf32>, vector<2x32xf32> -> vector<2x40xf32>
    %c0_92 = arith.constant 0 : index
    %c0_93 = arith.constant 0 : index
    %227 = vector.load %arg27[%c0_92, %c0_93] : memref<1x40xf32, #tpu.memory_space<vmem>>, vector<1x40xf32>
    %228 = vector.broadcast %227 : vector<1x40xf32> to vector<2x40xf32>
    %229 = arith.mulf %226, %228 : vector<2x40xf32>
    %cst_94 = arith.constant dense<0.000000e+00> : vector<2xf32>
    %230 = vector.multi_reduction <add>, %229, %cst_94 [1] : vector<2x40xf32> to vector<2xf32>
    %231 = vector.shape_cast %230 : vector<2xf32> to vector<2x1xf32>
    %c0_95 = arith.constant 0 : index
    %c0_96 = arith.constant 0 : index
    %232 = vector.load %arg28[%c0_95, %c0_96] : memref<1x1xf32, #tpu.memory_space<vmem>>, vector<1x1xf32>
    %233 = vector.broadcast %232 : vector<1x1xf32> to vector<2x1xf32>
    %234 = arith.addf %231, %233 : vector<2x1xf32>
    %235 = math.tanh %234 : vector<2x1xf32>
    %236 = vector.extract_strided_slice %90 {offsets = [0, 0, 0], sizes = [2, 1, 16], strides = [1, 1, 1]} : vector<2x4x16xf32> to vector<2x1x16xf32>
    %237 = vector.shape_cast %236 : vector<2x1x16xf32> to vector<2x16xf32>
    %238 = vector.extract_strided_slice %90 {offsets = [0, 1, 0], sizes = [2, 1, 16], strides = [1, 1, 1]} : vector<2x4x16xf32> to vector<2x1x16xf32>
    %239 = vector.shape_cast %238 : vector<2x1x16xf32> to vector<2x16xf32>
    %240 = vector.extract_strided_slice %90 {offsets = [0, 2, 0], sizes = [2, 1, 16], strides = [1, 1, 1]} : vector<2x4x16xf32> to vector<2x1x16xf32>
    %241 = vector.shape_cast %240 : vector<2x1x16xf32> to vector<2x16xf32>
    %242 = vector.extract_strided_slice %90 {offsets = [0, 3, 0], sizes = [2, 1, 16], strides = [1, 1, 1]} : vector<2x4x16xf32> to vector<2x1x16xf32>
    %243 = vector.shape_cast %242 : vector<2x1x16xf32> to vector<2x16xf32>
    %244 = tpu.concatenate %237, %239, %241, %243 in 1 : vector<2x16xf32>, vector<2x16xf32>, vector<2x16xf32>, vector<2x16xf32> -> vector<2x64xf32>
    %cst_97 = arith.constant 0.000000e+00 : f32
    %245 = vector.broadcast %cst_97 : f32 to vector<2x15xf32>
    %cst_98 = arith.constant 0.000000e+00 : f32
    %246 = vector.broadcast %cst_98 : f32 to vector<2x64xf32>
    %247 = tpu.concatenate %202, %200, %145, %141, %162, %212, %235, %245, %244, %246 in 1 : vector<2x32xf32>, vector<2x32xf32>, vector<2x32xf32>, vector<2x8xf32>, vector<2x4xf32>, vector<2x4xf32>, vector<2x1xf32>, vector<2x15xf32>, vector<2x64xf32>, vector<2x64xf32> -> vector<2x256xf32>
    %c0_99 = arith.constant 0 : index
    %c0_100 = arith.constant 0 : index
    %248 = vector.load %arg29[%c0_99, %c0_100] : memref<2x256xf32, #tpu.memory_space<vmem>>, vector<2x256xf32>
    tpu.vector_store %arg29[%c0_99, %c0_100], %247 {strides = array<i32>} : memref<2x256xf32, #tpu.memory_space<vmem>>, vector<2x256xf32>,
    return
  }
}

</mosaic_0001>

<bundles_post_ra>
// kernel: tpu_custom_call.1
= control target key start
LH: loop header
LB: loop body
LE: loop exit
PB: predicated region body
PF: predicated region fallthrough
CT: control target
= control target key end

     0   :  { %s5493_s6 = smov 1   ;;  %s5494_s10 = smov 2   ;;  %s9499_s0 = inlined_call_operand.smem [shape: u32[30], index: -1, kind: input, shape index: {}] }
   0x1   :  { %s5563_s5 = sld [smem:[%s9499_s0]]   ;;  %s5495_s14 = smov 3  }
   0x2   :  { %s5568_s9 = sld [smem:[%s9499_s0 + %s5493_s6]]   ;;  %s5496_s18 = smov 4  }
   0x3   :  { %s5573_s13 = sld [smem:[%s9499_s0 + %s5494_s10]]   ;;  %s5497_s22 = smov 5  }
   0x4   :  { %s5578_s17 = sld [smem:[%s9499_s0 + %s5495_s14]]   ;;  %s5498_s26 = smov 6  }
   0x5   :  { %s5583_s21 = sld [smem:[%s9499_s0 + %s5496_s18]]   ;;  %s5499_s30 = smov 7  }
   0x6   :  { %s5588_s25 = sld [smem:[%s9499_s0 + %s5497_s22]]   ;;  %s5500_s4 = smov 8  }
   0x7   :  { %s5593_s29 = sld [smem:[%s9499_s0 + %s5498_s26]]   ;;  %s5501_s10 = smov 9  }
   0x8   :  { %s5598_s3 = sld [smem:[%s9499_s0 + %s5499_s30]]   ;;  %s5502_s15 = smov 10  }
   0x9   :  { %s5603_s8 = sld [smem:[%s9499_s0 + %s5500_s4]]   ;;  %s5503_s20 = smov 11  }
   0xa   :  { %s5608_s14 = sld [smem:[%s9499_s0 + %s5501_s10]]   ;;  %s5504_s26 = smov 12  }
   0xb   :  { %s5613_s19 = sld [smem:[%s9499_s0 + %s5502_s15]]   ;;  %s5505_s1 = smov 13  }
   0xc   :  { %s5618_s24 = sld [smem:[%s9499_s0 + %s5503_s20]]   ;;  %s5506_s7 = smov 14  }
   0xd   :  { %s5623_s30 = sld [smem:[%s9499_s0 + %s5504_s26]]   ;;  %s5507_s15 = smov 15  }
   0xe   :  { %s5628_s6 = sld [smem:[%s9499_s0 + %s5505_s1]]   ;;  %s5508_s22 = smov 16  }
   0xf   :  { %s5633_s12 = sld [smem:[%s9499_s0 + %s5506_s7]]   ;;  %s5509_s28 = smov 17  }
  0x10   :  { %9619 = sst [smem:[#allocation33_spill]] %s5608_s14  ;;  %s5510_s7 = smov 18  }
  0x11   :  { %s5638_s20 = sld [smem:[%s9499_s0 + %s5507_s15]]   ;;  %s5511_s15 = smov 19  }
  0x12   :  { %9620 = sst [smem:[#allocation34_spill]] %s5618_s24  ;;  %s5521_s1 = smov 29  }
  0x13   :  { %s5643_s27 = sld [smem:[%s9499_s0 + %s5508_s22]]   ;;  %s5512_s22 = smov 20  }
  0x14   :  { %s5648_s4 = sld [smem:[%s9499_s0 + %s5509_s28]]   ;;  %s5513_s28 = smov 21  }
  0x15   :  { %s5653_s14 = sld [smem:[%s9499_s0 + %s5510_s7]]   ;;  %s5514_s7 = smov 22  }
  0x16   :  { %s5663_s24 = sld [smem:[%s9499_s0 + %s5512_s22]]   ;;  %s5516_s22 = smov 24  }
  0x17   :  { %9621 = sst [smem:[#allocation35_spill]] %s5638_s20 }
  0x18   :  { %s5658_s20 = sld [smem:[%s9499_s0 + %s5511_s15]]   ;;  %s5515_s15 = smov 23  }
  0x1a   :  { %9622 = sst [smem:[#allocation36_spill]] %s5648_s4 }
  0x1b   :  { %9623 = sst [smem:[#allocation37_spill]] %s5653_s14 }
  0x1c   :  { %9625 = sst [smem:[#allocation39_spill]] %s5663_s24 }
  0x1d   :  { %s5668_s4 = sld [smem:[%s9499_s0 + %s5513_s28]]   ;;  %s5517_s28 = smov 25  }
  0x1e   :  { %9624 = sst [smem:[#allocation38_spill]] %s5658_s20 }
  0x1f   :  { %s5673_s14 = sld [smem:[%s9499_s0 + %s5514_s7]]   ;;  %s5518_s7 = smov 26  }
  0x20   :  { %s5678_s20 = sld [smem:[%s9499_s0 + %s5515_s15]]   ;;  %s5519_s15 = smov 27  }
  0x21   :  { %s5683_s24 = sld [smem:[%s9499_s0 + %s5516_s22]]   ;;  %s5520_s22 = smov 28  }
  0x23   :  { %9626 = sst [smem:[#allocation40_spill]] %s5668_s4 }
  0x24   :  { %s5688_s4 = sld [smem:[%s9499_s0 + %s5517_s28]]  }
  0x25   :  { %9627 = sst [smem:[#allocation41_spill]] %s5673_s14 }
  0x26   :  { %9628 = sst [smem:[#allocation42_spill]] %s5678_s20 }
  0x27   :  { %9629 = sst [smem:[#allocation43_spill]] %s5683_s24 }
  0x28   :  { %s5693_s14 = sld [smem:[%s9499_s0 + %s5518_s7]]  }
  0x29   :  { %s5698_s20 = sld [smem:[%s9499_s0 + %s5519_s15]]  }
  0x2a   :  { %9630 = sst [smem:[#allocation44_spill]] %s5688_s4 }
  0x2b   :  { %s4602_s24 = sld [smem:[%s9499_s0 + %s5520_s22]]  }
  0x2c   :  { %s5706_s4 = sld [smem:[%s9499_s0 + %s5521_s1]]  }
  0x31   :  { %v64_v0 = vstv %s4602_s24 }
  0x32   :  { %65 = vst [vmem:[#allocation2] sm:$0x1] %v64_v0 }
  0x33   :  { %66 = vsyncpa [#allocation4], 0 }
  0x34   :  { %67 = vsyncpa [#allocation7], 0 }
  0x35   :  { %68 = vsyncpa [#allocation10], 0 }
  0x36   :  { %69 = vsyncpa [#allocation13], 0 }
  0x37   :  { %70 = vsyncpa [#allocation16], 0 }
  0x38   :  { %71 = vsyncpa [#allocation19], 0 }
  0x39   :  { %72 = vsyncpa [#allocation22], 0 }
  0x3a   :  { %73 = vsyncpa [#allocation5], 0  ;;  %s5522_s7 = smov [#allocation6]   ;;  %s5523_s11 = smov [#allocation9]  }
  0x3b   :  { %s94_s10 = sshll.u32 %s5522_s7, 4  ;;  %s114_s15 = sshll.u32 %s5523_s11, 4  ;;  %s95_s10 = int_to_ptr.vmem [resolvable:$true] %s94_s10  ;;  %s115_s15 = int_to_ptr.vmem [resolvable:$true] %s114_s15 }
  0x3c   :  { %s5169_s0 = scalar_lea.hbm %s5573_s13, 32 }
  0x3d   :  { %p5170_p0 = scmp.ne.s32.totalorder %s5573_s13, %s5169_s0  ;;  %p5173_p1 = scmp.lt.u32.totalorder %s5169_s0, %s5573_s13 }
  0x3f   :  { %p5175_p2 = pnand %p5173_p1, %p5170_p0 }
  0x41   :  { %5178 = shalt.err (!%p5175_p2)
}
  0x42   :  { %s5179_s24 = scalar_lea.vmem %s95_s10, 32  ;;  %p5184_p4 = scmp.lt.s32.totalorder %s95_s10, %s95_s10 }
  0x43   :  { %p5180_p3 = scmp.ne.s32.totalorder %s95_s10, %s5179_s24  ;;  %p5185_p5 = scmp.lt.s32.totalorder %s5179_s24, %s5179_s24 }
  0x45   :  { %p5186_p6 = por %p5185_p5, %p5184_p4 }
  0x47   :  { %p5187_p7 = pnand %p5186_p6, %p5180_p3 }
  0x49   :  { %5190 = shalt.err (!%p5187_p7)
}
  0x4a   :  { %97 = dma.hbm_to_vmem [thread:$0]  %s5573_s13, 32, %s95_s10, [#allocation7]  }
  0x4b   :  { %s5191_s16 = scalar_lea.hbm %s5583_s21, 32 }
  0x4c   :  { %p5192_p8 = scmp.ne.s32.totalorder %s5583_s21, %s5191_s16  ;;  %p5195_p9 = scmp.lt.u32.totalorder %s5191_s16, %s5583_s21 }
  0x4e   :  { %p5197_p10 = pnand %p5195_p9, %p5192_p8 }
  0x50   :  { %5200 = shalt.err (!%p5197_p10)
}
  0x51   :  { %s5201_s18 = scalar_lea.vmem %s115_s15, 32  ;;  %p5206_p12 = scmp.lt.s32.totalorder %s115_s15, %s115_s15 }
  0x52   :  { %p5202_p11 = scmp.ne.s32.totalorder %s115_s15, %s5201_s18  ;;  %p5207_p13 = scmp.lt.s32.totalorder %s5201_s18, %s5201_s18 }
  0x54   :  { %p5208_p0 = por %p5207_p13, %p5206_p12 }
  0x56   :  { %p5209_p1 = pnand %p5208_p0, %p5202_p11 }
  0x58   :  { %5212 = shalt.err (!%p5209_p1)
}
  0x59   :  { %117 = dma.hbm_to_vmem [thread:$0]  %s5583_s21, 32, %s115_s15, [#allocation10]  }
  0x5a   :  { %s5524_s22 = smov [#allocation12]   ;;  %s5525_s13 = smov [#allocation15]  }
  0x5b   :  { %s136_s23 = sshll.u32 %s5524_s22, 4  ;;  %s156_s26 = sshll.u32 %s5525_s13, 4  ;;  %s137_s23 = int_to_ptr.vmem [resolvable:$true] %s136_s23  ;;  %s157_s26 = int_to_ptr.vmem [resolvable:$true] %s156_s26 }
  0x5c   :  { %s5213_s1 = scalar_lea.hbm %s5593_s29, 32 }
  0x5d   :  { %p5214_p2 = scmp.ne.s32.totalorder %s5593_s29, %s5213_s1  ;;  %p5217_p3 = scmp.lt.u32.totalorder %s5213_s1, %s5593_s29 }
  0x5f   :  { %p5219_p4 = pnand %p5217_p3, %p5214_p2 }
  0x61   :  { %5222 = shalt.err (!%p5219_p4)
}
  0x62   :  { %s5223_s28 = scalar_lea.vmem %s137_s23, 32  ;;  %p5228_p6 = scmp.lt.s32.totalorder %s137_s23, %s137_s23 }
  0x63   :  { %p5224_p5 = scmp.ne.s32.totalorder %s137_s23, %s5223_s28  ;;  %p5229_p7 = scmp.lt.s32.totalorder %s5223_s28, %s5223_s28 }
  0x65   :  { %p5230_p8 = por %p5229_p7, %p5228_p6 }
  0x67   :  { %p5231_p9 = pnand %p5230_p8, %p5224_p5 }
  0x69   :  { %5234 = shalt.err (!%p5231_p9)
}
  0x6a   :  { %139 = dma.hbm_to_vmem [thread:$0]  %s5593_s29, 32, %s137_s23, [#allocation13]  }
  0x6b   :  { %s5235_s21 = scalar_lea.hbm %s5603_s8, 128 }
  0x6c   :  { %p5236_p10 = scmp.ne.s32.totalorder %s5603_s8, %s5235_s21  ;;  %p5239_p11 = scmp.lt.u32.totalorder %s5235_s21, %s5603_s8 }
  0x6e   :  { %p5241_p12 = pnand %p5239_p11, %p5236_p10 }
  0x70   :  { %5244 = shalt.err (!%p5241_p12)
}
  0x71   :  { %s5245_s2 = scalar_lea.vmem %s157_s26, 128  ;;  %p5250_p0 = scmp.lt.s32.totalorder %s157_s26, %s157_s26 }
  0x72   :  { %p5246_p13 = scmp.ne.s32.totalorder %s157_s26, %s5245_s2  ;;  %p5251_p1 = scmp.lt.s32.totalorder %s5245_s2, %s5245_s2 }
  0x74   :  { %p5252_p2 = por %p5251_p1, %p5250_p0 }
  0x76   :  { %p5253_p3 = pnand %p5252_p2, %p5246_p13 }
  0x78   :  { %5256 = shalt.err (!%p5253_p3)
}
  0x79   :  { %159 = dma.hbm_to_vmem [thread:$0]  %s5603_s8, 128, %s157_s26, [#allocation16]  }
  0x7a   :  { %s5526_s7 = smov [#allocation18]   ;;  %s5257_s29 = scalar_lea.hbm %s5623_s30, 32 }
  0x7b   :  { %s179_s10 = sshll.u32 %s5526_s7, 4  ;;  %p5258_p4 = scmp.ne.s32.totalorder %s5623_s30, %s5257_s29  ;;  %s180_s10 = int_to_ptr.vmem [resolvable:$true] %s179_s10 }
  0x7c   :  { %p5261_p5 = scmp.lt.u32.totalorder %s5257_s29, %s5623_s30 }
  0x7e   :  { %p5263_p6 = pnand %p5261_p5, %p5258_p4 }
  0x80   :  { %5266 = shalt.err (!%p5263_p6)
}
  0x81   :  { %s5267_s11 = scalar_lea.vmem %s180_s10, 32  ;;  %p5272_p8 = scmp.lt.s32.totalorder %s180_s10, %s180_s10 }
  0x82   :  { %p5268_p7 = scmp.ne.s32.totalorder %s180_s10, %s5267_s11  ;;  %p5273_p9 = scmp.lt.s32.totalorder %s5267_s11, %s5267_s11 }
  0x84   :  { %p5274_p10 = por %p5273_p9, %p5272_p8 }
  0x86   :  { %p5275_p11 = pnand %p5274_p10, %p5268_p7 }
  0x88   :  { %5278 = shalt.err (!%p5275_p11)
}
  0x89   :  { %s5527_s15 = smov 16   ;;  %s5528_s8 = smov 1  }
  0x8a   :  { %185 = dma.hbm_to_vmem [thread:$0]  %s5623_s30, 32, %s180_s10, [#allocation19], %s5527_s15, %s5527_s15, %s5528_s8  }
  0x8b   :  { %s5529_s0 = smov [#allocation21]   ;;  %s5530_s16 = smov [#allocation3]  }
  0x8c   :  { %s204_s24 = sshll.u32 %s5529_s0, 4  ;;  %s81_s18 = sshll.u32 %s5530_s16, 4  ;;  %s205_s24 = int_to_ptr.vmem [resolvable:$true] %s204_s24  ;;  %s82_s18 = int_to_ptr.vmem [resolvable:$true] %s81_s18 }
  0x8d   :  { %s5279_s22 = scalar_lea.hbm %s5633_s12, 16 }
  0x8e   :  { %p5280_p12 = scmp.ne.s32.totalorder %s5633_s12, %s5279_s22  ;;  %p5283_p13 = scmp.lt.u32.totalorder %s5279_s22, %s5633_s12 }
  0x90   :  { %p5285_p0 = pnand %p5283_p13, %p5280_p12 }
  0x92   :  { %5288 = shalt.err (!%p5285_p0)
}
  0x93   :  { %s5289_s23 = scalar_lea.vmem %s205_s24, 16  ;;  %s5293_s13 = scalar_lea.vmem %s205_s24, 32 }
  0x94   :  { %p5290_p1 = scmp.ne.s32.totalorder %s205_s24, %s5289_s23  ;;  %p5294_p2 = scmp.lt.s32.totalorder %s205_s24, %s205_s24 }
  0x95   :  { %p5295_p3 = scmp.lt.s32.totalorder %s5293_s13, %s5289_s23 }
  0x97   :  { %p5296_p4 = por %p5295_p3, %p5294_p2 }
  0x99   :  { %p5297_p5 = pnand %p5296_p4, %p5290_p1 }
  0x9b   :  { %5300 = shalt.err (!%p5297_p5)
}
  0x9c   :  { %207 = dma.hbm_to_vmem [thread:$0]  %s5633_s12, 16, %s205_s24, [#allocation22]  }
  0x9d   :  { %s5301_s30 = scalar_lea.hbm %s5568_s9, 128 }
  0x9e   :  { %p5302_p6 = scmp.ne.s32.totalorder %s5568_s9, %s5301_s30  ;;  %p5305_p7 = scmp.lt.u32.totalorder %s5301_s30, %s5568_s9 }
  0xa0   :  { %p5307_p8 = pnand %p5305_p7, %p5302_p6 }
  0xa2   :  { %5310 = shalt.err (!%p5307_p8)
}
  0xa3   :  { %s5311_s26 = scalar_lea.vmem %s82_s18, 128  ;;  %p5316_p10 = scmp.lt.s32.totalorder %s82_s18, %s82_s18 }
  0xa4   :  { %p5312_p9 = scmp.ne.s32.totalorder %s82_s18, %s5311_s26  ;;  %p5317_p11 = scmp.lt.s32.totalorder %s5311_s26, %s5311_s26 }
  0xa6   :  { %p5318_p12 = por %p5317_p11, %p5316_p10 }
  0xa8   :  { %p5319_p13 = pnand %p5318_p12, %p5312_p9 }
  0xaa   :  { %5322 = shalt.err (!%p5319_p13)
}
  0xab   :  { %s5531_s1 = smov 64   ;;  %s5532_s28 = smov 4  }
  0xac   :  { %87 = dma.hbm_to_vmem [thread:$0]  %s5568_s9, 128, %s82_s18, [#allocation4], %s5531_s1, %s5531_s1, %s5532_s28  }
  0xad   :  { %s5533_s12 = smov [#allocation8]   ;;  %s5534_s2 = smov [#allocation11]  }
  0xae   :  { %s104_s21 = sshll.u32 %s5533_s12, 4  ;;  %s123_s7 = sshll.u32 %s5534_s2, 4  ;;  %s105_s21 = int_to_ptr.vmem [resolvable:$true] %s104_s21  ;;  %s124_s7 = int_to_ptr.vmem [resolvable:$true] %s123_s7 }
  0xaf   :  { %s5323_s10 = scalar_lea.hbm %s5578_s17, 32 }
  0xb0   :  { %p5324_p0 = scmp.ne.s32.totalorder %s5578_s17, %s5323_s10  ;;  %p5327_p1 = scmp.lt.u32.totalorder %s5323_s10, %s5578_s17 }
  0xb2   :  { %p5329_p2 = pnand %p5327_p1, %p5324_p0 }
  0xb4   :  { %5332 = shalt.err (!%p5329_p2)
}
  0xb5   :  { %s5333_s29 = scalar_lea.vmem %s105_s21, 32  ;;  %p5338_p4 = scmp.lt.s32.totalorder %s105_s21, %s105_s21 }
  0xb6   :  { %p5334_p3 = scmp.ne.s32.totalorder %s105_s21, %s5333_s29  ;;  %p5339_p5 = scmp.lt.s32.totalorder %s5333_s29, %s5333_s29 }
  0xb8   :  { %p5340_p6 = por %p5339_p5, %p5338_p4 }
  0xba   :  { %p5341_p7 = pnand %p5340_p6, %p5334_p3 }
  0xbc   :  { %5344 = shalt.err (!%p5341_p7)
}
  0xbd   :  { %107 = dma.hbm_to_vmem [thread:$0]  %s5578_s17, 32, %s105_s21, [#allocation7]  }
  0xbe   :  { %s5345_s9 = scalar_lea.hbm %s5588_s25, 256 }
  0xbf   :  { %p5346_p8 = scmp.ne.s32.totalorder %s5588_s25, %s5345_s9  ;;  %p5349_p9 = scmp.lt.u32.totalorder %s5345_s9, %s5588_s25 }
  0xc1   :  { %p5351_p10 = pnand %p5349_p9, %p5346_p8 }
  0xc3   :  { %5354 = shalt.err (!%p5351_p10)
}
  0xc4   :  { %s5355_s11 = scalar_lea.vmem %s124_s7, 256  ;;  %p5360_p12 = scmp.lt.s32.totalorder %s124_s7, %s124_s7 }
  0xc5   :  { %p5356_p11 = scmp.ne.s32.totalorder %s124_s7, %s5355_s11  ;;  %p5361_p13 = scmp.lt.s32.totalorder %s5355_s11, %s5355_s11 }
  0xc7   :  { %p5362_p0 = por %p5361_p13, %p5360_p12 }
  0xc9   :  { %p5363_p1 = pnand %p5362_p0, %p5356_p11 }
  0xcb   :  { %5366 = shalt.err (!%p5363_p1)
}
  0xcc   :  { %s5535_s8 = smov 128   ;;  %s5536_s0 = smov 8  }
  0xcd   :  { %129 = dma.hbm_to_vmem [thread:$0]  %s5588_s25, 256, %s124_s7, [#allocation10], %s5535_s8, %s5535_s8, %s5536_s0  }
  0xce   :  { %s5537_s17 = smov [#allocation14]   ;;  %s5538_s16 = smov [#allocation17]  }
  0xcf   :  { %s146_s24 = sshll.u32 %s5537_s17, 4  ;;  %s168_s18 = sshll.u32 %s5538_s16, 4  ;;  %s147_s24 = int_to_ptr.vmem [resolvable:$true] %s146_s24  ;;  %s169_s18 = int_to_ptr.vmem [resolvable:$true] %s168_s18 }
  0xd0   :  { %s5367_s22 = scalar_lea.hbm %s5598_s3, 32 }
  0xd1   :  { %p5368_p2 = scmp.ne.s32.totalorder %s5598_s3, %s5367_s22  ;;  %p5371_p3 = scmp.lt.u32.totalorder %s5367_s22, %s5598_s3 }
  0xd3   :  { %p5373_p4 = pnand %p5371_p3, %p5368_p2 }
  0xd5   :  { %5376 = shalt.err (!%p5373_p4)
}
  0xd6   :  { %s5377_s23 = scalar_lea.vmem %s147_s24, 32  ;;  %p5382_p6 = scmp.lt.s32.totalorder %s147_s24, %s147_s24 }
  0xd7   :  { %p5378_p5 = scmp.ne.s32.totalorder %s147_s24, %s5377_s23  ;;  %p5383_p7 = scmp.lt.s32.totalorder %s5377_s23, %s5377_s23 }
  0xd9   :  { %p5384_p8 = por %p5383_p7, %p5382_p6 }
  0xdb   :  { %p5385_p9 = pnand %p5384_p8, %p5378_p5 }
  0xdd   :  { %5388 = shalt.err (!%p5385_p9)
}
  0xde   :  { %149 = dma.hbm_to_vmem [thread:$0]  %s5598_s3, 32, %s147_s24, [#allocation13]  }
  0xdf   :  { %s5389_s25 = scalar_lea.hbm %s5613_s19, 16 }
  0xe0   :  { %p5390_p10 = scmp.ne.s32.totalorder %s5613_s19, %s5389_s25  ;;  %p5393_p11 = scmp.lt.u32.totalorder %s5389_s25, %s5613_s19 }
  0xe2   :  { %p5395_p12 = pnand %p5393_p11, %p5390_p10 }
  0xe4   :  { %5398 = shalt.err (!%p5395_p12)
}
  0xe5   :  { %s5399_s13 = scalar_lea.vmem %s169_s18, 16  ;;  %s5403_s30 = scalar_lea.vmem %s169_s18, 32 }
  0xe6   :  { %p5400_p13 = scmp.ne.s32.totalorder %s169_s18, %s5399_s13  ;;  %p5404_p0 = scmp.lt.s32.totalorder %s169_s18, %s169_s18 }
  0xe7   :  { %p5405_p1 = scmp.lt.s32.totalorder %s5403_s30, %s5399_s13 }
  0xe9   :  { %p5406_p2 = por %p5405_p1, %p5404_p0 }
  0xeb   :  { %p5407_p3 = pnand %p5406_p2, %p5400_p13 }
  0xed   :  { %5410 = shalt.err (!%p5407_p3)
}
  0xee   :  { %171 = dma.hbm_to_vmem [thread:$0]  %s5613_s19, 16, %s169_s18, [#allocation16]  }
  0xef   :  { %s5539_s3 = smov [#allocation20]   ;;  %s5540_s28 = smov [#allocation23]  }
  0xf0   :  { %s191_s26 = sshll.u32 %s5539_s3, 4  ;;  %s216_s12 = sshll.u32 %s5540_s28, 4  ;;  %s192_s26 = int_to_ptr.vmem [resolvable:$true] %s191_s26  ;;  %s217_s12 = int_to_ptr.vmem [resolvable:$true] %s216_s12 }
  0xf1   :  { %s5411_s21 = scalar_lea.hbm %s5628_s6, 256 }
  0xf2   :  { %p5412_p4 = scmp.ne.s32.totalorder %s5628_s6, %s5411_s21  ;;  %p5415_p5 = scmp.lt.u32.totalorder %s5411_s21, %s5628_s6 }
  0xf4   :  { %p5417_p6 = pnand %p5415_p5, %p5412_p4 }
  0xf6   :  { %5420 = shalt.err (!%p5417_p6)
}
  0xf7   :  { %s5421_s2 = scalar_lea.vmem %s192_s26, 256  ;;  %p5426_p8 = scmp.lt.s32.totalorder %s192_s26, %s192_s26 }
  0xf8   :  { %p5422_p7 = scmp.ne.s32.totalorder %s192_s26, %s5421_s2  ;;  %p5427_p9 = scmp.lt.s32.totalorder %s5421_s2, %s5421_s2 }
  0xfa   :  { %p5428_p10 = por %p5427_p9, %p5426_p8 }
  0xfc   :  { %p5429_p11 = pnand %p5428_p10, %p5422_p7 }
  0xfe   :  { %5432 = shalt.err (!%p5429_p11)
}
  0xff   :  { %197 = dma.hbm_to_vmem [thread:$0]  %s5628_s6, 256, %s192_s26, [#allocation19], %s5535_s8, %s5535_s8, %s5536_s0  }
 0x100   :  { %s5433_s19 = scalar_lea.hbm %s5643_s27, 16 }
 0x101   :  { %p5434_p12 = scmp.ne.s32.totalorder %s5643_s27, %s5433_s19  ;;  %p5437_p13 = scmp.lt.u32.totalorder %s5433_s19, %s5643_s27 }
 0x103   :  { %p5439_p0 = pnand %p5437_p13, %p5434_p12 }
 0x105   :  { %5442 = shalt.err (!%p5439_p0)
}
 0x106   :  { %s5443_s7 = scalar_lea.vmem %s217_s12, 16  ;;  %s5447_s10 = scalar_lea.vmem %s217_s12, 32 }
 0x107   :  { %p5444_p1 = scmp.ne.s32.totalorder %s217_s12, %s5443_s7  ;;  %p5448_p2 = scmp.lt.s32.totalorder %s217_s12, %s217_s12 }
 0x108   :  { %p5449_p3 = scmp.lt.s32.totalorder %s5447_s10, %s5443_s7 }
 0x10a   :  { %p5450_p4 = por %p5449_p3, %p5448_p2 }
 0x10c   :  { %p5451_p5 = pnand %p5450_p4, %p5444_p1 }
 0x10e   :  { %5454 = shalt.err (!%p5451_p5)
}
 0x10f   :  { %219 = dma.hbm_to_vmem [thread:$0]  %s5643_s27, 16, %s217_s12, [#allocation22]  }
 0x110   :  { %5477 = dma.done.wait [#allocation4], 128  }
 0x111   :  { %5478 = vsyncadd [#allocation4], 4294967168 }
 0x112   :  { %5479 = dma.done.wait [#allocation7], 64  }
 0x113   :  { %5480 = vsyncadd [#allocation7], 4294967232 }
 0x114   :  { %5481 = dma.done.wait [#allocation10], 288  }
 0x115   :  { %5482 = vsyncadd [#allocation10], 4294967008 }
 0x116   :  { %5483 = dma.done.wait [#allocation13], 64  }
 0x117   :  { %5484 = vsyncadd [#allocation13], 4294967232 }
 0x118   :  { %5485 = dma.done.wait [#allocation16], 144  }
 0x119   :  { %5486 = vsyncadd [#allocation16], 4294967152 }
 0x11a   :  { %5487 = dma.done.wait [#allocation19], 288  }
 0x11b   :  { %5488 = vsyncadd [#allocation19], 4294967008 }
 0x11c   :  { %5489 = dma.done.wait [#allocation22], 32  }
 0x11d   :  { %5490 = vsyncadd [#allocation22], 4294967264  ;;  %vm521_vm0 = vcmask 1040384   ;;  %v9508_v1 = vmov 0.0   ;;  %vm555_vm1 = vcmask 1044480   ;;  %s5542_s6 = smov 24  }
 0x11e   :  { %v455_v2 = vrot.slane %v9508_v1, 7  ;;  %v5781_v7 = vld [vmem:[%s5563_s5 + $0x4] sm:$0xf]  ;;  %v5784_v8 = vld [vmem:[%s5563_s5] sm:$0xf]  ;;  %s5543_s27 = smov 32  }
 0x11f   :  { %9631 = vst [vmem:[#allocation45_spill] sm:$0xff] %v5781_v7  ;;  %9632 = vst [vmem:[#allocation46_spill] sm:$0xff] %v5784_v8  ;;  %v5787_v9 = vld [vmem:[%s5563_s5 + $0x8] sm:$0xf]  ;;  %v457_v10 = vrot.slane %v5781_v7, 7  ;;  %v456_v11 = vrot.slane %v5784_v8, 7 }
 0x120   :  { %v522_v3 = vsel %vm521_vm0, 0.0, %v455_v2  ;;  %9633 = vst [vmem:[#allocation47_spill] sm:$0xff] %v5787_v9  ;;  %v458_v13 = vrot.slane %v5787_v9, 7  ;;  %v5795_v14 = vld [vmem:[%s5563_s5 + $0xc] sm:$0xf]  ;;  %s5544_s29 = smov 40  }
 0x121   :  { %v5773_v4 = vsel %vm555_vm1, %v522_v3, 0.0  ;;  %9634 = vst [vmem:[#allocation48_spill] sm:$0xff] %v5795_v14  ;;  %v524_v16 = vsel %vm521_vm0, 0.0, %v457_v10  ;;  %v523_v17 = vsel %vm521_vm0, 0.0, %v456_v11  ;;  %v5819_v24 = vld [vmem:[%s5563_s5 + $0x10] sm:$0xf] }
 0x122   :  { %v614_v5 = vrot.slane %v5773_v4, 1  ;;  %v714_v6 = vrot.slane %v5773_v4, 2  ;;  %v525_v18 = vsel %vm521_vm0, 0.0, %v458_v13  ;;  %v5806_v19 = vsel %vm555_vm1, %v524_v16, 0.0  ;;  %9635 = vst [vmem:[#allocation49_spill] sm:$0xff] %v5819_v24  ;;  %s5545_s9 = smov 48  }
 0x123   :  { %v5809_v20 = vsel %vm555_vm1, %v523_v17, 0.0  ;;  %v5812_v21 = vsel %vm555_vm1, %v525_v18, 0.0  ;;  %v5815_v22 = vrot.slane %v5806_v19, 1  ;;  %v5822_v25 = vld [vmem:[%s5563_s5 + $0x14] sm:$0xf]  ;;  %v5833_v28 = vrot.slane %v5806_v19, 2 }
 0x124   :  { %639 = vrot.lane.b32.xlu0 %v614_v5, %s5536_s0  ;;  %v615_v23 = vrot.slane %v5809_v20, 1  ;;  %9636 = vst [vmem:[#allocation50_spill] sm:$0xff] %v5822_v25  ;;  %v5827_v26 = vrot.slane %v5812_v21, 1  ;;  %v5836_v29 = vld [vmem:[%s5563_s5 + $0x18] sm:$0xf]  ;;  %v715_v31 = vrot.slane %v5809_v20, 2 }
 0x125   :  { %643 = vrot.lane.b32.xlu1 %v5815_v22, %s5536_s0  ;;  %9637 = vst [vmem:[#allocation51_spill] sm:$0xff] %v5836_v29  ;;  %v5839_v30 = vld [vmem:[%s5563_s5 + $0x1c] sm:$0xf]  ;;  %v5847_v33 = vld [vmem:[%s5563_s5 + $0x20] sm:$0xf]  ;;  %v460_v39 = vrot.slane %v5819_v24, 7 }
 0x126   :  { %9638 = vst [vmem:[#allocation52_spill] sm:$0xff] %v5839_v30  ;;  %9639 = vst [vmem:[#allocation53_spill] sm:$0xff] %v5847_v33  ;;  %v5850_v34 = vld [vmem:[%s5563_s5 + $0x24] sm:$0xf]  ;;  %v5857_v36 = vld [vmem:[%s5563_s5 + $0x28] sm:$0xf] }
 0x127   :  { %9640 = vst [vmem:[#allocation54_spill] sm:$0xff] %v5850_v34  ;;  %9641 = vst [vmem:[#allocation55_spill] sm:$0xff] %v5857_v36  ;;  %v5860_v37 = vld [vmem:[%s5563_s5 + $0x2c] sm:$0xf]  ;;  %v5867_v40 = vrot.slane %v5812_v21, 2  ;;  %v459_v41 = vrot.slane %v5795_v14, 7 }
 0x128   :  { %739 = vrot.lane.b32.xlu0 %v714_v6, %s5527_s15  ;;  %9642 = vst [vmem:[#allocation56_spill] sm:$0xff] %v5860_v37  ;;  %v527_v42 = vsel %vm521_vm0, 0.0, %v460_v39  ;;  %v462_v47 = vrot.slane %v5836_v29, 7  ;;  %v461_v49 = vrot.slane %v5822_v25, 7  ;;  %s9643_s11 = sld [smem:[#allocation34_spill]]  ;;  %s5546_s8 = smov 56  }
 0x129   :  { %645 = vrot.lane.b32.xlu1 %v5827_v26, %s5536_s0  ;;  %v526_v43 = vsel %vm521_vm0, 0.0, %v459_v41  ;;  %v5879_v44 = vsel %vm555_vm1, %v527_v42, 0.0  ;;  %v5945_v60 = vld [vmem:[%s5563_s5 + $0x38] sm:$0xf]  ;;  %v5948_v61 = vld [vmem:[%s5563_s5 + $0x3c] sm:$0xf] }
 0x12a   :  { %v5885_v45 = vsel %vm555_vm1, %v526_v43, 0.0  ;;  %v618_v46 = vrot.slane %v5879_v44, 1  ;;  %v529_v50 = vsel %vm521_vm0, 0.0, %v462_v47  ;;  %v528_v52 = vsel %vm521_vm0, 0.0, %v461_v49  ;;  %9644 = vst [vmem:[#allocation57_spill] sm:$0xff] %v5945_v60  ;;  %9645 = vst [vmem:[#allocation58_spill] sm:$0xff] %v5948_v61 }
 0x12b   :  { %v918_v48 = vrot.slane %v5885_v45, 1  ;;  %v5899_v51 = vsel %vm555_vm1, %v529_v50, 0.0  ;;  %v5910_v54 = vsel %vm555_vm1, %v528_v52, 0.0  ;;  %v718_v56 = vrot.slane %v5879_v44, 2  ;;  %s9646_s17 = sld [smem:[#allocation33_spill]]  ;;  %s5550_s24 = smov 120  }
 0x12c   :  { %641 = vrot.lane.b32.xlu0 %v615_v23, %s5536_s0  ;;  %v5907_v53 = vrot.slane %v5899_v51, 1  ;;  %v5914_v55 = vrot.slane %v5910_v54, 1  ;;  %v1022_v57 = vrot.slane %v5885_v45, 2  ;;  %v5930_v58 = vrot.slane %v5910_v54, 2  ;;  %v386_v8 = vld [vmem:[%s5563_s5 + $0x40] sm:$0xf] }
 0x12d   :  { %741 = vrot.lane.b32.xlu1 %v715_v31, %s5527_s15  ;;  %v5940_v59 = vrot.slane %v5899_v51, 2  ;;  %v463_v63 = vrot.slane %v5839_v30, 7  ;;  %v464_v11 = vrot.slane %v5847_v33, 7  ;;  %v9510_v43 = vmov 0.0|0.0   ;;  %s9830_s16 = sld [smem:[#allocation36_spill]]  ;;  %s5551_s18 = smov 112  }
 0x12e   :  { %v402_v0 = vld [vmem:[%s9643_s11] sm:$0xff]  ;;  %v403_v2 = vld [vmem:[%s9643_s11 + $0x8] sm:$0xff]  ;;  %v404_v16 = vld [vmem:[%s9643_s11 + $0x10] sm:$0xff]  ;;  %4941 = vmatprep.subr.bf16.mxu0 %v9510_v43  ;;  %vm296_vm2 = vcmask 261120   ;;  %vm5548_vm3 = vmmov 0   ;;  %v471_v25 = vrot.slane %v5948_v61, 7 }
 0x12f   :  { %v530_v3 = vsel %vm521_vm0, 0.0, %v463_v63  ;;  %v4947_v10 = vpack.c.bf16 %v403_v2, %v402_v0  ;;  %v405_v17 = vld [vmem:[%s9643_s11 + $0x18] sm:$0xff]  ;;  %v406_v39 = vld [vmem:[%s9643_s11 + $0x20] sm:$0xff]  ;;  %v407_v41 = vld [vmem:[%s9643_s11 + $0x28] sm:$0xff]  ;;  %4763 = vmatprep.mubr.msk.f32.mxu0 %vm5548_vm3, %v9508_v1  ;;  %vm1351_vm4 = vcmask 64512   ;;  %vm1377_vm5 = vcmask 130048  }
 0x130   :  { %743 = vrot.lane.b32.xlu0 %v5833_v28, %s5527_s15  ;;  %v5973_v13 = vsel %vm555_vm1, %v530_v3, 0.0  ;;  %v4951_v18 = vpack.c.bf16 %v405_v17, %v404_v16  ;;  %v408_v52 = vld [vmem:[%s9643_s11 + $0x30] sm:$0xff]  ;;  %v409_v63 = vld [vmem:[%s9643_s11 + $0x38] sm:$0xff]  ;;  %v283_v2 = vld [vmem:[#allocation8] sm:$0x3]  ;;  %v466_v3 = vrot.slane %v5857_v36, 7 }
 0x131   :  { %745 = vrot.lane.b32.xlu1 %v5867_v40, %s5527_s15  ;;  %4948 = vmatprep.subr.bf16.mxu1 %v4947_v10  ;;  %v287_v47 = vld [vmem:[%s9646_s17 + $0x10] sm:$0xff]  ;;  %v4959_v0 = vpack.c.bf16 %v409_v63, %v408_v52  ;;  %v538_v9 = vsel %vm521_vm0, 0.0, %v471_v25  ;;  %vm1403_vm6 = vcmask 195584   ;;  %vm1468_vm7 = vcmask 326656   ;;  %s9834_s22 = sld [smem:[#allocation37_spill]]  ;;  %s5552_s23 = smov 96  }
 0x132   :  { %4950 = vmatpush3.bf16.msra.mxu1 %v4947_v10  ;;  %v410_v10 = vld [vmem:[%s9643_s11 + $0x40] sm:$0xff]  ;;  %v382_v52 = vld [vmem:[%s5563_s5 + $0x30] sm:$0xf]  ;;  %v6271_v61 = vsel %vm555_vm1, %v538_v9, 0.0  ;;  %vm1501_vm8 = vcmask 392192   ;;  %vm1534_vm9 = vcmask 457728  }
 0x133   :  { %4952 = vmatprep.subr.bf16.mxu1 %v4951_v18  ;;  %vm1567_vm10 = vcmask 523264   ;;  %vm1654_vm11 = vcmask 588800   ;;  %vm3550_vm12 = vcmask 195712   ;;  %vm3642_vm13 = vcmask 1041409   ;;  %s9837_s25 = sld [smem:[#allocation38_spill]]  ;;  %s9838_s13 = sld [smem:[#allocation39_spill]] }
 0x134   :  { %822 = vrot.lane.b32.xlu0 %v5809_v20, %s5542_s6  ;;  %vm3644_vm14 = vcmask 1042434   ;;  %vm3646_vm15 = vcmask 1043459   ;;  %s9839_s30 = sld [smem:[#allocation40_spill]]  ;;  %s9840_s3 = sld [smem:[#allocation41_spill]] }
 0x135   :  { %824 = vrot.lane.b32.xlu1 %v5806_v19, %s5542_s6  ;;  %s9841_s26 = sld [smem:[#allocation42_spill]]  ;;  %s9842_s28 = sld [smem:[#allocation44_spill]] }
 0x136   :  { %4954 = vmatpush3.bf16.msra.mxu1 %v4951_v18 }
 0x138   :  { %826 = vrot.lane.b32.xlu0 %v5812_v21, %s5542_s6 }
 0x139   :  { %828 = vrot.lane.b32.xlu1 %v5885_v45, %s5542_s6 }
 0x13c   :  { %926 = vrot.lane.b32.xlu0 %v615_v23, %s5543_s27  ;;  %v285_v23 = vld [vmem:[%s9646_s17] sm:$0xff] }
 0x13d   :  { %928 = vrot.lane.b32.xlu1 %v5815_v22, %s5543_s27 }
 0x140   :  { %647 = vrot.lane.b32.xlu0 %v618_v46, %s5536_s0 }
 0x141   :  { %930 = vrot.lane.b32.xlu1 %v5827_v26, %s5543_s27 }
 0x144   :  { %932 = vrot.lane.b32.xlu0 %v918_v48, %s5543_s27 }
 0x145   :  { %1030 = vrot.lane.b32.xlu1 %v715_v31, %s5544_s29 }
 0x148   :  { %1032 = vrot.lane.b32.xlu0 %v5833_v28, %s5544_s29 }
 0x149   :  { %649 = vrot.lane.b32.xlu1 %v5914_v55, %s5536_s0 }
 0x14c   :  { %651 = vrot.lane.b32.xlu0 %v5907_v53, %s5536_s0 }
 0x14d   :  { %747 = vrot.lane.b32.xlu1 %v718_v56, %s5527_s15 }
 0x150   :  { %1034 = vrot.lane.b32.xlu0 %v5867_v40, %s5544_s29 }
 0x151   :  { %1036 = vrot.lane.b32.xlu1 %v1022_v57, %s5544_s29 }
 0x154   :  { %1126 = vrot.lane.b32.xlu0 %v5806_v19, %s5545_s9 }
 0x155   :  { %1128 = vrot.lane.b32.xlu1 %v5812_v21, %s5545_s9 }
 0x158   :  { %749 = vrot.lane.b32.xlu0 %v5930_v58, %s5527_s15 }
 0x159   :  { %751 = vrot.lane.b32.xlu1 %v5940_v59, %s5527_s15 }
 0x15c   :  { %830 = vrot.lane.b32.xlu0 %v5879_v44, %s5542_s6 }
 0x15d   :  { %832 = vrot.lane.b32.xlu1 %v5910_v54, %s5542_s6 }
 0x160   :  { %1130 = vrot.lane.b32.xlu0 %v5885_v45, %s5545_s9  ;;  %v1023_v45 = vrot.slane %v5973_v13, 2 }
 0x161   :  { %1132 = vrot.lane.b32.xlu1 %v5773_v4, %s5545_s9 }
 0x164   :  { %1201 = vrot.lane.b32.xlu0 %v5815_v22, %s5546_s8  ;;  %v531_v22 = vsel %vm521_vm0, 0.0, %v464_v11  ;;  %v533_v11 = vsel %vm521_vm0, 0.0, %v466_v3  ;;  %v468_v3 = vrot.slane %v382_v52, 7 }
 0x165   :  { %1203 = vrot.lane.b32.xlu1 %v5827_v26, %s5546_s8  ;;  %v286_v26 = vld [vmem:[%s9646_s17 + $0x8] sm:$0xff]  ;;  %v5986_v42 = vsel %vm555_vm1, %v531_v22, 0.0 }
 0x166   :  { %v4942_v31 = vpack.c.bf16 %v286_v26, %v285_v23  ;;  %9647 = vst [vmem:[#allocation59_spill] sm:$0xff] %v5986_v42  ;;  %v621_v49 = vrot.slane %v5986_v42, 1  ;;  %v6055_v23 = vld [vmem:[%s5563_s5 + $0x4c] sm:$0xf] }
 0x167   :  { %9651 = vst [vmem:[#allocation63_spill] sm:$0xff] %v6055_v23 }
 0x168   :  { %834 = vrot.lane.b32.xlu0 %v5899_v51, %s5542_s6  ;;  %4943 = vmatpush3.bf16.msra.mxu0 %v4942_v31 }
 0x169   :  { %836 = vrot.lane.b32.xlu1 %v5973_v13, %s5542_s6  ;;  %4944 = vmatprep.subr.bf16.mxu0 %v9510_v43 }
 0x16c   :  { %934 = vrot.lane.b32.xlu0 %v618_v46, %s5543_s27  ;;  %v4955_v46 = vpack.c.bf16 %v407_v41, %v406_v39 }
 0x16d   :  { %936 = vrot.lane.b32.xlu1 %v5914_v55, %s5543_s27 }
 0x16e   :  { %4956 = vmatprep.subr.bf16.mxu1 %v4955_v46 }
 0x16f   :  { %4958 = vmatpush3.bf16.msra.mxu1 %v4955_v46  ;;  %v467_v46 = vrot.slane %v5860_v37, 7 }
 0x170   :  { %1205 = vrot.lane.b32.xlu0 %v918_v48, %s5546_s8  ;;  %v288_v48 = vld [vmem:[%s9646_s17 + $0x18] sm:$0xff]  ;;  %4960 = vmatprep.subr.bf16.mxu1 %v4959_v0 }
 0x171   :  { %v4945_v50 = vpack.c.bf16 %v288_v48, %v287_v47  ;;  %1207 = vrot.lane.b32.xlu1 %v614_v5, %s5546_s8  ;;  %v465_v5 = vrot.slane %v5850_v34, 7 }
 0x173   :  { %4946 = vmatpush3.bf16.msra.mxu0 %v4945_v50  ;;  %4962 = vmatpush3.bf16.msra.mxu1 %v4959_v0  ;;  %v532_v16 = vsel %vm521_vm0, 0.0, %v465_v5  ;;  %v534_v50 = vsel %vm521_vm0, 0.0, %v467_v46  ;;  %v383_v46 = vld [vmem:[%s5563_s5 + $0x34] sm:$0xf] }
 0x174   :  { %1276 = vrot.lane.b32.xlu0 %v5833_v28, %s5531_s1  ;;  %v919_v28 = vrot.slane %v5973_v13, 1  ;;  %4782 = vmatprep.subr.mxu1 %v410_v10  ;;  %v6036_v18 = vsel %vm555_vm1, %v532_v16, 0.0  ;;  %v6102_v0 = vsel %vm555_vm1, %v534_v50, 0.0  ;;  %v469_v1 = vrot.slane %v383_v46, 7 }
 0x175   :  { %1278 = vrot.lane.b32.xlu1 %v5867_v40, %s5531_s1  ;;  %v6023_v40 = vsel %vm555_vm1, %v533_v11, 0.0  ;;  %9649 = vst [vmem:[#allocation61_spill] sm:$0xff] %v6036_v18  ;;  %v6042_v22 = vrot.slane %v6036_v18, 1  ;;  %v6066_v26 = vrot.slane %v6036_v18, 2 }
 0x176   :  { %4764 = vmatmul.mubr.msk.f32.vlgmr.msra.gmra.mrb[0].mxu0 %vm296_vm2, %v283_v2  ;;  %9648 = vst [vmem:[#allocation60_spill] sm:$0xff] %v6023_v40  ;;  %v6033_v17 = vrot.slane %v6023_v40, 1  ;;  %v6078_v39 = vrot.slane %v6023_v40, 2  ;;  %v536_v43 = vsel %vm521_vm0, 0.0, %v469_v1 }
 0x177   :  { %4783 = vmatpush3.msra.mxu1 %v410_v10  ;;  %v6157_v46 = vsel %vm555_vm1, %v536_v43, 0.0 }
 0x178   :  { %653 = vrot.lane.b32.xlu0 %v621_v49, %s5536_s0  ;;  %9652 = vst [vmem:[#allocation64_spill] sm:$0xff] %v6157_v46  ;;  %v6167_v1 = vrot.slane %v6157_v46, 1  ;;  %v6230_v37 = vrot.slane %v6157_v46, 2 }
 0x179   :  { %938 = vrot.lane.b32.xlu1 %v5907_v53, %s5543_s27 }
 0x17c   :  { %940 = vrot.lane.b32.xlu0 %v919_v28, %s5543_s27 }
 0x17d   :  { %1038 = vrot.lane.b32.xlu1 %v718_v56, %s5544_s29  ;;  %v6052_v56 = vld [vmem:[%s5563_s5 + $0x48] sm:$0xf] }
 0x17e   :  { %9650 = vst [vmem:[#allocation62_spill] sm:$0xff] %v6052_v56 }
 0x180   :  { %1040 = vrot.lane.b32.xlu0 %v5930_v58, %s5544_s29 }
 0x181   :  { %1280 = vrot.lane.b32.xlu1 %v1022_v57, %s5531_s1  ;;  %v470_v57 = vrot.slane %v5945_v60, 7  ;;  %v6222_v60 = vld [vmem:[%s5563_s5 + $0x58] sm:$0xf] }
 0x182   :  { %9654 = vst [vmem:[#allocation66_spill] sm:$0xff] %v6222_v60 }
 0x183   :  { %v537_v38 = vsel %vm521_vm0, 0.0, %v470_v57 }
 0x184   :  { %1282 = vrot.lane.b32.xlu0 %v714_v6, %s5531_s1  ;;  %v721_v6 = vrot.slane %v5986_v42, 2  ;;  %v6181_v32 = vsel %vm555_vm1, %v537_v38, 0.0  ;;  %v9516_v38 = vrot.slane %v6102_v0, 2 }
 0x185   :  { %655 = vrot.lane.b32.xlu1 %v6042_v22, %s5536_s0  ;;  %9653 = vst [vmem:[#allocation65_spill] sm:$0xff] %v6181_v32 }
 0x188   :  { %657 = vrot.lane.b32.xlu0 %v6033_v17, %s5536_s0 }
 0x189   :  { %753 = vrot.lane.b32.xlu1 %v721_v6, %s5527_s15 }
 0x18c   :  { %1042 = vrot.lane.b32.xlu0 %v5940_v59, %s5544_s29 }
 0x18d   :  { %1044 = vrot.lane.b32.xlu1 %v1023_v45, %s5544_s29 }
 0x190   :  { %1134 = vrot.lane.b32.xlu0 %v5910_v54, %s5545_s9 }
 0x191   :  { %1136 = vrot.lane.b32.xlu1 %v5899_v51, %s5545_s9 }
 0x194   :  { %755 = vrot.lane.b32.xlu0 %v6066_v26, %s5527_s15 }
 0x195   :  { %757 = vrot.lane.b32.xlu1 %v6078_v39, %s5527_s15 }
 0x196   :  { %v6073_v31 = vpop.permute.xlu0 %639 }
 0x197   :  { %v6089_v47 = vpop.permute.xlu1 %643  ;;  %v1352_v25 = vsel %vm1351_vm4, %v5773_v4, %v6073_v31 }
 0x198   :  { %838 = vrot.lane.b32.xlu0 %v5986_v42, %s5542_s6 }
 0x199   :  { %840 = vrot.lane.b32.xlu1 %v6036_v18, %s5542_s6 }
 0x19a   :  { %v6082_v41 = vpop.permute.xlu0 %739 }
 0x19b   :  { %v6099_v63 = vpop.permute.xlu1 %645 }
 0x19c   :  { %1138 = vrot.lane.b32.xlu0 %v5973_v13, %s5545_s9 }
 0x19d   :  { %1209 = vrot.lane.b32.xlu1 %v5914_v55, %s5546_s8 }
 0x19e   :  { %v6091_v48 = vpop.permute.xlu0 %641 }
 0x19f   :  { %v6110_v10 = vpop.permute.xlu1 %741 }
 0x1a0   :  { %1211 = vrot.lane.b32.xlu0 %v5907_v53, %s5546_s8  ;;  %v535_v53 = vsel %vm521_vm0, 0.0, %v468_v3 }
 0x1a1   :  { %842 = vrot.lane.b32.xlu1 %v6023_v40, %s5542_s6  ;;  %v6122_v16 = vsel %vm555_vm1, %v535_v53, 0.0 }
 0x1a2   :  { %v6104_v2 = vpop.permute.xlu0 %743  ;;  %v9514_v50 = vrot.slane %v6122_v16, 1  ;;  %v9512_v43 = vrot.slane %v6122_v16, 2 }
 0x1a3   :  { %v6119_v11 = vpop.permute.xlu1 %745 }
 0x1a4   :  { %844 = vrot.lane.b32.xlu0 %v6102_v0, %s5542_s6 }
 0x1a5   :  { %942 = vrot.lane.b32.xlu1 %v621_v49, %s5543_s27  ;;  %v9513_v49 = vrot.slane %v6102_v0, 1 }
 0x1a6   :  { %v6112_v5 = vpop.permute.xlu0 %822 }
 0x1a7   :  { %v6133_v52 = vpop.permute.xlu1 %824 }
 0x1a8   :  { %944 = vrot.lane.b32.xlu0 %v6042_v22, %s5543_s27 }
 0x1a9   :  { %1213 = vrot.lane.b32.xlu1 %v919_v28, %s5546_s8 }
 0x1aa   :  { %v6124_v55 = vpop.permute.xlu0 %826 }
 0x1ab   :  { %v6144_v53 = vpop.permute.xlu1 %828 }
 0x1ac   :  { %1284 = vrot.lane.b32.xlu0 %v5930_v58, %s5531_s1 }
 0x1ad   :  { %1286 = vrot.lane.b32.xlu1 %v5940_v59, %s5531_s1 }
 0x1ae   :  { %v6135_v3 = vpop.permute.xlu0 %926 }
 0x1af   :  { %v6154_v28 = vpop.permute.xlu1 %928 }
 0x1b0   :  { %659 = vrot.lane.b32.xlu0 %v9514_v50, %s5536_s0 }
 0x1b1   :  { %946 = vrot.lane.b32.xlu1 %v6033_v17, %s5543_s27 }
 0x1b2   :  { %v6146_v58 = vpop.permute.xlu0 %647 }
 0x1b3   :  { %v6169_v59 = vpop.permute.xlu1 %930 }
 0x1b4   :  { %948 = vrot.lane.b32.xlu0 %v9513_v49, %s5543_s27 }
 0x1b5   :  { %1046 = vrot.lane.b32.xlu1 %v721_v6, %s5544_s29  ;;  %v6191_v6 = vrot.slane %v6181_v32, 1 }
 0x1b6   :  { %v6160_v62 = vpop.permute.xlu0 %932 }
 0x1b7   :  { %v6183_v27 = vpop.permute.xlu1 %1030 }
 0x1b8   :  { %1048 = vrot.lane.b32.xlu0 %v6066_v26, %s5544_s29 }
 0x1b9   :  { %1288 = vrot.lane.b32.xlu1 %v1023_v45, %s5531_s1 }
 0x1ba   :  { %v6172_v35 = vpop.permute.xlu0 %1032 }
 0x1bb   :  { %v6197_v57 = vpop.permute.xlu1 %649 }
 0x1bc   :  { %661 = vrot.lane.b32.xlu0 %v6167_v1, %s5536_s0 }
 0x1bd   :  { %663 = vrot.lane.b32.xlu1 %v6191_v6, %s5536_s0 }
 0x1be   :  { %v6185_v15 = vpop.permute.xlu0 %651 }
 0x1bf   :  { %v6206_v13 = vpop.permute.xlu1 %747 }
 0x1c0   :  { %759 = vrot.lane.b32.xlu0 %v9512_v43, %s5527_s15  ;;  %v6215_v43 = vrot.slane %v6181_v32, 2 }
 0x1c1   :  { %1050 = vrot.lane.b32.xlu1 %v6078_v39, %s5544_s29 }
 0x1c2   :  { %v6199_v12 = vpop.permute.xlu0 %1034 }
 0x1c3   :  { %v6217_v49 = vpop.permute.xlu1 %1036 }
 0x1c4   :  { %1052 = vrot.lane.b32.xlu0 %v9516_v38, %s5544_s29  ;;  %v6225_v38 = vld [vmem:[%s5563_s5 + $0x5c] sm:$0xf] }
 0x1c5   :  { %9655 = vst [vmem:[#allocation67_spill] sm:$0xff] %v6225_v38  ;;  %1140 = vrot.lane.b32.xlu1 %v6036_v18, %s5545_s9 }
 0x1c6   :  { %v6208_v45 = vpop.permute.xlu0 %1126 }
 0x1c7   :  { %v6236_v34 = vpop.permute.xlu1 %1128 }
 0x1c8   :  { %1142 = vrot.lane.b32.xlu0 %v6023_v40, %s5545_s9  ;;  %v472_v40 = vrot.slane %v386_v8, 7 }
 0x1c9   :  { %761 = vrot.lane.b32.xlu1 %v6230_v37, %s5527_s15 }
 0x1ca   :  { %v6219_v50 = vpop.permute.xlu0 %749  ;;  %v539_v8 = vsel %vm521_vm0, 0.0, %v472_v40  ;;  %v1353_v40 = vsel %vm1351_vm4, %v5809_v20, %v6091_v48 }
 0x1cb   :  { %v6244_v30 = vpop.permute.xlu1 %751  ;;  %v6297_v4 = vsel %vm555_vm1, %v539_v8, 0.0  ;;  %v1379_v8 = vsel %vm1377_vm5, %v1353_v40, %v6110_v10 }
 0x1cc   :  { %763 = vrot.lane.b32.xlu0 %v6215_v43, %s5527_s15  ;;  %v1405_v48 = vsel %vm1403_vm6, %v1379_v8, %v6133_v52  ;;  %v9659_v52 = vrot.slane %v6297_v4, 1 }
 0x1cd   :  { %846 = vrot.lane.b32.xlu1 %v6122_v16, %s5542_s6 }
 0x1ce   :  { %v6238_v33 = vpop.permute.xlu0 %830 }
 0x1cf   :  { %v6252_v36 = vpop.permute.xlu1 %832 }
 0x1d0   :  { %848 = vrot.lane.b32.xlu0 %v6157_v46, %s5542_s6 }
 0x1d1   :  { %1144 = vrot.lane.b32.xlu1 %v6102_v0, %s5545_s9 }
 0x1d2   :  { %v6246_v29 = vpop.permute.xlu0 %1130 }
 0x1d3   :  { %v6259_v14 = vpop.permute.xlu1 %1132 }
 0x1d4   :  { %1215 = vrot.lane.b32.xlu0 %v6042_v22, %s5546_s8  ;;  %v9657_v22 = vrot.slane %v6122_v16, 1 }
 0x1d5   :  { %1217 = vrot.lane.b32.xlu1 %v6033_v17, %s5546_s8  ;;  %v9658_v17 = vrot.slane %v6102_v0, 1 }
 0x1d6   :  { %v1202_v24 = vpop.permute.xlu0 %1201 }
 0x1d7   :  { %v1204_v18 = vpop.permute.xlu1 %1203 }
 0x1d8   :  { %850 = vrot.lane.b32.xlu0 %v6181_v32, %s5542_s6 }
 0x1d9   :  { %852 = vrot.lane.b32.xlu1 %v6271_v61, %s5542_s6 }
 0x1da   :  { %v6262_v7 = vpop.permute.xlu0 %834 }
 0x1db   :  { %9656 = vst [vmem:[#allocation68_spill] sm:$0xff] %v6262_v7  ;;  %v6283_v9 = vpop.permute.xlu1 %836  ;;  %v387_v7 = vld [vmem:[%s5563_s5 + $0x44] sm:$0xf] }
 0x1dc   :  { %950 = vrot.lane.b32.xlu0 %v9657_v22, %s5543_s27  ;;  %v6288_v22 = vsel %vm1377_vm5, %v1352_v25, %v6082_v41 }
 0x1dd   :  { %952 = vrot.lane.b32.xlu1 %v6167_v1, %s5543_s27  ;;  %v1404_v31 = vsel %vm1403_vm6, %v6288_v22, %v6112_v5 }
 0x1de   :  { %v6273_v42 = vpop.permute.xlu0 %934  ;;  %v1436_v20 = vsel %vm296_vm2, %v1404_v31, %v6135_v3 }
 0x1df   :  { %v6305_v41 = vpop.permute.xlu1 %936  ;;  %v1469_v40 = vsel %vm1468_vm7, %v1436_v20, %v6183_v27 }
 0x1e0   :  { %1219 = vrot.lane.b32.xlu0 %v9658_v17, %s5546_s8  ;;  %v474_v17 = vrot.slane %v6052_v56, 7  ;;  %v473_v56 = vrot.slane %v387_v7, 7  ;;  %v9538_v7 = vrot.slane %v6271_v61, 1 }
 0x1e1   :  { %1290 = vrot.lane.b32.xlu1 %v6066_v26, %s5531_s1  ;;  %v1437_v26 = vsel %vm296_vm2, %v1405_v48, %v6154_v28  ;;  %v1502_v28 = vsel %vm1501_vm8, %v1469_v40, %v6208_v45 }
 0x1e2   :  { %v6290_v38 = vpop.permute.xlu0 %1205  ;;  %v541_v10 = vsel %vm521_vm0, 0.0, %v474_v17  ;;  %v1470_v3 = vsel %vm1468_vm7, %v1437_v26, %v6172_v35  ;;  %v9660_v17 = vrot.slane %v6122_v16, 2  ;;  %v1535_v35 = vsel %vm1534_vm9, %v1502_v28, %v1202_v24 }
 0x1e3   :  { %v6320_v5 = vpop.permute.xlu1 %1207  ;;  %v1503_v31 = vsel %vm1501_vm8, %v1470_v3, %v6236_v34  ;;  %v6345_v20 = vsel %vm555_vm1, %v541_v10, 0.0  ;;  %v540_v48 = vsel %vm521_vm0, 0.0, %v473_v56  ;;  %v9662_v34 = vrot.slane %v6102_v0, 2 }
 0x1e4   :  { %1292 = vrot.lane.b32.xlu0 %v6078_v39, %s5531_s1  ;;  %v1536_v27 = vsel %vm1534_vm9, %v1503_v31, %v1204_v18  ;;  %9661 = vst [vmem:[#allocation69_spill] sm:$0xff] %v6345_v20  ;;  %v6359_v18 = vrot.slane %v6345_v20, 1  ;;  %v6362_v56 = vsel %vm555_vm1, %v540_v48, 0.0  ;;  %v1354_v3 = vsel %vm1351_vm4, %v5806_v19, %v6089_v47 }
 0x1e5   :  { %665 = vrot.lane.b32.xlu1 %v9659_v52, %s5536_s0  ;;  %9663 = vst [vmem:[#allocation70_spill] sm:$0xff] %v6362_v56  ;;  %v1355_v0 = vsel %vm1351_vm4, %v5812_v21, %v6099_v63  ;;  %v6378_v52 = vrot.slane %v6362_v56, 1  ;;  %v1380_v28 = vsel %vm1377_vm5, %v1354_v3, %v6104_v2 }
 0x1e6   :  { %v1277_v25 = vpop.permute.xlu0 %1276  ;;  %v1381_v31 = vsel %vm1377_vm5, %v1355_v0, %v6119_v11  ;;  %v1406_v19 = vsel %vm1403_vm6, %v1380_v28, %v6124_v55 }
 0x1e7   :  { %v1279_v8 = vpop.permute.xlu1 %1278  ;;  %v1568_v26 = vsel %vm1567_vm10, %v1535_v35, %v1277_v25  ;;  %v1407_v21 = vsel %vm1403_vm6, %v1381_v31, %v6144_v53  ;;  %v1438_v2 = vsel %vm296_vm2, %v1406_v19, %v6169_v59  ;;  %v9537_v53 = vrot.slane %v6297_v4, 2 }
 0x1e8   :  { %954 = vrot.lane.b32.xlu0 %v6191_v6, %s5543_s27  ;;  %v1569_v45 = vsel %vm1567_vm10, %v1536_v27, %v1279_v8  ;;  %v1439_v63 = vsel %vm296_vm2, %v1407_v21, %v6160_v62  ;;  %v6452_v19 = vrot.slane %v6345_v20, 2 }
 0x1e9   :  { %956 = vrot.lane.b32.xlu1 %v9538_v7, %s5543_s27  ;;  %v1638_v24 = vcombine.low %v1568_v26, %v1569_v45  ;;  %v1472_v55 = vsel %vm1468_vm7, %v1439_v63, %v6217_v49  ;;  %v6424_v26 = vld [vmem:[%s5563_s5 + $0x6c] sm:$0xf] }
 0x1ea   :  { %v6324_v39 = vpop.permute.xlu0 %653  ;;  %v1505_v59 = vsel %vm1501_vm8, %v1472_v55, %v6259_v14  ;;  %9665 = vst [vmem:[#allocation72_spill] sm:$0xff] %v6424_v26 }
 0x1eb   :  { %v6364_v25 = vpop.permute.xlu1 %938  ;;  %4784 = vmatprep.mubr.msk.f32.mxu1 %vm1654_vm11, %v1638_v24  ;;  %v1538_v49 = vsel %vm1534_vm9, %v1505_v59, %v6320_v5  ;;  %v390_v59 = vld [vmem:[%s5563_s5 + $0x50] sm:$0xf]  ;;  %v391_v24 = vld [vmem:[%s5563_s5 + $0x54] sm:$0xf] }
 0x1ec   :  { %1054 = vrot.lane.b32.xlu0 %v9660_v17, %s5544_s29  ;;  %v1471_v17 = vsel %vm1468_vm7, %v1438_v2, %v6199_v12  ;;  %v475_v2 = vrot.slane %v6055_v23, 7  ;;  %v477_v7 = vrot.slane %v391_v24, 7  ;;  %v1408_v23 = vsel %vm1403_vm6, %v6288_v22, %v6238_v33 }
 0x1ed   :  { %1056 = vrot.lane.b32.xlu1 %v6230_v37, %s5544_s29  ;;  %v1504_v62 = vsel %vm1501_vm8, %v1471_v17, %v6246_v29  ;;  %v6421_v29 = vld [vmem:[%s5563_s5 + $0x68] sm:$0xf] }
 0x1ee   :  { %v6350_v40 = vpop.permute.xlu0 %940  ;;  %v1537_v12 = vsel %vm1534_vm9, %v1504_v62, %v6290_v38  ;;  %9664 = vst [vmem:[#allocation71_spill] sm:$0xff] %v6421_v29  ;;  %v9536_v38 = vrot.slane %v6271_v61, 2  ;;  %v542_v62 = vsel %vm521_vm0, 0.0, %v475_v2 }
 0x1ef   :  { %v6390_v47 = vpop.permute.xlu1 %1038 }
 0x1f0   :  { %1294 = vrot.lane.b32.xlu0 %v9662_v34, %s5531_s1  ;;  %v6435_v34 = vrot.slane %v6362_v56, 2 }
 0x1f1   :  { %667 = vrot.lane.b32.xlu1 %v6378_v52, %s5536_s0 }
 0x1f2   :  { %v6367_v10 = vpop.permute.xlu0 %1040 }
 0x1f3   :  { %v1281_v35 = vpop.permute.xlu1 %1280 }
 0x1f4   :  { %669 = vrot.lane.b32.xlu0 %v6359_v18, %s5536_s0  ;;  %v1570_v27 = vsel %vm1567_vm10, %v1537_v12, %v1281_v35  ;;  %v6476_v35 = vsel %vm555_vm1, %v542_v62, 0.0 }
 0x1f5   :  { %765 = vrot.lane.b32.xlu1 %v9537_v53, %s5527_s15 }
 0x1f6   :  { %v6396_v11 = vpop.permute.xlu0 %1282 }
 0x1f7   :  { %v1571_v8 = vsel %vm1567_vm10, %v1538_v49, %v6396_v11  ;;  %v6437_v3 = vpop.permute.xlu1 %655 }
 0x1f8   :  { %1058 = vrot.lane.b32.xlu0 %v6215_v43, %s5544_s29  ;;  %v1639_v45 = vcombine.low %v1570_v27, %v1571_v8  ;;  %v476_v27 = vrot.slane %v390_v59, 7 }
 0x1f9   :  { %1060 = vrot.lane.b32.xlu1 %v9536_v38, %s5544_s29 }
 0x1fa   :  { %v6418_v48 = vpop.permute.xlu0 %657  ;;  %4785 = vmatmul.mubr.msk.f32.vlgmr.msra.gmra.mrb[0].mxu1 %vm1654_vm11, %v1639_v45 }
 0x1fb   :  { %v6447_v28 = vpop.permute.xlu1 %753 }
 0x1fc   :  { %1146 = vrot.lane.b32.xlu0 %v6157_v46, %s5545_s9 }
 0x1fd   :  { %1148 = vrot.lane.b32.xlu1 %v6181_v32, %s5545_s9  ;;  %v544_v32 = vsel %vm521_vm0, 0.0, %v477_v7  ;;  %v478_v7 = vrot.slane %v6222_v60, 7 }
 0x1fe   :  { %v6440_v0 = vpop.permute.xlu0 %1042 }
 0x1ff   :  { %v6456_v21 = vpop.permute.xlu1 %1044 }
 0x200   :  { %767 = vrot.lane.b32.xlu0 %v6435_v34, %s5527_s15 }
 0x201   :  { %769 = vrot.lane.b32.xlu1 %v6452_v19, %s5527_s15 }
 0x202   :  { %v1135_v31 = vpop.permute.xlu0 %1134 }
 0x203   :  { %v1137_v17 = vpop.permute.xlu1 %1136 }
 0x204   :  { %854 = vrot.lane.b32.xlu0 %v6297_v4, %s5542_s6 }
 0x205   :  { %856 = vrot.lane.b32.xlu1 %v6362_v56, %s5542_s6 }
 0x206   :  { %v6458_v63 = vpop.permute.xlu0 %755 }
 0x207   :  { %v6473_v12 = vpop.permute.xlu1 %757 }
 0x208   :  { %1150 = vrot.lane.b32.xlu0 %v6271_v61, %s5545_s9 }
 0x209   :  { %1221 = vrot.lane.b32.xlu1 %v6167_v1, %s5546_s8  ;;  %v9666_v1 = vrot.slane %v6297_v4, 1 }
 0x20a   :  { %v6465_v55 = vpop.permute.xlu0 %838 }
 0x20b   :  { %v6484_v8 = vpop.permute.xlu1 %840 }
 0x20c   :  { %1223 = vrot.lane.b32.xlu0 %v6191_v6, %s5546_s8  ;;  %v543_v6 = vsel %vm521_vm0, 0.0, %v476_v27 }
 0x20d   :  { %858 = vrot.lane.b32.xlu1 %v6345_v20, %s5542_s6  ;;  %v6492_v62 = vsel %vm555_vm1, %v543_v6, 0.0  ;;  %v9667_v6 = vrot.slane %v6271_v61, 1 }
 0x20e   :  { %v6478_v49 = vpop.permute.xlu0 %1138  ;;  %v9542_v27 = vrot.slane %v6492_v62, 1 }
 0x20f   :  { %v1210_v2 = vpop.permute.xlu1 %1209 }
 0x210   :  { %860 = vrot.lane.b32.xlu0 %v6476_v35, %s5542_s6 }
 0x211   :  { %958 = vrot.lane.b32.xlu1 %v9666_v1, %s5543_s27  ;;  %v922_v1 = vrot.slane %v6476_v35, 1 }
 0x212   :  { %v1212_v45 = vpop.permute.xlu0 %1211 }
 0x213   :  { %v6503_v38 = vpop.permute.xlu1 %842 }
 0x214   :  { %960 = vrot.lane.b32.xlu0 %v6378_v52, %s5543_s27 }
 0x215   :  { %1225 = vrot.lane.b32.xlu1 %v9667_v6, %s5546_s8 }
 0x216   :  { %v6494_v59 = vpop.permute.xlu0 %844 }
 0x217   :  { %v6520_v46 = vpop.permute.xlu1 %942 }
 0x218   :  { %1296 = vrot.lane.b32.xlu0 %v6230_v37, %s5531_s1  ;;  %v1356_v37 = vsel %vm1351_vm4, %v5879_v44, %v6146_v58  ;;  %v6535_v58 = vsel %vm555_vm1, %v544_v32, 0.0 }
 0x219   :  { %1298 = vrot.lane.b32.xlu1 %v6215_v43, %s5531_s1  ;;  %v1382_v6 = vsel %vm1377_vm5, %v1356_v37, %v6206_v13 }
 0x21a   :  { %v6505_v53 = vpop.permute.xlu0 %944  ;;  %v1409_v33 = vsel %vm1403_vm6, %v1382_v6, %v6252_v36 }
 0x21b   :  { %v1214_v44 = vpop.permute.xlu1 %1213  ;;  %v1441_v43 = vsel %vm296_vm2, %v1409_v33, %v6305_v41  ;;  %v6556_v41 = vrot.slane %v6535_v58, 1 }
 0x21c   :  { %671 = vrot.lane.b32.xlu0 %v9542_v27, %s5536_s0  ;;  %v1440_v27 = vsel %vm296_vm2, %v1408_v23, %v6273_v42  ;;  %v1358_v42 = vsel %vm1351_vm4, %v5899_v51, %v6185_v15  ;;  %v1474_v23 = vsel %vm1468_vm7, %v1441_v43, %v6367_v10 }
 0x21d   :  { %v1473_v36 = vsel %vm1468_vm7, %v1440_v27, %v6390_v47  ;;  %962 = vrot.lane.b32.xlu1 %v6359_v18, %s5543_s27  ;;  %v1507_v37 = vsel %vm1501_vm8, %v1474_v23, %v1137_v17  ;;  %v545_v47 = vsel %vm521_vm0, 0.0, %v478_v7  ;;  %v1384_v27 = vsel %vm1377_vm5, %v1358_v42, %v6244_v30 }
 0x21e   :  { %v1285_v24 = vpop.permute.xlu0 %1284  ;;  %v1506_v32 = vsel %vm1501_vm8, %v1473_v36, %v1135_v31  ;;  %v1540_v15 = vsel %vm1534_vm9, %v1507_v37, %v1212_v45  ;;  %v1411_v33 = vsel %vm1403_vm6, %v1384_v27, %v6283_v9  ;;  %v9668_v45 = vrot.slane %v6297_v4, 2 }
 0x21f   :  { %v1539_v51 = vsel %vm1534_vm9, %v1506_v32, %v1210_v2  ;;  %v1287_v10 = vpop.permute.xlu1 %1286  ;;  %v1443_v2 = vsel %vm296_vm2, %v1411_v33, %v6350_v40  ;;  %v9544_v30 = vrot.slane %v6492_v62, 2  ;;  %v1357_v40 = vsel %vm1351_vm4, %v5910_v54, %v6197_v57  ;;  %v9670_v54 = vld [vmem:[#allocation68_spill] sm:$0xff] }
 0x220   :  { %964 = vrot.lane.b32.xlu0 %v922_v1, %s5543_s27  ;;  %v1572_v31 = vsel %vm1567_vm10, %v1539_v51, %v1285_v24  ;;  %v1573_v17 = vsel %vm1567_vm10, %v1540_v15, %v1287_v10  ;;  %v6578_v24 = vsel %vm555_vm1, %v545_v47, 0.0  ;;  %v1476_v7 = vsel %vm1468_vm7, %v1443_v2, %v6456_v21  ;;  %v6645_v2 = vld [vmem:[%s5563_s5 + $0x7c] sm:$0xf] }
 0x221   :  { %v1640_v43 = vcombine.low %v1572_v31, %v1573_v17  ;;  %1062 = vrot.lane.b32.xlu1 %v9668_v45, %s5544_s29  ;;  %v9669_v23 = vrot.slane %v6271_v61, 2  ;;  %v6594_v36 = vrot.slane %v6578_v24, 1  ;;  %v1383_v21 = vsel %vm1377_vm5, %v1357_v40, %v6219_v50  ;;  %v6642_v45 = vld [vmem:[%s5563_s5 + $0x78] sm:$0xf] }
 0x222   :  { %v6540_v13 = vpop.permute.xlu0 %659  ;;  %v1509_v32 = vsel %vm1501_vm8, %v1476_v7, %v6259_v14  ;;  %v9543_v37 = vrot.slane %v6476_v35, 2  ;;  %v1410_v57 = vsel %vm1403_vm6, %v1383_v21, %v9670_v54  ;;  %v6650_v7 = vrot.slane %v6535_v58, 2 }
 0x223   :  { %v6582_v9 = vpop.permute.xlu1 %946  ;;  %4787 = vmatprep.mubr.msk.f32.mxu1 %vm1654_vm11, %v1640_v43  ;;  %v1442_v15 = vsel %vm296_vm2, %v1410_v57, %v6364_v25  ;;  %v1542_v10 = vsel %vm1534_vm9, %v1509_v32, %v6320_v5 }
 0x224   :  { %1064 = vrot.lane.b32.xlu0 %v6435_v34, %s5544_s29  ;;  %v1475_v50 = vsel %vm1468_vm7, %v1442_v15, %v6440_v0  ;;  %v1575_v31 = vsel %vm1567_vm10, %v1542_v10, %v6396_v11  ;;  %v9671_v15 = vld [vmem:[#allocation67_spill] sm:$0xff] }
 0x225   :  { %1300 = vrot.lane.b32.xlu1 %v9669_v23, %s5531_s1  ;;  %v1508_v47 = vsel %vm1501_vm8, %v1475_v50, %v6478_v49  ;;  %v6634_v49 = vrot.slane %v6578_v24, 2  ;;  %v479_v50 = vrot.slane %v9671_v15, 7  ;;  %v9674_v15 = vld [vmem:[#allocation59_spill] sm:$0xff] }
 0x226   :  { %v6565_v6 = vpop.permute.xlu0 %948  ;;  %v1541_v25 = vsel %vm1534_vm9, %v1508_v47, %v1214_v44 }
 0x227   :  { %v6606_v61 = vpop.permute.xlu1 %1046 }
 0x228   :  { %673 = vrot.lane.b32.xlu0 %v6556_v41, %s5536_s0 }
 0x229   :  { %675 = vrot.lane.b32.xlu1 %v6594_v36, %s5536_s0 }
 0x22a   :  { %v6585_v42 = vpop.permute.xlu0 %1048 }
 0x22b   :  { %v1289_v27 = vpop.permute.xlu1 %1288 }
 0x22c   :  { %771 = vrot.lane.b32.xlu0 %v9544_v30, %s5527_s15  ;;  %v1574_v0 = vsel %vm1567_vm10, %v1541_v25, %v1289_v27  ;;  %v546_v25 = vsel %vm521_vm0, 0.0, %v479_v50 }
 0x22d   :  { %v1641_v33 = vcombine.low %v1574_v0, %v1575_v31  ;;  %1066 = vrot.lane.b32.xlu1 %v6452_v19, %s5544_s29  ;;  %v394_v0 = vld [vmem:[%s5563_s5 + $0x60] sm:$0xf]  ;;  %v6687_v31 = vsel %vm555_vm1, %v546_v25, 0.0 }
 0x22e   :  { %v6610_v51 = vpop.permute.xlu0 %661  ;;  %v480_v40 = vrot.slane %v394_v0, 7 }
 0x22f   :  { %v6636_v43 = vpop.permute.xlu1 %663  ;;  %4788 = vmatmul.mubr.msk.f32.gmra.mrb[2].mxu1 %vm1654_vm11, %v1641_v33 }
 0x230   :  { %1068 = vrot.lane.b32.xlu0 %v9543_v37, %s5544_s29 }
 0x231   :  { %1152 = vrot.lane.b32.xlu1 %v6362_v56, %s5545_s9 }
 0x232   :  { %v6627_v17 = vpop.permute.xlu0 %759 }
 0x233   :  { %v6656_v23 = vpop.permute.xlu1 %1050 }
 0x234   :  { %1154 = vrot.lane.b32.xlu0 %v6345_v20, %s5545_s9 }
 0x235   :  { %773 = vrot.lane.b32.xlu1 %v6650_v7, %s5527_s15 }
 0x236   :  { %v6639_v44 = vpop.permute.xlu0 %1052 }
 0x237   :  { %v1141_v32 = vpop.permute.xlu1 %1140 }
 0x238   :  { %775 = vrot.lane.b32.xlu0 %v6634_v49, %s5527_s15 }
 0x239   :  { %862 = vrot.lane.b32.xlu1 %v6492_v62, %s5542_s6 }
 0x23a   :  { %v1143_v21 = vpop.permute.xlu0 %1142 }
 0x23b   :  { %v6668_v57 = vpop.permute.xlu1 %761 }
 0x23c   :  { %864 = vrot.lane.b32.xlu0 %v6535_v58, %s5542_s6 }
 0x23d   :  { %1156 = vrot.lane.b32.xlu1 %v6476_v35, %s5545_s9 }
 0x23e   :  { %v6662_v54 = vpop.permute.xlu0 %763 }
 0x23f   :  { %v6677_v47 = vpop.permute.xlu1 %846 }
 0x240   :  { %1227 = vrot.lane.b32.xlu0 %v6378_v52, %s5546_s8  ;;  %v9672_v52 = vrot.slane %v6492_v62, 1 }
 0x241   :  { %1229 = vrot.lane.b32.xlu1 %v6359_v18, %s5546_s8 }
 0x242   :  { %v6671_v10 = vpop.permute.xlu0 %848 }
 0x243   :  { %v6689_v33 = vpop.permute.xlu1 %1144 }
 0x244   :  { %866 = vrot.lane.b32.xlu0 %v6578_v24, %s5542_s6 }
 0x245   :  { %868 = vrot.lane.b32.xlu1 %v6687_v31, %s5542_s6 }
 0x246   :  { %v1216_v27 = vpop.permute.xlu0 %1215 }
 0x247   :  { %v1218_v50 = vpop.permute.xlu1 %1217 }
 0x248   :  { %966 = vrot.lane.b32.xlu0 %v9672_v52, %s5543_s27  ;;  %v547_v52 = vsel %vm521_vm0, 0.0, %v480_v40  ;;  %v482_v40 = vrot.slane %v6421_v29, 7 }
 0x249   :  { %v6698_v18 = vpop.f32.mrb[0].mxu0  ;;  %968 = vrot.lane.b32.xlu1 %v6556_v41, %s5543_s27  ;;  %v6708_v0 = vsel %vm555_vm1, %v547_v52, 0.0 }
 0x24a   :  { %v6691_v37 = vpop.permute.xlu0 %850  ;;  %9673 = vst [vmem:[#allocation68_spill] sm:$0xff] %v6698_v18  ;;  %v4765_v25 = vpop.f32.mrb[1].mxu0  ;;  %v395_v18 = vld [vmem:[%s5563_s5 + $0x64] sm:$0xf]  ;;  %v549_v56 = vsel %vm521_vm0, 0.0, %v482_v40 }
 0x24b   :  { %v6713_v60 = vpop.permute.xlu1 %852  ;;  %v481_v29 = vrot.slane %v395_v18, 7  ;;  %v923_v18 = vrot.slane %v6687_v31, 1 }
 0x24c   :  { %1231 = vrot.lane.b32.xlu0 %v922_v1, %s5546_s8  ;;  %v1359_v1 = vsel %vm1351_vm4, %v9674_v15, %v6324_v39  ;;  %v1412_v39 = vsel %vm1403_vm6, %v6288_v22, %v6465_v55 }
 0x24d   :  { %1302 = vrot.lane.b32.xlu1 %v6435_v34, %s5531_s1  ;;  %v1385_v20 = vsel %vm1377_vm5, %v1359_v1, %v6447_v28  ;;  %v1444_v28 = vsel %vm296_vm2, %v1412_v39, %v6520_v46 }
 0x24e   :  { %v6701_v30 = vpop.permute.xlu0 %950  ;;  %v1413_v15 = vsel %vm1403_vm6, %v1385_v20, %v6484_v8  ;;  %v1477_v20 = vsel %vm1468_vm7, %v1444_v28, %v6606_v61  ;;  %v9676_v8 = vrot.slane %v6708_v0, 1 }
 0x24f   :  { %v6732_v34 = vpop.permute.xlu1 %952  ;;  %v1510_v40 = vsel %vm1501_vm8, %v1477_v20, %v1141_v32 }
 0x250   :  { %1304 = vrot.lane.b32.xlu0 %v6452_v19, %s5531_s1  ;;  %v9675_v19 = vld [vmem:[#allocation60_spill] sm:$0xff] }
 0x251   :  { %v1361_v52 = vsel %vm1351_vm4, %v9675_v19, %v6418_v48  ;;  %v1445_v48 = vsel %vm296_vm2, %v1413_v15, %v6505_v53  ;;  %677 = vrot.lane.b32.xlu1 %v9676_v8, %s5536_s0 }
 0x252   :  { %v1220_v25 = vpop.permute.xlu0 %1219  ;;  %v1387_v19 = vsel %vm1377_vm5, %v1361_v52, %v6473_v12  ;;  %v1478_v55 = vsel %vm1468_vm7, %v1445_v48, %v6585_v42  ;;  %v9677_v12 = vrot.slane %v6492_v62, 2  ;;  %v6757_v42 = vsel %vm555_vm1, %v549_v56, 0.0 }
 0x253   :  { %v1415_v53 = vsel %vm1403_vm6, %v1387_v19, %v6494_v59  ;;  %v1511_v46 = vsel %vm1501_vm8, %v1478_v55, %v1143_v21  ;;  %v1543_v52 = vsel %vm1534_vm9, %v1510_v40, %v1216_v27  ;;  %v1291_v15 = vpop.permute.xlu1 %1290  ;;  %v548_v59 = vsel %vm521_vm0, 0.0, %v481_v29 }
 0x254   :  { %970 = vrot.lane.b32.xlu0 %v6594_v36, %s5543_s27  ;;  %v1447_v61 = vsel %vm296_vm2, %v1415_v53, %v6565_v6  ;;  %v1544_v39 = vsel %vm1534_vm9, %v1511_v46, %v1218_v50  ;;  %v1576_v48 = vsel %vm1567_vm10, %v1543_v52, %v1291_v15  ;;  %v9678_v6 = vld [vmem:[#allocation61_spill] sm:$0xff]  ;;  %v9679_v29 = vrot.slane %v6476_v35, 2 }
 0x255   :  { %v1480_v21 = vsel %vm1468_vm7, %v1447_v61, %v6639_v44  ;;  %972 = vrot.lane.b32.xlu1 %v923_v18, %s5543_s27  ;;  %v1360_v27 = vsel %vm1351_vm4, %v9678_v6, %v6437_v3  ;;  %v6780_v44 = vrot.slane %v6757_v42, 1  ;;  %v6783_v50 = vsel %vm555_vm1, %v548_v59, 0.0 }
 0x256   :  { %v1293_v1 = vpop.permute.xlu0 %1292  ;;  %v1513_v19 = vsel %vm1501_vm8, %v1480_v21, %v6259_v14  ;;  %v6834_v15 = vrot.slane %v6783_v50, 2 }
 0x257   :  { %v1577_v32 = vsel %vm1567_vm10, %v1544_v39, %v1293_v1  ;;  %v1386_v1 = vsel %vm1377_vm5, %v1360_v27, %v6458_v63  ;;  %v6789_v55 = vpop.permute.xlu1 %665  ;;  %v6801_v63 = vrot.slane %v6783_v50, 1  ;;  %v9549_v39 = vrot.slane %v6687_v31, 2 }
 0x258   :  { %1070 = vrot.lane.b32.xlu0 %v9677_v12, %s5544_s29  ;;  %v1642_v56 = vcombine.low %v1576_v48, %v1577_v32  ;;  %v1414_v3 = vsel %vm1403_vm6, %v1386_v1, %v6503_v38  ;;  %v1546_v38 = vsel %vm1534_vm9, %v1513_v19, %v6320_v5 }
 0x259   :  { %v1446_v20 = vsel %vm296_vm2, %v1414_v3, %v6582_v9  ;;  %1072 = vrot.lane.b32.xlu1 %v6650_v7, %s5544_s29  ;;  %v1579_v12 = vsel %vm1567_vm10, %v1546_v38, %v6396_v11 }
 0x25a   :  { %v6768_v28 = vpop.permute.xlu0 %954  ;;  %4790 = vmatprep.mubr.msk.f32.mxu1 %vm1654_vm11, %v1642_v56  ;;  %v1479_v8 = vsel %vm1468_vm7, %v1446_v20, %v6656_v23  ;;  %v9550_v23 = vrot.slane %v6708_v0, 2  ;;  %v6850_v56 = vrot.slane %v6757_v42, 2  ;;  %v398_v20 = vld [vmem:[%s5563_s5 + $0x70] sm:$0xf] }
 0x25b   :  { %v1512_v53 = vsel %vm1501_vm8, %v1479_v8, %v6689_v33  ;;  %v6811_v46 = vpop.permute.xlu1 %956 }
 0x25c   :  { %1306 = vrot.lane.b32.xlu0 %v9679_v29, %s5531_s1  ;;  %v1545_v9 = vsel %vm1534_vm9, %v1512_v53, %v1220_v25  ;;  %v483_v29 = vrot.slane %v6424_v26, 7 }
 0x25d   :  { %679 = vrot.lane.b32.xlu1 %v6801_v63, %s5536_s0 }
 0x25e   :  { %v6794_v35 = vpop.permute.xlu0 %1054  ;;  %v550_v3 = vsel %vm521_vm0, 0.0, %v483_v29 }
 0x25f   :  { %v6822_v33 = vpop.permute.xlu1 %1056  ;;  %v6874_v38 = vsel %vm555_vm1, %v550_v3, 0.0  ;;  %v399_v3 = vld [vmem:[%s5563_s5 + $0x74] sm:$0xf] }
 0x260   :  { %681 = vrot.lane.b32.xlu0 %v6780_v44, %s5536_s0 }
 0x261   :  { %777 = vrot.lane.b32.xlu1 %v9550_v23, %s5527_s15  ;;  %v485_v23 = vrot.slane %v399_v3, 7 }
 0x262   :  { %v1295_v40 = vpop.permute.xlu0 %1294 }
 0x263   :  { %v1578_v61 = vsel %vm1567_vm10, %v1545_v9, %v1295_v40  ;;  %v6836_v59 = vpop.permute.xlu1 %667  ;;  %v484_v9 = vrot.slane %v398_v20, 7 }
 0x264   :  { %v1643_v52 = vcombine.low %v1578_v61, %v1579_v12  ;;  %1074 = vrot.lane.b32.xlu0 %v6634_v49, %s5544_s29 }
 0x265   :  { %1076 = vrot.lane.b32.xlu1 %v9549_v39, %s5544_s29 }
 0x266   :  { %4791 = vmatmul.mubr.msk.f32.gmra.mrb[4].mxu1 %vm1654_vm11, %v1643_v52  ;;  %v6825_v25 = vpop.permute.xlu0 %669 }
 0x267   :  { %v6845_v32 = vpop.permute.xlu1 %765 }
 0x268   :  { %1158 = vrot.lane.b32.xlu0 %v6535_v58, %s5545_s9 }
 0x269   :  { %1160 = vrot.lane.b32.xlu1 %v6578_v24, %s5545_s9 }
 0x26a   :  { %v6838_v21 = vpop.permute.xlu0 %1058 }
 0x26b   :  { %v6854_v6 = vpop.permute.xlu1 %1060 }
 0x26c   :  { %779 = vrot.lane.b32.xlu0 %v6834_v15, %s5527_s15 }
 0x26d   :  { %781 = vrot.lane.b32.xlu1 %v6850_v56, %s5527_s15 }
 0x26e   :  { %v1147_v48 = vpop.permute.xlu0 %1146 }
 0x26f   :  { %v1149_v1 = vpop.permute.xlu1 %1148 }
 0x270   :  { %870 = vrot.lane.b32.xlu0 %v6708_v0, %s5542_s6 }
 0x271   :  { %872 = vrot.lane.b32.xlu1 %v6783_v50, %s5542_s6 }
 0x272   :  { %v6856_v27 = vpop.permute.xlu0 %767 }
 0x273   :  { %v6871_v8 = vpop.permute.xlu1 %769 }
 0x274   :  { %1162 = vrot.lane.b32.xlu0 %v6687_v31, %s5545_s9 }
 0x275   :  { %1233 = vrot.lane.b32.xlu1 %v6556_v41, %s5546_s8  ;;  %v9680_v41 = vrot.slane %v6708_v0, 1 }
 0x276   :  { %v6863_v19 = vpop.permute.xlu0 %854 }
 0x277   :  { %v6882_v40 = vpop.permute.xlu1 %856 }
 0x278   :  { %1235 = vrot.lane.b32.xlu0 %v6594_v36, %s5546_s8  ;;  %v551_v36 = vsel %vm521_vm0, 0.0, %v484_v9  ;;  %v1362_v9 = vsel %vm1351_vm4, %v6122_v16, %v6540_v13  ;;  %v552_v13 = vsel %vm521_vm0, 0.0, %v485_v23  ;;  %v486_v23 = vrot.slane %v6642_v45, 7 }
 0x279   :  { %874 = vrot.lane.b32.xlu1 %v6757_v42, %s5542_s6  ;;  %v6890_v52 = vsel %vm555_vm1, %v551_v36, 0.0 }
 0x27a   :  { %v6876_v53 = vpop.permute.xlu0 %1150  ;;  %v9553_v20 = vrot.slane %v6890_v52, 1 }
 0x27b   :  { %v1222_v61 = vpop.permute.xlu1 %1221 }
 0x27c   :  { %876 = vrot.lane.b32.xlu0 %v6874_v38, %s5542_s6 }
 0x27d   :  { %974 = vrot.lane.b32.xlu1 %v9680_v41, %s5543_s27  ;;  %v1388_v41 = vsel %vm1377_vm5, %v1362_v9, %v6627_v17  ;;  %v1416_v17 = vsel %vm1403_vm6, %v6288_v22, %v6677_v47  ;;  %v6931_v9 = vsel %vm555_vm1, %v552_v13, 0.0 }
 0x27e   :  { %v1224_v12 = vpop.permute.xlu0 %1223  ;;  %v1417_v3 = vsel %vm1403_vm6, %v1388_v41, %v6671_v10  ;;  %v1448_v10 = vsel %vm296_vm2, %v1416_v17, %v6701_v30  ;;  %v6951_v30 = vrot.slane %v6931_v9, 1 }
 0x27f   :  { %v6904_v39 = vpop.permute.xlu1 %858 }
 0x280   :  { %976 = vrot.lane.b32.xlu0 %v6801_v63, %s5543_s27 }
 0x281   :  { %1237 = vrot.lane.b32.xlu1 %v923_v18, %s5546_s8 }
 0x282   :  { %v6892_v29 = vpop.permute.xlu0 %860 }
 0x283   :  { %v6917_v26 = vpop.permute.xlu1 %958 }
 0x284   :  { %1308 = vrot.lane.b32.xlu0 %v6650_v7, %s5531_s1  ;;  %v9552_v7 = vrot.slane %v6874_v38, 1 }
 0x285   :  { %1310 = vrot.lane.b32.xlu1 %v6634_v49, %s5531_s1  ;;  %v1449_v49 = vsel %vm296_vm2, %v1417_v3, %v6732_v34  ;;  %v9681_v34 = vld [vmem:[#allocation65_spill] sm:$0xff] }
 0x286   :  { %v6906_v36 = vpop.permute.xlu0 %960  ;;  %v1482_v47 = vsel %vm1468_vm7, %v1449_v49, %v6822_v33 }
 0x287   :  { %v1226_v18 = vpop.permute.xlu1 %1225 }
 0x288   :  { %683 = vrot.lane.b32.xlu0 %v9553_v20, %s5536_s0  ;;  %v1515_v20 = vsel %vm1501_vm8, %v1482_v47, %v1149_v1 }
 0x289   :  { %978 = vrot.lane.b32.xlu1 %v6780_v44, %s5543_s27  ;;  %v1548_v3 = vsel %vm1534_vm9, %v1515_v20, %v1224_v12  ;;  %v9682_v12 = vrot.slane %v6708_v0, 2 }
 0x28a   :  { %v1297_v16 = vpop.permute.xlu0 %1296 }
 0x28b   :  { %v1299_v17 = vpop.permute.xlu1 %1298 }
 0x28c   :  { %980 = vrot.lane.b32.xlu0 %v9552_v7, %s5543_s27  ;;  %v1481_v7 = vsel %vm1468_vm7, %v1448_v10, %v6794_v35  ;;  %v1364_v35 = vsel %vm1351_vm4, %v9681_v34, %v6636_v43  ;;  %v553_v10 = vsel %vm521_vm0, 0.0, %v486_v23  ;;  %v9684_v34 = vrot.slane %v6687_v31, 2 }
 0x28d   :  { %v1514_v13 = vsel %vm1501_vm8, %v1481_v7, %v1147_v48  ;;  %v1390_v48 = vsel %vm1377_vm5, %v1364_v35, %v6662_v54  ;;  %v1581_v7 = vsel %vm1567_vm10, %v1548_v3, %v1299_v17  ;;  %1078 = vrot.lane.b32.xlu1 %v9682_v12, %s5544_s29  ;;  %v9555_v54 = vrot.slane %v6890_v52, 2 }
 0x28e   :  { %v6938_v41 = vpop.permute.xlu0 %671  ;;  %v1547_v33 = vsel %vm1534_vm9, %v1514_v13, %v1222_v61  ;;  %v1419_v47 = vsel %vm1403_vm6, %v1390_v48, %v6713_v60  ;;  %v6976_v20 = vsel %vm555_vm1, %v553_v10, 0.0 }
 0x28f   :  { %v1580_v1 = vsel %vm1567_vm10, %v1547_v33, %v1297_v16  ;;  %v1451_v61 = vsel %vm296_vm2, %v1419_v47, %v6811_v46  ;;  %v9683_v16 = vld [vmem:[#allocation64_spill] sm:$0xff]  ;;  %v6983_v13 = vpop.permute.xlu1 %962  ;;  %v6992_v35 = vrot.slane %v6976_v20, 1 }
 0x290   :  { %1080 = vrot.lane.b32.xlu0 %v6834_v15, %s5544_s29  ;;  %v1644_v43 = vcombine.low %v1580_v1, %v1581_v7  ;;  %v1363_v60 = vsel %vm1351_vm4, %v9683_v16, %v6610_v51  ;;  %v1484_v23 = vsel %vm1468_vm7, %v1451_v61, %v6854_v6  ;;  %v9554_v6 = vrot.slane %v6874_v38, 2 }
 0x291   :  { %1312 = vrot.lane.b32.xlu1 %v9684_v34, %s5531_s1  ;;  %v1389_v3 = vsel %vm1377_vm5, %v1363_v60, %v6668_v57  ;;  %v1517_v51 = vsel %vm1501_vm8, %v1484_v23, %v6259_v14  ;;  %v7040_v61 = vrot.slane %v6931_v9, 2 }
 0x292   :  { %v6963_v49 = vpop.permute.xlu0 %964  ;;  %4793 = vmatprep.mubr.msk.f32.mxu1 %vm1654_vm11, %v1644_v43  ;;  %v1418_v33 = vsel %vm1403_vm6, %v1389_v3, %v6691_v37  ;;  %v1550_v48 = vsel %vm1534_vm9, %v1517_v51, %v6320_v5  ;;  %v487_v51 = vrot.slane %v6645_v2, 7 }
 0x293   :  { %v7004_v31 = vpop.permute.xlu1 %1062  ;;  %v1450_v17 = vsel %vm296_vm2, %v1418_v33, %v6768_v28 }
 0x294   :  { %685 = vrot.lane.b32.xlu0 %v6951_v30, %s5536_s0  ;;  %v1483_v57 = vsel %vm1468_vm7, %v1450_v17, %v6838_v21  ;;  %v1583_v21 = vsel %vm1567_vm10, %v1550_v48, %v6396_v11 }
 0x295   :  { %687 = vrot.lane.b32.xlu1 %v6992_v35, %s5536_s0  ;;  %v1516_v1 = vsel %vm1501_vm8, %v1483_v57, %v6876_v53  ;;  %v7032_v53 = vrot.slane %v6976_v20, 2  ;;  %v554_v57 = vsel %vm521_vm0, 0.0, %v487_v51 }
 0x296   :  { %v6986_v46 = vpop.permute.xlu0 %1064  ;;  %v1549_v37 = vsel %vm1534_vm9, %v1516_v1, %v1226_v18  ;;  %v7074_v1 = vsel %vm555_vm1, %v554_v57, 0.0 }
 0x297   :  { %v1301_v28 = vpop.permute.xlu1 %1300 }
 0x298   :  { %783 = vrot.lane.b32.xlu0 %v9555_v54, %s5527_s15  ;;  %v1582_v7 = vsel %vm1567_vm10, %v1549_v37, %v1301_v28 }
 0x299   :  { %v1645_v43 = vcombine.low %v1582_v7, %v1583_v21  ;;  %1082 = vrot.lane.b32.xlu1 %v6850_v56, %s5544_s29  ;;  %v9686_v7 = vrot.slane %v6874_v38, 1 }
 0x29a   :  { %v7008_v10 = vpop.permute.xlu0 %673 }
 0x29b   :  { %v7034_v12 = vpop.permute.xlu1 %675  ;;  %4794 = vmatmul.mubr.msk.f32.gmra.mrb[6].mxu1 %vm1654_vm11, %v1645_v43 }
 0x29c   :  { %1084 = vrot.lane.b32.xlu0 %v9554_v6, %s5544_s29 }
 0x29d   :  { %1164 = vrot.lane.b32.xlu1 %v6783_v50, %s5545_s9 }
 0x29e   :  { %v7025_v47 = vpop.permute.xlu0 %771 }
 0x29f   :  { %v7044_v16 = vpop.permute.xlu1 %1066 }
 0x2a0   :  { %1166 = vrot.lane.b32.xlu0 %v6757_v42, %s5545_s9 }
 0x2a1   :  { %785 = vrot.lane.b32.xlu1 %v7040_v61, %s5527_s15 }
 0x2a2   :  { %v1069_v18 = vpop.permute.xlu0 %1068 }
 0x2a3   :  { %v1153_v23 = vpop.permute.xlu1 %1152 }
 0x2a4   :  { %787 = vrot.lane.b32.xlu0 %v7032_v53, %s5527_s15 }
 0x2a5   :  { %878 = vrot.lane.b32.xlu1 %v6890_v52, %s5542_s6 }
 0x2a6   :  { %v1155_v60 = vpop.permute.xlu0 %1154 }
 0x2a7   :  { %v7056_v3 = vpop.permute.xlu1 %773 }
 0x2a8   :  { %880 = vrot.lane.b32.xlu0 %v6931_v9, %s5542_s6 }
 0x2a9   :  { %1168 = vrot.lane.b32.xlu1 %v6874_v38, %s5545_s9 }
 0x2aa   :  { %v7050_v34 = vpop.permute.xlu0 %775 }
 0x2ab   :  { %v7065_v17 = vpop.permute.xlu1 %862 }
 0x2ac   :  { %1239 = vrot.lane.b32.xlu0 %v6801_v63, %s5546_s8  ;;  %v9685_v63 = vrot.slane %v6890_v52, 1 }
 0x2ad   :  { %1241 = vrot.lane.b32.xlu1 %v6780_v44, %s5546_s8  ;;  %v925_v44 = vrot.slane %v7074_v1, 1 }
 0x2ae   :  { %v7059_v33 = vpop.permute.xlu0 %864 }
 0x2af   :  { %v1157_v37 = vpop.permute.xlu1 %1156 }
 0x2b0   :  { %882 = vrot.lane.b32.xlu0 %v6976_v20, %s5542_s6 }
 0x2b1   :  { %884 = vrot.lane.b32.xlu1 %v7074_v1, %s5542_s6 }
 0x2b2   :  { %v1228_v48 = vpop.permute.xlu0 %1227 }
 0x2b3   :  { %v1230_v21 = vpop.permute.xlu1 %1229 }
 0x2b4   :  { %982 = vrot.lane.b32.xlu0 %v9685_v63, %s5543_s27  ;;  %v1365_v63 = vsel %vm1351_vm4, %v6297_v4, %v6789_v55 }
 0x2b5   :  { %984 = vrot.lane.b32.xlu1 %v6951_v30, %s5543_s27  ;;  %v1391_v54 = vsel %vm1377_vm5, %v1365_v63, %v6845_v32 }
 0x2b6   :  { %v7076_v28 = vpop.permute.xlu0 %866  ;;  %v1421_v4 = vsel %vm1403_vm6, %v1391_v54, %v6882_v40 }
 0x2b7   :  { %v7090_v51 = vpop.permute.xlu1 %868 }
 0x2b8   :  { %1243 = vrot.lane.b32.xlu0 %v9686_v7, %s5546_s8  ;;  %v9687_v7 = vld [vmem:[#allocation69_spill] sm:$0xff] }
 0x2b9   :  { %1314 = vrot.lane.b32.xlu1 %v6834_v15, %s5531_s1  ;;  %v1367_v6 = vsel %vm1351_vm4, %v9687_v7, %v6825_v25  ;;  %v1453_v15 = vsel %vm296_vm2, %v1421_v4, %v6906_v36 }
 0x2ba   :  { %v7083_v43 = vpop.permute.xlu0 %966  ;;  %v1393_v63 = vsel %vm1377_vm5, %v1367_v6, %v6871_v8  ;;  %v1486_v7 = vsel %vm1468_vm7, %v1453_v15, %v6986_v46  ;;  %v9556_v15 = vlaneseq }
 0x2bb   :  { %v7110_v55 = vpop.permute.xlu1 %968  ;;  %v1423_v40 = vsel %vm1403_vm6, %v1393_v63, %v6892_v29  ;;  %v1519_v36 = vsel %vm1501_vm8, %v1486_v7, %v1155_v60 }
 0x2bc   :  { %1316 = vrot.lane.b32.xlu0 %v6850_v56, %s5531_s1  ;;  %v1420_v56 = vsel %vm1403_vm6, %v6288_v22, %v6863_v19  ;;  %v1455_v8 = vsel %vm296_vm2, %v1423_v40, %v6963_v49  ;;  %v1552_v46 = vsel %vm1534_vm9, %v1519_v36, %v1230_v21  ;;  %v9688_v49 = vrot.slane %v6890_v52, 2 }
 0x2bd   :  { %v1452_v25 = vsel %vm296_vm2, %v1420_v56, %v6917_v26  ;;  %986 = vrot.lane.b32.xlu1 %v6992_v35, %s5543_s27  ;;  %v1488_v4 = vsel %vm1468_vm7, %v1455_v8, %v1069_v18  ;;  %v1029_v8 = vrot.slane %v7074_v1, 2 }
 0x2be   :  { %v1232_v57 = vpop.permute.xlu0 %1231  ;;  %v1485_v19 = vsel %vm1468_vm7, %v1452_v25, %v7004_v31  ;;  %v5549_v31 = vmov 1966171168  }
 0x2bf   :  { %v1518_v26 = vsel %vm1501_vm8, %v1485_v19, %v1153_v23  ;;  %v1303_v6 = vpop.permute.xlu1 %1302  ;;  %v1850_v56 = vunpack.c.l.s4 %v5549_v31 }
 0x2c0   :  { %988 = vrot.lane.b32.xlu0 %v925_v44, %s5543_s27  ;;  %v1551_v54 = vsel %vm1534_vm9, %v1518_v26, %v1228_v48  ;;  %v9689_v48 = vld [vmem:[#allocation70_spill] sm:$0xff]  ;;  %v4604_v26 = vld [vmem:[#allocation17] ss:$0 sm:$0xff] }
 0x2c1   :  { %v1584_v60 = vsel %vm1567_vm10, %v1551_v54, %v1303_v6  ;;  %1086 = vrot.lane.b32.xlu1 %v9688_v49, %s5544_s29  ;;  %v1366_v21 = vsel %vm1351_vm4, %v9689_v48, %v6836_v59  ;;  %v1851_v40 = vunpack.c.0.s8 %v1850_v56  ;;  %v7159_v59 = vshrl.u32 %v9556_v15, 7 }
 0x2c2   :  { %v1305_v32 = vpop.permute.xlu0 %1304  ;;  %v1392_v18 = vsel %vm1377_vm5, %v1366_v21, %v6856_v27  ;;  %v9691_v27 = vrot.slane %v6874_v38, 2  ;;  %v9692_v38 = vld [vmem:[#allocation68_spill] sm:$0xff] }
 0x2c3   :  { %v1585_v29 = vsel %vm1567_vm10, %v1552_v46, %v1305_v32  ;;  %v1521_v32 = vsel %vm1501_vm8, %v1488_v4, %v6259_v14  ;;  %v7151_v63 = vpop.permute.xlu1 %677  ;;  %v1422_v7 = vsel %vm1403_vm6, %v1392_v18, %v6904_v39  ;;  %9690 = vst [vmem:[#allocation59_spill] sm:$0xff] %v7159_v59  ;;  %v367_v31 = vadd.f32 %v4604_v26, %v9692_v38 }
 0x2c4   :  { %1088 = vrot.lane.b32.xlu0 %v7040_v61, %s5544_s29  ;;  %v1646_v25 = vcombine.low %v1584_v60, %v1585_v29  ;;  %v1454_v36 = vsel %vm296_vm2, %v1422_v7, %v6983_v13  ;;  %v1554_v39 = vsel %vm1534_vm9, %v1521_v32, %v6320_v5  ;;  %v7179_v56 = vsub.s32 %v1851_v40, %v7159_v59 }
 0x2c5   :  { %1318 = vrot.lane.b32.xlu1 %v9691_v27, %s5531_s1  ;;  %v1487_v54 = vsel %vm1468_vm7, %v1454_v36, %v7044_v16  ;;  %v1587_v16 = vsel %vm1567_vm10, %v1554_v39, %v6396_v11  ;;  %v7211_v36 = vsub.s32 0, %v7159_v59 }
 0x2c6   :  { %v7137_v23 = vpop.permute.xlu0 %970  ;;  %4796 = vmatprep.mubr.msk.f32.mxu1 %vm1654_vm11, %v1646_v25  ;;  %v1520_v46 = vsel %vm1501_vm8, %v1487_v54, %v1157_v37  ;;  %9693 = vst [vmem:[#allocation60_spill] sm:$0xff] %v7179_v56  ;;  %v1855_v49 = vrot.slane %v367_v31, %v7179_v56 }
 0x2c7   :  { %v7174_v6 = vpop.permute.xlu1 %972  ;;  %v1553_v13 = vsel %vm1534_vm9, %v1520_v46, %v1232_v57  ;;  %9694 = vst [vmem:[#allocation61_spill] sm:$0xff] %v7211_v36 }
 0x2c8   :  { %1090 = vrot.lane.b32.xlu0 %v7032_v53, %s5544_s29  ;;  %v1856_v21 = vcombine.high %v1855_v49, %v1855_v49 }
 0x2c9   :  { %1092 = vrot.lane.b32.xlu1 %v1029_v8, %s5544_s29 }
 0x2ca   :  { %v7156_v19 = vpop.permute.xlu0 %1070  ;;  %v1870_v7 = vrot.slane %v1856_v21, %v7179_v56 }
 0x2cb   :  { %v1073_v37 = vpop.permute.xlu1 %1072 }
 0x2cc   :  { %1170 = vrot.lane.b32.xlu0 %v6931_v9, %s5545_s9 }
 0x2cd   :  { %v7185_v25 = vpop.f32.mrb[0].mxu1  ;;  %1172 = vrot.lane.b32.xlu1 %v6976_v20, %s5545_s9 }
 0x2ce   :  { %v1307_v4 = vpop.permute.xlu0 %1306  ;;  %v7189_v57 = vpop.f32.mrb[1].mxu1 }
 0x2cf   :  { %v1586_v29 = vsel %vm1567_vm10, %v1553_v13, %v1307_v4  ;;  %v7199_v18 = vpop.permute.xlu1 %679 }
 0x2d0   :  { %v1647_v60 = vcombine.low %v1586_v29, %v1587_v16  ;;  %1174 = vrot.lane.b32.xlu0 %v7074_v1, %s5545_s9 }
 0x2d1   :  { %1245 = vrot.lane.b32.xlu1 %v6951_v30, %s5546_s8  ;;  %v1863_v30 = vrot.slane %v1855_v49, %v7179_v56  ;;  %v9739_v56 = vld [vmem:[#allocation67_spill] sm:$0xff] }
 0x2d2   :  { %4797 = vmatmul.mubr.msk.f32.gmra.mrb[8].mxu1 %vm1654_vm11, %v1647_v60  ;;  %v7193_v48 = vpop.permute.xlu0 %681 }
 0x2d3   :  { %v7208_v40 = vpop.permute.xlu1 %777 }
 0x2d4   :  { %1247 = vrot.lane.b32.xlu0 %v6992_v35, %s5546_s8  ;;  %v7217_v35 = vrot.slane %v1870_v7, %v7211_v36  ;;  %v1424_v7 = vsel %vm1403_vm6, %v6288_v22, %v7065_v17  ;;  %v1370_v17 = vsel %vm1351_vm4, %v6578_v24, %v7034_v12  ;;  %v1369_v12 = vsel %vm1351_vm4, %v6535_v58, %v7008_v10 }
 0x2d5   :  { %1249 = vrot.lane.b32.xlu1 %v925_v44, %s5546_s8 }
 0x2d6   :  { %v7201_v32 = vpop.permute.xlu0 %1074  ;;  %9695 = vst [vmem:[#allocation65_spill] sm:$0xff] %v7217_v35 }
 0x2d7   :  { %v1077_v26 = vpop.permute.xlu1 %1076 }
 0x2d8   :  { %1320 = vrot.lane.b32.xlu0 %v7040_v61, %s5531_s1  ;;  %v7227_v61 = vrot.slane %v1863_v30, %v7211_v36 }
 0x2d9   :  { %1322 = vrot.lane.b32.xlu1 %v7032_v53, %s5531_s1  ;;  %v1368_v53 = vsel %vm1351_vm4, %v6492_v62, %v6938_v41  ;;  %v1456_v62 = vsel %vm296_vm2, %v1424_v7, %v7083_v43 }
 0x2da   :  { %v1159_v27 = vpop.permute.xlu0 %1158  ;;  %9696 = vst [vmem:[#allocation64_spill] sm:$0xff] %v7227_v61  ;;  %v1394_v29 = vsel %vm1377_vm5, %v1368_v53, %v7025_v47  ;;  %v1489_v47 = vsel %vm1468_vm7, %v1456_v62, %v7156_v19 }
 0x2db   :  { %v1161_v1 = vpop.permute.xlu1 %1160  ;;  %v1425_v21 = vsel %vm1403_vm6, %v1394_v29, %v7059_v33  ;;  %v1522_v33 = vsel %vm1501_vm8, %v1489_v47, %v1159_v27 }
 0x2dc   :  { %1324 = vrot.lane.b32.xlu0 %v1029_v8, %s5531_s1  ;;  %v1457_v41 = vsel %vm296_vm2, %v1425_v21, %v7110_v55  ;;  %v1396_v21 = vsel %vm1377_vm5, %v1370_v17, %v7050_v34 }
 0x2dd   :  { %1897 = vrot.lane.b32.xlu1 %v7227_v61, %s5550_s24  ;;  %v1490_v53 = vsel %vm1468_vm7, %v1457_v41, %v1073_v37  ;;  %v1427_v27 = vsel %vm1403_vm6, %v1396_v21, %v7090_v51 }
 0x2de   :  { %v7221_v54 = vpop.permute.xlu0 %779  ;;  %v1523_v29 = vsel %vm1501_vm8, %v1490_v53, %v1161_v1  ;;  %v1459_v24 = vsel %vm296_vm2, %v1427_v27, %v7174_v6 }
 0x2df   :  { %v7232_v8 = vpop.permute.xlu1 %781 }
 0x2e0   :  { %1899 = vrot.lane.b32.xlu0 %v7217_v35, %s5550_s24 }
 0x2e2   :  { %v7229_v44 = vpop.permute.xlu0 %870 }
 0x2e3   :  { %v7234_v46 = vpop.permute.xlu1 %872 }
 0x2e6   :  { %v1163_v39 = vpop.permute.xlu0 %1162 }
 0x2e7   :  { %v1234_v38 = vpop.permute.xlu1 %1233 }
 0x2e8   :  { %v1555_v7 = vsel %vm1534_vm9, %v1522_v33, %v1234_v38 }
 0x2ea   :  { %v1236_v13 = vpop.permute.xlu0 %1235 }
 0x2eb   :  { %v7241_v4 = vpop.permute.xlu1 %874  ;;  %v1556_v43 = vsel %vm1534_vm9, %v1523_v29, %v1236_v13  ;;  %v1492_v13 = vsel %vm1468_vm7, %v1459_v24, %v1077_v26 }
 0x2ec   :  { %v1525_v51 = vsel %vm1501_vm8, %v1492_v13, %v6259_v14 }
 0x2ed   :  { %v1558_v47 = vsel %vm1534_vm9, %v1525_v51, %v6320_v5 }
 0x2ee   :  { %v7236_v31 = vpop.permute.xlu0 %876 }
 0x2ef   :  { %v7247_v60 = vpop.permute.xlu1 %974 }
 0x2f2   :  { %v7243_v16 = vpop.permute.xlu0 %976 }
 0x2f3   :  { %v1238_v30 = vpop.permute.xlu1 %1237 }
 0x2f6   :  { %v1309_v49 = vpop.permute.xlu0 %1308 }
 0x2f7   :  { %v1311_v55 = vpop.permute.xlu1 %1310  ;;  %v1588_v19 = vsel %vm1567_vm10, %v1555_v7, %v1309_v49  ;;  %v1395_v49 = vsel %vm1377_vm5, %v1369_v12, %v7056_v3 }
 0x2f8   :  { %v1589_v37 = vsel %vm1567_vm10, %v1556_v43, %v1311_v55  ;;  %v1426_v6 = vsel %vm1403_vm6, %v1395_v49, %v7076_v28 }
 0x2f9   :  { %v1648_v1 = vcombine.low %v1588_v19, %v1589_v37  ;;  %v1458_v58 = vsel %vm296_vm2, %v1426_v6, %v7137_v23  ;;  %v1591_v23 = vsel %vm1567_vm10, %v1558_v47, %v6396_v11 }
 0x2fa   :  { %v7258_v15 = vpop.permute.xlu0 %683  ;;  %v1491_v26 = vsel %vm1468_vm7, %v1458_v58, %v7201_v32 }
 0x2fb   :  { %v7284_v34 = vpop.permute.xlu1 %978  ;;  %4799 = vmatprep.mubr.msk.f32.mxu1 %vm1654_vm11, %v1648_v1  ;;  %v1524_v3 = vsel %vm1501_vm8, %v1491_v26, %v1163_v39  ;;  %v1371_v26 = vsel %vm1351_vm4, %v6708_v0, %v7151_v63  ;;  %v1373_v0 = vsel %vm1351_vm4, %v6757_v42, %v7193_v48 }
 0x2fc   :  { %v1557_v33 = vsel %vm1534_vm9, %v1524_v3, %v1238_v30  ;;  %v1397_v47 = vsel %vm1377_vm5, %v1371_v26, %v7208_v40  ;;  %v1428_v3 = vsel %vm1403_vm6, %v6288_v22, %v7229_v44 }
 0x2fe   :  { %v7274_v62 = vpop.permute.xlu0 %980 }
 0x2ff   :  { %v1079_v41 = vpop.permute.xlu1 %1078 }
 0x302   :  { %v1081_v38 = vpop.permute.xlu0 %1080  ;;  %v7302_v53 = vpop.f32.mrb[2].mxu1 }
 0x303   :  { %v1313_v29 = vpop.permute.xlu1 %1312  ;;  %v7305_v28 = vpop.f32.mrb[3].mxu1 }
 0x304   :  { %v1590_v17 = vsel %vm1567_vm10, %v1557_v33, %v1313_v29  ;;  %v1429_v33 = vsel %vm1403_vm6, %v1397_v47, %v7234_v46 }
 0x305   :  { %v1649_v32 = vcombine.low %v1590_v17, %v1591_v23  ;;  %v1461_v17 = vsel %vm296_vm2, %v1429_v33, %v7243_v16  ;;  %v1460_v23 = vsel %vm296_vm2, %v1428_v3, %v7247_v60  ;;  %v1399_v60 = vsel %vm1377_vm5, %v1373_v0, %v7232_v8 }
 0x306   :  { %v7295_v10 = vpop.permute.xlu0 %685  ;;  %v1494_v63 = vsel %vm1468_vm7, %v1461_v17, %v1081_v38  ;;  %v1493_v40 = vsel %vm1468_vm7, %v1460_v23, %v1079_v41  ;;  %v1431_v38 = vsel %vm1403_vm6, %v1399_v60, %v7236_v31  ;;  %v1372_v8 = vsel %vm1351_vm4, %v6783_v50, %v7199_v18 }
 0x307   :  { %v7312_v7 = vpop.permute.xlu1 %687  ;;  %4800 = vmatmul.mubr.msk.f32.gmra.mrb[10].mxu1 %vm1654_vm11, %v1649_v32  ;;  %v1398_v33 = vsel %vm1377_vm5, %v1372_v8, %v7221_v54  ;;  %v1375_v60 = vsel %vm1351_vm4, %v6931_v9, %v7295_v10 }
 0x308   :  { %v1430_v17 = vsel %vm1403_vm6, %v1398_v33, %v7241_v4 }
 0x30a   :  { %v7310_v43 = vpop.permute.xlu0 %783 }
 0x30b   :  { %v1083_v55 = vpop.permute.xlu1 %1082 }
 0x30e   :  { %v1085_v39 = vpop.permute.xlu0 %1084 }
 0x30f   :  { %v1165_v19 = vpop.permute.xlu1 %1164 }
 0x310   :  { %v1526_v46 = vsel %vm1501_vm8, %v1493_v40, %v1165_v19 }
 0x312   :  { %v1167_v21 = vpop.permute.xlu0 %1166 }
 0x313   :  { %v7317_v37 = vpop.permute.xlu1 %785  ;;  %v1527_v44 = vsel %vm1501_vm8, %v1494_v63, %v1167_v21  ;;  %v1463_v21 = vsel %vm296_vm2, %v1431_v38, %v7274_v62 }
 0x314   :  { %v1496_v19 = vsel %vm1468_vm7, %v1463_v21, %v1085_v39  ;;  %v1462_v39 = vsel %vm296_vm2, %v1430_v17, %v7284_v34 }
 0x315   :  { %v1529_v31 = vsel %vm1501_vm8, %v1496_v19, %v6259_v14  ;;  %v1495_v63 = vsel %vm1468_vm7, %v1462_v39, %v1083_v55  ;;  %v1374_v55 = vsel %vm1351_vm4, %v6890_v52, %v7258_v15 }
 0x316   :  { %v7315_v30 = vpop.permute.xlu0 %787  ;;  %v1562_v50 = vsel %vm1534_vm9, %v1529_v31, %v6320_v5 }
 0x317   :  { %v7321_v1 = vpop.permute.xlu1 %878  ;;  %v1595_v4 = vsel %vm1567_vm10, %v1562_v50, %v6396_v11 }
 0x31a   :  { %v7319_v27 = vpop.permute.xlu0 %880 }
 0x31b   :  { %v1169_v12 = vpop.permute.xlu1 %1168 }
 0x31c   :  { %v1528_v18 = vsel %vm1501_vm8, %v1495_v63, %v1169_v12  ;;  %v1400_v12 = vsel %vm1377_vm5, %v1374_v55, %v7310_v43 }
 0x31d   :  { %v1433_v52 = vsel %vm1403_vm6, %v1400_v12, %v7319_v27 }
 0x31e   :  { %v1240_v24 = vpop.permute.xlu0 %1239 }
 0x31f   :  { %v1242_v49 = vpop.permute.xlu1 %1241  ;;  %v1559_v26 = vsel %vm1534_vm9, %v1526_v46, %v1240_v24 }
 0x320   :  { %v1560_v16 = vsel %vm1534_vm9, %v1527_v44, %v1242_v49 }
 0x322   :  { %v7323_v13 = vpop.permute.xlu0 %882 }
 0x323   :  { %v885_v6 = vpop.permute.xlu1 %884 }
 0x326   :  { %v7325_v51 = vpop.permute.xlu0 %982 }
 0x327   :  { %v7337_v29 = vpop.permute.xlu1 %984 }
 0x32a   :  { %v1244_v58 = vpop.permute.xlu0 %1243 }
 0x32b   :  { %v1315_v47 = vpop.permute.xlu1 %1314  ;;  %v1561_v54 = vsel %vm1534_vm9, %v1528_v18, %v1244_v58 }
 0x32c   :  { %v1592_v42 = vsel %vm1567_vm10, %v1559_v26, %v1315_v47  ;;  %v7387_v47 = vld [vmem:[#allocation18] ss:$0 sm:$0xff] }
 0x32d   :  { %v1759_v43 = vadd.f32 %v7185_v25, %v7387_v47  ;;  %v1769_v25 = vadd.f32 %v7302_v53, %v7387_v47 }
 0x32e   :  { %v1317_v32 = vpop.permute.xlu0 %1316 }
 0x32f   :  { %v1593_v3 = vsel %vm1567_vm10, %v1560_v16, %v1317_v32  ;;  %v987_v24 = vpop.permute.xlu1 %986  ;;  %v1833_v17 = vmul.f32 0.999995, %v1759_v43 }
 0x330   :  { %v1650_v41 = vcombine.low %v1592_v42, %v1593_v3  ;;  %v1376_v3 = vsel %vm1351_vm4, %v6976_v20, %v7312_v7  ;;  %v1754_v20 = vadd.f32 %v7387_v47, %v7189_v57  ;;  %v1432_v7 = vsel %vm1403_vm6, %v6288_v22, %v7321_v1 }
 0x331   :  { %v1402_v38 = vsel %vm1377_vm5, %v1376_v3, %v7315_v30  ;;  %v1764_v1 = vadd.f32 %v7387_v47, %v7305_v28 }
 0x332   :  { %v989_v48 = vpop.permute.xlu0 %988  ;;  %4802 = vmatprep.mubr.msk.f32.mxu1 %vm1654_vm11, %v1650_v41  ;;  %v1435_v15 = vsel %vm1403_vm6, %v1402_v38, %v885_v6  ;;  %v1401_v41 = vsel %vm1377_vm5, %v1375_v60, %v7317_v37  ;;  %v1464_v37 = vsel %vm296_vm2, %v1432_v7, %v7325_v51  ;;  %v1832_v39 = vmul.f32 0.999995, %v1754_v20 }
 0x333   :  { %v1087_v62 = vpop.permute.xlu1 %1086  ;;  %v1467_v9 = vsel %vm296_vm2, %v1435_v15, %v989_v48  ;;  %v1434_v30 = vsel %vm1403_vm6, %v1401_v41, %v7323_v13  ;;  %v1465_v48 = vsel %vm296_vm2, %v1433_v52, %v7337_v29 }
 0x334   :  { %v1466_v57 = vsel %vm296_vm2, %v1434_v30, %v987_v24  ;;  %v1497_v13 = vsel %vm1468_vm7, %v1464_v37, %v1087_v62  ;;  %v1881_v55 = vmul.f32 %v7227_v61, %v1832_v39  ;;  %v9699_v37 = vld [vmem:[#allocation45_spill] sm:$0xff] }
 0x336   :  { %v1089_v49 = vpop.permute.xlu0 %1088 }
 0x337   :  { %v1319_v40 = vpop.permute.xlu1 %1318  ;;  %v1498_v21 = vsel %vm1468_vm7, %v1465_v48, %v1089_v49 }
 0x338   :  { %v1594_v44 = vsel %vm1567_vm10, %v1561_v54, %v1319_v40 }
 0x339   :  { %v4792_v23 = vpop.f32.mrb[4].mxu1  ;;  %v1651_v26 = vcombine.low %v1594_v44, %v1595_v4 }
 0x33a   :  { %v1773_v32 = vpop.f32.mrb[5].mxu1  ;;  %v1091_v0 = vpop.permute.xlu0 %1090  ;;  %v1779_v8 = vadd.f32 %v4792_v23, %v7387_v47  ;;  %v1835_v23 = vmul.f32 0.999995, %v1769_v25  ;;  %v9698_v25 = vld [vmem:[#allocation46_spill] sm:$0xff] }
 0x33b   :  { %v1093_v34 = vpop.permute.xlu1 %1092  ;;  %4803 = vmatmul.mubr.msk.f32.gmra.mrb[12].mxu1 %vm1654_vm11, %v1651_v26  ;;  %v1499_v19 = vsel %vm1468_vm7, %v1466_v57, %v1091_v0  ;;  %v1774_v53 = vadd.f32 %v7387_v47, %v1773_v32  ;;  %v1834_v0 = vmul.f32 0.999995, %v1764_v1  ;;  %v9700_v48 = vcombine.low %v9698_v25, %v9699_v37  ;;  %v9702_v1 = vld [vmem:[#allocation47_spill] sm:$0xff] }
 0x33c   :  { %v1500_v27 = vsel %vm1468_vm7, %v1467_v9, %v1093_v34  ;;  %v1837_v63 = vmul.f32 0.999995, %v1779_v8  ;;  %v9706_v8 = vld [vmem:[#allocation49_spill] sm:$0xff] }
 0x33d   :  { %v1533_v51 = vsel %vm1501_vm8, %v1500_v27, %v6259_v14  ;;  %v1836_v50 = vmul.f32 0.999995, %v1774_v53  ;;  %v1883_v12 = vmul.f32 %v7227_v61, %v1834_v0  ;;  %v9707_v53 = vld [vmem:[#allocation50_spill] sm:$0xff]  ;;  %v9719_v0 = vld [vmem:[#allocation56_spill] sm:$0xff] }
 0x33e   :  { %v1171_v46 = vpop.permute.xlu0 %1170  ;;  %v1566_v32 = vsel %vm1534_vm9, %v1533_v51, %v6320_v5  ;;  %v1886_v60 = vmul.f32 %v7227_v61, %v1837_v63  ;;  %v9708_v51 = vcombine.low %v9706_v8, %v9707_v53 }
 0x33f   :  { %v1173_v58 = vpop.permute.xlu1 %1172  ;;  %v1530_v24 = vsel %vm1501_vm8, %v1497_v13, %v1171_v46  ;;  %v1882_v46 = vmul.f32 %v7227_v61, %v1833_v17  ;;  %v1599_v26 = vsel %vm1567_vm10, %v1566_v32, %v6396_v11  ;;  %v1885_v3 = vmul.f32 %v7227_v61, %v1836_v50  ;;  %v9715_v17 = vld [vmem:[#allocation54_spill] sm:$0xff] }
 0x340   :  { %v1531_v28 = vsel %vm1501_vm8, %v1498_v21, %v1173_v58  ;;  %v9703_v21 = vld [vmem:[#allocation48_spill] sm:$0xff] }
 0x341   :  { %v9704_v13 = vcombine.low %v9702_v1, %v9703_v21 }
 0x342   :  { %v1175_v16 = vpop.permute.xlu0 %1174 }
 0x343   :  { %v1246_v10 = vpop.permute.xlu1 %1245  ;;  %v1532_v29 = vsel %vm1501_vm8, %v1499_v19, %v1175_v16  ;;  %v1884_v16 = vmul.f32 %v7227_v61, %v1835_v23  ;;  %v9718_v23 = vld [vmem:[#allocation55_spill] sm:$0xff] }
 0x344   :  { %v1563_v62 = vsel %vm1534_vm9, %v1530_v24, %v1246_v10  ;;  %v9711_v24 = vld [vmem:[#allocation52_spill] sm:$0xff]  ;;  %v9720_v32 = vcombine.low %v9718_v23, %v9719_v0 }
 0x346   :  { %v1248_v42 = vpop.permute.xlu0 %1247 }
 0x347   :  { %v1250_v33 = vpop.permute.xlu1 %1249  ;;  %v1564_v18 = vsel %vm1534_vm9, %v1531_v28, %v1248_v42 }
 0x348   :  { %v1565_v49 = vsel %vm1534_vm9, %v1532_v29, %v1250_v33  ;;  %v9710_v33 = vld [vmem:[#allocation51_spill] sm:$0xff] }
 0x349   :  { %v9712_v28 = vcombine.low %v9710_v33, %v9711_v24  ;;  %v9722_v24 = vld [vmem:[#allocation57_spill] sm:$0xff] }
 0x34a   :  { %v1321_v6 = vpop.permute.xlu0 %1320 }
 0x34b   :  { %v1323_v40 = vpop.permute.xlu1 %1322  ;;  %v1596_v44 = vsel %vm1567_vm10, %v1563_v62, %v1321_v6 }
 0x34c   :  { %v1597_v4 = vsel %vm1567_vm10, %v1564_v18, %v1323_v40 }
 0x34d   :  { %v1652_v34 = vcombine.low %v1596_v44, %v1597_v4 }
 0x34e   :  { %v1325_v31 = vpop.permute.xlu0 %1324 }
 0x34f   :  { %v1598_v54 = vsel %vm1567_vm10, %v1565_v49, %v1325_v31  ;;  %4805 = vmatprep.mubr.msk.f32.mxu1 %vm1654_vm11, %v1652_v34  ;;  %v7449_v42 = vpop.permute.xlu1 %1897  ;;  %v9714_v31 = vld [vmem:[#allocation53_spill] sm:$0xff] }
 0x350   :  { %v1653_v58 = vcombine.low %v1598_v54, %v1599_v26  ;;  %9697 = vst [vmem:[#allocation69_spill] sm:$0xff] %v7449_v42  ;;  %v1903_v38 = vadd.f32 %v7449_v42, %v1881_v55  ;;  %v1904_v52 = vadd.f32 %v7449_v42, %v1882_v46  ;;  %v1905_v15 = vadd.f32 %v7449_v42, %v1883_v12 }
 0x351   :  { %v1906_v43 = vadd.f32 %v7449_v42, %v1884_v16  ;;  %v1907_v41 = vadd.f32 %v7449_v42, %v1885_v3  ;;  %v1908_v9 = vadd.f32 %v7449_v42, %v1886_v60  ;;  %v9716_v62 = vcombine.low %v9714_v31, %v9715_v17 }
 0x352   :  { %4806 = vmatmul.mubr.msk.f32.gmra.mrb[14].mxu1 %vm1654_vm11, %v1653_v58  ;;  %v1919_v10 = vmax.f32 %v1903_v38, 0.0  ;;  %v1920_v20 = vmax.f32 %v1904_v52, 0.0  ;;  %v1921_v7 = vmax.f32 %v1905_v15, 0.0 }
 0x353   :  { %v1922_v30 = vmax.f32 %v1906_v43, 0.0  ;;  %v1923_v27 = vmax.f32 %v1907_v41, 0.0  ;;  %v1924_v6 = vmax.f32 %v1908_v9, 0.0 }
 0x354   :  { %v7461_v57 = vadd.f32 %v9700_v48, %v1919_v10  ;;  %v7466_v19 = vadd.f32 %v9704_v13, %v1920_v20  ;;  %v7471_v29 = vadd.f32 %v9708_v51, %v1921_v7 }
 0x355   :  { %v7476_v49 = vadd.f32 %v9712_v28, %v1922_v30  ;;  %v7481_v39 = vadd.f32 %v9716_v62, %v1923_v27  ;;  %v7486_v63 = vadd.f32 %v9720_v32, %v1924_v6  ;;  %v9723_v28 = vld [vmem:[#allocation58_spill] sm:$0xff] }
 0x356   :  { %9701 = vst [vmem:[#allocation70_spill] sm:$0xff] %v7461_v57  ;;  %9705 = vst [vmem:[#allocation68_spill] sm:$0xff] %v7466_v19  ;;  %v2015_v50 = vrot.slane %v7461_v57, 7  ;;  %v1999_v18 = vcombine.high %v7461_v57, %v7461_v57  ;;  %v2017_v54 = vrot.slane %v7466_v19, 7  ;;  %v2000_v38 = vcombine.high %v7466_v19, %v7466_v19  ;;  %v5159_v19 = vld [vmem:[%s5563_s5 + $0x40] sm:$0xf] }
 0x357   :  { %9709 = vst [vmem:[#allocation46_spill] sm:$0xff] %v7471_v29  ;;  %9713 = vst [vmem:[#allocation45_spill] sm:$0xff] %v7476_v49  ;;  %v2019_v43 = vrot.slane %v7471_v29, 7  ;;  %v2001_v7 = vcombine.high %v7471_v29, %v7471_v29  ;;  %v2021_v21 = vrot.slane %v7476_v49, 7  ;;  %v9724_v31 = vcombine.low %v9722_v24, %v9723_v28  ;;  %v7659_v24 = vpop.permute.xlu0 %1899 }
 0x358   :  { %9717 = vst [vmem:[#allocation47_spill] sm:$0xff] %v7481_v39  ;;  %9721 = vst [vmem:[#allocation48_spill] sm:$0xff] %v7486_v63  ;;  %v2079_v40 = vsel %vm521_vm0, 0.0, %v2015_v50  ;;  %v2016_v44 = vrot.slane %v1999_v18, 7  ;;  %v2081_v4 = vsel %vm521_vm0, 0.0, %v2017_v54  ;;  %v2018_v15 = vrot.slane %v2000_v38, 7 }
 0x359   :  { %v7495_v46 = vsel %vm555_vm1, %v2079_v40, 0.0  ;;  %v7503_v16 = vsel %vm555_vm1, %v2081_v4, 0.0  ;;  %v2083_v9 = vsel %vm521_vm0, 0.0, %v2019_v43  ;;  %v2020_v48 = vrot.slane %v2001_v7, 7  ;;  %v412_v38 = vld [vmem:[%s9643_s11 + $0x50] sm:$0xff]  ;;  %9729 = vst [vmem:[#allocation53_spill] sm:$0xff] %v7659_v24 }
 0x35a   :  { %v2167_v26 = vrot.slane %v7495_v46, 1  ;;  %v2080_v34 = vsel %vm521_vm0, 0.0, %v2016_v44  ;;  %v7512_v58 = vrot.slane %v7503_v16, 1  ;;  %v2263_v60 = vrot.slane %v7495_v46, 2 }
 0x35b   :  { %v7500_v55 = vsel %vm555_vm1, %v2080_v34, 0.0  ;;  %v7526_v52 = vrot.slane %v7503_v16, 2  ;;  %v2082_v41 = vsel %vm521_vm0, 0.0, %v2018_v15  ;;  %v7550_v6 = vsel %vm555_vm1, %v2083_v9, 0.0 }
 0x35c   :  { %2191 = vrot.lane.b32.xlu1 %v2167_v26, %s5536_s0  ;;  %v7507_v12 = vrot.slane %v7500_v55, 1  ;;  %v7519_v3 = vrot.slane %v7500_v55, 2  ;;  %v7540_v10 = vsel %vm555_vm1, %v2082_v41, 0.0  ;;  %v2170_v37 = vrot.slane %v7550_v6, 1  ;;  %v414_v41 = vld [vmem:[%s9643_s11 + $0x60] sm:$0xff] }
 0x35d   :  { %v2463_v8 = vrot.slane %v7540_v10, 1  ;;  %v2084_v53 = vsel %vm521_vm0, 0.0, %v2020_v48  ;;  %v2085_v33 = vsel %vm521_vm0, 0.0, %v2021_v21  ;;  %v2266_v50 = vrot.slane %v7550_v6, 2 }
 0x35e   :  { %2193 = vrot.lane.b32.xlu0 %v7507_v12, %s5536_s0  ;;  %v7572_v62 = vsel %vm555_vm1, %v2084_v53, 0.0  ;;  %v7576_v23 = vsel %vm555_vm1, %v2085_v33, 0.0  ;;  %v2567_v18 = vrot.slane %v7540_v10, 2  ;;  %v2002_v44 = vcombine.high %v7476_v49, %v7476_v49  ;;  %v418_v33 = vld [vmem:[%s9643_s11 + $0x80] sm:$0xff] }
 0x35f   :  { %9726 = vst [vmem:[#allocation50_spill] sm:$0xff] %v7572_v62  ;;  %9727 = vst [vmem:[#allocation51_spill] sm:$0xff] %v7576_v23  ;;  %v7581_v0 = vrot.slane %v7572_v62, 1  ;;  %v7586_v32 = vrot.slane %v7576_v23, 1  ;;  %v7605_v54 = vrot.slane %v7572_v62, 2  ;;  %v7610_v40 = vrot.slane %v7576_v23, 2 }
 0x360   :  { %2195 = vrot.lane.b32.xlu1 %v7512_v58, %s5536_s0  ;;  %v2022_v4 = vrot.slane %v2002_v44, 7  ;;  %v2003_v53 = vcombine.high %v7481_v39, %v7481_v39 }
 0x362   :  { %2287 = vrot.lane.b32.xlu0 %v2263_v60, %s5527_s15  ;;  %v2024_v44 = vrot.slane %v2003_v53, 7  ;;  %v2004_v53 = vcombine.high %v7486_v63, %v7486_v63 }
 0x364   :  { %2289 = vrot.lane.b32.xlu1 %v7519_v3, %s5527_s15 }
 0x366   :  { %2291 = vrot.lane.b32.xlu0 %v7526_v52, %s5527_s15 }
 0x368   :  { %2367 = vrot.lane.b32.xlu1 %v7495_v46, %s5542_s6 }
 0x36a   :  { %2369 = vrot.lane.b32.xlu0 %v7500_v55, %s5542_s6 }
 0x36c   :  { %2371 = vrot.lane.b32.xlu1 %v7503_v16, %s5542_s6 }
 0x36e   :  { %v4795_v20 = vpop.f32.mrb[6].mxu1  ;;  %2373 = vrot.lane.b32.xlu0 %v7540_v10, %s5542_s6 }
 0x36f   :  { %v1789_v30 = vadd.f32 %v4795_v20, %v7387_v47  ;;  %v7547_v27 = vpop.f32.mrb[7].mxu1 }
 0x370   :  { %2471 = vrot.lane.b32.xlu1 %v2167_v26, %s5543_s27  ;;  %v2086_v26 = vsel %vm521_vm0, 0.0, %v2022_v4  ;;  %v9730_v4 = vld [vmem:[#allocation62_spill] sm:$0xff] }
 0x371   :  { %v1839_v25 = vmul.f32 0.999995, %v1789_v30  ;;  %v7630_v34 = vsel %vm555_vm1, %v2086_v26, 0.0  ;;  %v9731_v26 = vld [vmem:[#allocation63_spill] sm:$0xff] }
 0x372   :  { %2473 = vrot.lane.b32.xlu0 %v7507_v12, %s5543_s27 }
 0x373   :  { %v1888_v1 = vmul.f32 %v7227_v61, %v1839_v25  ;;  %v415_v25 = vld [vmem:[%s9643_s11 + $0x68] sm:$0xff] }
 0x374   :  { %2197 = vrot.lane.b32.xlu1 %v2170_v37, %s5536_s0 }
 0x375   :  { %v1910_v13 = vadd.f32 %v7449_v42, %v1888_v1 }
 0x376   :  { %2475 = vrot.lane.b32.xlu0 %v7512_v58, %s5543_s27 }
 0x377   :  { %v1926_v51 = vmax.f32 %v1910_v13, 0.0 }
 0x378   :  { %2477 = vrot.lane.b32.xlu1 %v2463_v8, %s5543_s27 }
 0x379   :  { %v7569_v17 = vadd.f32 %v9724_v31, %v1926_v51  ;;  %v417_v51 = vld [vmem:[%s9643_s11 + $0x78] sm:$0xff] }
 0x37a   :  { %2575 = vrot.lane.b32.xlu0 %v2263_v60, %s5544_s29  ;;  %v2023_v60 = vrot.slane %v7481_v39, 7  ;;  %v4975_v31 = vpack.c.bf16 %v418_v33, %v417_v51  ;;  %v5157_v33 = vld [vmem:[%s5563_s5 + $0x30] sm:$0xf] }
 0x37b   :  { %9725 = vst [vmem:[#allocation49_spill] sm:$0xff] %v7569_v17 }
 0x37c   :  { %2577 = vrot.lane.b32.xlu1 %v7519_v3, %s5544_s29  ;;  %v2087_v7 = vsel %vm521_vm0, 0.0, %v2023_v60  ;;  %v9732_v60 = vcombine.low %v9730_v4, %v9731_v26 }
 0x37d   :  { %v7650_v1 = vsel %vm555_vm1, %v2087_v7, 0.0  ;;  %v9736_v7 = vmov 0.0|0.0  }
 0x37e   :  { %2199 = vrot.lane.b32.xlu0 %v7581_v0, %s5536_s0  ;;  %9728 = vst [vmem:[#allocation52_spill] sm:$0xff] %v7650_v1  ;;  %v2173_v28 = vrot.slane %v7650_v1, 1 }
 0x380   :  { %2201 = vrot.lane.b32.xlu1 %v7586_v32, %s5536_s0 }
 0x382   :  { %2293 = vrot.lane.b32.xlu0 %v2266_v50, %s5527_s15 }
 0x384   :  { %2579 = vrot.lane.b32.xlu1 %v7526_v52, %s5544_s29 }
 0x386   :  { %2581 = vrot.lane.b32.xlu0 %v2567_v18, %s5544_s29 }
 0x388   :  { %2671 = vrot.lane.b32.xlu1 %v7500_v55, %s5545_s9 }
 0x38a   :  { %2673 = vrot.lane.b32.xlu0 %v7503_v16, %s5545_s9 }
 0x38c   :  { %2295 = vrot.lane.b32.xlu1 %v7605_v54, %s5527_s15 }
 0x38e   :  { %2297 = vrot.lane.b32.xlu0 %v7610_v40, %s5527_s15 }
 0x390   :  { %2375 = vrot.lane.b32.xlu1 %v7550_v6, %s5542_s6 }
 0x392   :  { %2377 = vrot.lane.b32.xlu0 %v7572_v62, %s5542_s6 }
 0x394   :  { %2675 = vrot.lane.b32.xlu1 %v7540_v10, %s5545_s9  ;;  %v1784_v10 = vadd.f32 %v7387_v47, %v7547_v27 }
 0x396   :  { %2743 = vrot.lane.b32.xlu0 %v7507_v12, %s5546_s8  ;;  %v411_v12 = vld [vmem:[%s9643_s11 + $0x48] sm:$0xff] }
 0x397   :  { %v4963_v43 = vpack.c.bf16 %v412_v38, %v411_v12  ;;  %v2025_v38 = vrot.slane %v7486_v63, 7 }
 0x398   :  { %2745 = vrot.lane.b32.xlu1 %v7512_v58, %s5546_s8  ;;  %v413_v58 = vld [vmem:[%s9643_s11 + $0x58] sm:$0xff] }
 0x399   :  { %v4967_v30 = vpack.c.bf16 %v414_v41, %v413_v58  ;;  %4964 = vmatprep.subr.bf16.mxu0 %v4963_v43  ;;  %5037 = vmatprep.subr.bf16.mxu1 %v4963_v43  ;;  %v2088_v58 = vsel %vm521_vm0, 0.0, %v2024_v44  ;;  %v419_v41 = vld [vmem:[%s9643_s11 + $0x88] sm:$0xff] }
 0x39a   :  { %2379 = vrot.lane.b32.xlu0 %v7576_v23, %s5542_s6  ;;  %4966 = vmatpush3.bf16.msra.mxu0 %v4963_v43 }
 0x39b   :  { %4968 = vmatprep.subr.bf16.mxu0 %v4967_v30  ;;  %5042 = vmatpush3.bf16.msra.mxu1 %v4963_v43  ;;  %v7686_v43 = vsel %vm555_vm1, %v2088_v58, 0.0 }
 0x39c   :  { %2381 = vrot.lane.b32.xlu1 %v7630_v34, %s5542_s6  ;;  %5038 = vmatprep.subr.bf16.mxu1 %v4967_v30  ;;  %9734 = vst [vmem:[#allocation55_spill] sm:$0xff] %v7686_v43  ;;  %v7725_v27 = vrot.slane %v7686_v43, 2 }
 0x39e   :  { %2479 = vrot.lane.b32.xlu0 %v2170_v37, %s5543_s27  ;;  %v416_v37 = vld [vmem:[%s9643_s11 + $0x70] sm:$0xff]  ;;  %4970 = vmatpush3.bf16.msra.mxu0 %v4967_v30 }
 0x39f   :  { %v4971_v21 = vpack.c.bf16 %v416_v37, %v415_v25  ;;  %5043 = vmatpush3.bf16.msra.mxu1 %v4967_v30  ;;  %v2269_v25 = vrot.slane %v7650_v1, 2  ;;  %v1838_v37 = vmul.f32 0.999995, %v1784_v10 }
 0x3a0   :  { %2481 = vrot.lane.b32.xlu1 %v7581_v0, %s5543_s27 }
 0x3a1   :  { %4972 = vmatprep.subr.bf16.mxu0 %v4971_v21  ;;  %5039 = vmatprep.subr.bf16.mxu1 %v4971_v21 }
 0x3a2   :  { %2747 = vrot.lane.b32.xlu0 %v2463_v8, %s5546_s8  ;;  %4974 = vmatpush3.bf16.msra.mxu0 %v4971_v21 }
 0x3a3   :  { %4976 = vmatprep.subr.bf16.mxu0 %v4975_v31  ;;  %5044 = vmatpush3.bf16.msra.mxu1 %v4971_v21 }
 0x3a4   :  { %2815 = vrot.lane.b32.xlu1 %v7519_v3, %s5531_s1  ;;  %5040 = vmatprep.subr.bf16.mxu1 %v4975_v31 }
 0x3a5   :  { %v4798_v15 = vpop.f32.mrb[8].mxu1 }
 0x3a6   :  { %v1799_v9 = vadd.f32 %v4798_v15, %v7387_v47  ;;  %v7641_v20 = vpop.f32.mrb[9].mxu1  ;;  %2817 = vrot.lane.b32.xlu0 %v7526_v52, %s5531_s1  ;;  %v2464_v52 = vrot.slane %v7630_v34, 1  ;;  %v2089_v15 = vsel %vm521_vm0, 0.0, %v2025_v38  ;;  %4978 = vmatpush3.bf16.msra.mxu0 %v4975_v31 }
 0x3a7   :  { %5045 = vmatpush3.bf16.msra.mxu1 %v4975_v31  ;;  %4824 = vmatprep.subr.mxu0 %v419_v41 }
 0x3a8   :  { %v1841_v48 = vmul.f32 0.999995, %v1799_v9  ;;  %2203 = vrot.lane.b32.xlu1 %v2173_v28, %s5536_s0  ;;  %v7692_v9 = vsel %vm555_vm1, %v2089_v15, 0.0  ;;  %5041 = vmatprep.subr.mxu1 %v419_v41 }
 0x3a9   :  { %9735 = vst [vmem:[#allocation56_spill] sm:$0xff] %v7692_v9  ;;  %v7704_v30 = vrot.slane %v7692_v9, 1  ;;  %v7731_v21 = vrot.slane %v7692_v9, 2 }
 0x3aa   :  { %v1890_v13 = vmul.f32 %v7217_v35, %v1841_v48  ;;  %2483 = vrot.lane.b32.xlu0 %v7586_v32, %s5543_s27  ;;  %4825 = vmatpush3.msra.mxu0 %v419_v41  ;;  %v1887_v48 = vmul.f32 %v7227_v61, %v1838_v37 }
 0x3ab   :  { %5046 = vmatpush3.msra.mxu1 %v419_v41  ;;  %4983 = vmatprep.subr.bf16.mxu0 %v9736_v7 }
 0x3ac   :  { %v1912_v8 = vadd.f32 %v7659_v24, %v1890_v13  ;;  %2485 = vrot.lane.b32.xlu1 %v2464_v52, %s5543_s27  ;;  %v1909_v13 = vadd.f32 %v7449_v42, %v1887_v48 }
 0x3ae   :  { %v1928_v3 = vmax.f32 %v1912_v8, 0.0  ;;  %2583 = vrot.lane.b32.xlu0 %v2266_v50, %s5544_s29  ;;  %v7698_v50 = vrot.slane %v7686_v43, 1  ;;  %v1925_v51 = vmax.f32 %v1909_v13, 0.0  ;;  %v5158_v8 = vld [vmem:[%s5563_s5 + $0x34] sm:$0xf] }
 0x3af   :  { %v1941_v31 = vcombine.low %v5157_v33, %v5158_v8 }
 0x3b0   :  { %v7671_v12 = vadd.f32 %v9732_v60, %v1928_v3  ;;  %2585 = vrot.lane.b32.xlu1 %v7605_v54, %s5544_s29  ;;  %v2026_v3 = vrot.slane %v2004_v53, 7 }
 0x3b1   :  { %v7748_v44 = vadd.f32 %v1941_v31, %v1925_v51 }
 0x3b2   :  { %9733 = vst [vmem:[#allocation54_spill] sm:$0xff] %v7671_v12  ;;  %2819 = vrot.lane.b32.xlu0 %v2567_v18, %s5531_s1  ;;  %v9558_v18 = vrot.slane %v7630_v34, 2  ;;  %v2090_v26 = vsel %vm521_vm0, 0.0, %v2026_v3 }
 0x3b3   :  { %9737 = vst [vmem:[#allocation57_spill] sm:$0xff] %v7748_v44  ;;  %v7760_v38 = vsel %vm555_vm1, %v2090_v26, 0.0  ;;  %v2029_v26 = vrot.slane %v7569_v17, 7 }
 0x3b4   :  { %2205 = vrot.lane.b32.xlu1 %v7698_v50, %s5536_s0 }
 0x3b6   :  { %2207 = vrot.lane.b32.xlu0 %v7704_v30, %s5536_s0 }
 0x3b8   :  { %2299 = vrot.lane.b32.xlu1 %v2269_v25, %s5527_s15 }
 0x3ba   :  { %2587 = vrot.lane.b32.xlu0 %v7610_v40, %s5544_s29 }
 0x3bc   :  { %2589 = vrot.lane.b32.xlu1 %v9558_v18, %s5544_s29  ;;  %v9738_v18 = vld [vmem:[#allocation66_spill] sm:$0xff] }
 0x3be   :  { %2677 = vrot.lane.b32.xlu0 %v7572_v62, %s5545_s9 }
 0x3c0   :  { %2679 = vrot.lane.b32.xlu1 %v7576_v23, %s5545_s9 }
 0x3c2   :  { %2301 = vrot.lane.b32.xlu0 %v7725_v27, %s5527_s15 }
 0x3c4   :  { %2303 = vrot.lane.b32.xlu1 %v7731_v21, %s5527_s15 }
 0x3c6   :  { %2383 = vrot.lane.b32.xlu0 %v7650_v1, %s5542_s6 }
 0x3c8   :  { %2385 = vrot.lane.b32.xlu1 %v7686_v43, %s5542_s6 }
 0x3ca   :  { %2681 = vrot.lane.b32.xlu0 %v7630_v34, %s5545_s9 }
 0x3cc   :  { %2749 = vrot.lane.b32.xlu1 %v7581_v0, %s5546_s8  ;;  %v2027_v0 = vrot.slane %v7748_v44, 7 }
 0x3ce   :  { %v7750_v4 = vpop.permute.xlu1 %2191  ;;  %2751 = vrot.lane.b32.xlu0 %v7586_v32, %s5546_s8  ;;  %v2091_v41 = vsel %vm521_vm0, 0.0, %v2027_v0  ;;  %v9565_v0 = vrot.slane %v7760_v38, 1 }
 0x3cf   :  { %v7783_v37 = vsel %vm555_vm1, %v2091_v41, 0.0 }
 0x3d0   :  { %2387 = vrot.lane.b32.xlu1 %v7692_v9, %s5542_s6  ;;  %v7757_v60 = vpop.permute.xlu0 %2193  ;;  %v9557_v33 = vrot.slane %v7783_v37, 1 }
 0x3d2   :  { %v7762_v58 = vpop.permute.xlu1 %2195  ;;  %2389 = vrot.lane.b32.xlu0 %v7760_v38, %s5542_s6 }
 0x3d4   :  { %2487 = vrot.lane.b32.xlu1 %v2173_v28, %s5543_s27  ;;  %v7770_v32 = vpop.permute.xlu0 %2287  ;;  %v2005_v28 = vcombine.high %v7748_v44, %v7748_v44 }
 0x3d6   :  { %v7772_v15 = vpop.permute.xlu1 %2289  ;;  %2489 = vrot.lane.b32.xlu0 %v7698_v50, %s5543_s27  ;;  %v2028_v31 = vrot.slane %v2005_v28, 7 }
 0x3d8   :  { %2753 = vrot.lane.b32.xlu1 %v2464_v52, %s5546_s8  ;;  %v7780_v10 = vpop.permute.xlu0 %2291 }
 0x3da   :  { %v4801_v48 = vpop.f32.mrb[10].mxu1  ;;  %v7787_v13 = vpop.permute.xlu1 %2367  ;;  %2821 = vrot.lane.b32.xlu0 %v7605_v54, %s5531_s1 }
 0x3db   :  { %v1809_v53 = vadd.f32 %v4801_v48, %v7387_v47  ;;  %v7792_v51 = vpop.f32.mrb[11].mxu1  ;;  %v2092_v48 = vsel %vm521_vm0, 0.0, %v2028_v31 }
 0x3dc   :  { %2823 = vrot.lane.b32.xlu1 %v7610_v40, %s5531_s1  ;;  %v7796_v52 = vpop.permute.xlu0 %2369  ;;  %v7830_v59 = vsel %vm555_vm1, %v2092_v48, 0.0 }
 0x3dd   :  { %v1843_v8 = vmul.f32 0.999995, %v1809_v53  ;;  %v7885_v61 = vrot.slane %v7830_v59, 2 }
 0x3de   :  { %v7799_v3 = vpop.permute.xlu1 %2371  ;;  %2209 = vrot.lane.b32.xlu0 %v9557_v33, %s5536_s0  ;;  %v2093_v33 = vsel %vm521_vm0, 0.0, %v2029_v26 }
 0x3df   :  { %v1892_v54 = vmul.f32 %v7217_v35, %v1843_v8  ;;  %v7837_v31 = vsel %vm555_vm1, %v2093_v33, 0.0 }
 0x3e0   :  { %2491 = vrot.lane.b32.xlu1 %v7704_v30, %s5543_s27  ;;  %v7808_v40 = vpop.permute.xlu0 %2373 }
 0x3e1   :  { %v1914_v41 = vadd.f32 %v7659_v24, %v1892_v54  ;;  %v9740_v54 = vcombine.low %v9738_v18, %v9739_v56  ;;  %v7845_v56 = vrot.slane %v7830_v59, 1 }
 0x3e2   :  { %v7812_v28 = vpop.permute.xlu1 %2471  ;;  %2493 = vrot.lane.b32.xlu0 %v9565_v0, %s5543_s27 }
 0x3e3   :  { %v1930_v53 = vmax.f32 %v1914_v41, 0.0  ;;  %v7852_v41 = vrot.slane %v7837_v31, 1 }
 0x3e4   :  { %2591 = vrot.lane.b32.xlu1 %v2269_v25, %s5544_s29  ;;  %v7821_v8 = vpop.permute.xlu0 %2473  ;;  %v9742_v25 = vrot.slane %v7630_v34, 2  ;;  %v9568_v34 = vrot.slane %v7783_v37, 2 }
 0x3e5   :  { %v7827_v36 = vadd.f32 %v9740_v54, %v1930_v53  ;;  %v1794_v53 = vadd.f32 %v7387_v47, %v7641_v20 }
 0x3e6   :  { %v7832_v0 = vpop.permute.xlu1 %2197  ;;  %2593 = vrot.lane.b32.xlu0 %v7725_v27, %s5544_s29 }
 0x3e7   :  { %9741 = vst [vmem:[#allocation58_spill] sm:$0xff] %v7827_v36  ;;  %v1840_v42 = vmul.f32 0.999995, %v1794_v53 }
 0x3e8   :  { %2825 = vrot.lane.b32.xlu1 %v9742_v25, %s5531_s1  ;;  %v7842_v26 = vpop.permute.xlu0 %2475  ;;  %v9572_v25 = vrot.slane %v7760_v38, 2 }
 0x3e9   :  { %v1889_v44 = vmul.f32 %v7217_v35, %v1840_v42  ;;  %v2006_v42 = vcombine.high %v7569_v17, %v7569_v17 }
 0x3ea   :  { %v7847_v18 = vpop.permute.xlu1 %2477  ;;  %2211 = vrot.lane.b32.xlu0 %v7845_v56, %s5536_s0 }
 0x3eb   :  { %v1911_v63 = vadd.f32 %v7659_v24, %v1889_v44  ;;  %v2030_v1 = vrot.slane %v2006_v42, 7 }
 0x3ec   :  { %2213 = vrot.lane.b32.xlu1 %v7852_v41, %s5536_s0  ;;  %v7856_v33 = vpop.permute.xlu0 %2575 }
 0x3ed   :  { %v1927_v57 = vmax.f32 %v1911_v63, 0.0 }
 0x3ee   :  { %v7859_v48 = vpop.permute.xlu1 %2577  ;;  %2305 = vrot.lane.b32.xlu0 %v9568_v34, %s5527_s15 }
 0x3f0   :  { %2595 = vrot.lane.b32.xlu1 %v7731_v21, %s5544_s29  ;;  %v7868_v54 = vpop.permute.xlu0 %2199 }
 0x3f1   :  { %9743 = vst [vmem:[#allocation62_spill] sm:$0xff] %v7868_v54 }
 0x3f2   :  { %v7871_v7 = vpop.permute.xlu1 %2201  ;;  %2597 = vrot.lane.b32.xlu0 %v9572_v25, %s5544_s29  ;;  %v7893_v25 = vrot.slane %v7837_v31, 2 }
 0x3f3   :  { %9744 = vst [vmem:[#allocation63_spill] sm:$0xff] %v7871_v7 }
 0x3f4   :  { %2683 = vrot.lane.b32.xlu1 %v7686_v43, %s5545_s9  ;;  %v7878_v34 = vpop.permute.xlu0 %2293  ;;  %v5160_v43 = vld [vmem:[%s5563_s5 + $0x44] sm:$0xf] }
 0x3f6   :  { %v7880_v20 = vpop.permute.xlu1 %2579  ;;  %2685 = vrot.lane.b32.xlu0 %v7692_v9, %s5545_s9  ;;  %v1943_v9 = vcombine.low %v5159_v19, %v5160_v43  ;;  %v2094_v19 = vsel %vm521_vm0, 0.0, %v2030_v1 }
 0x3f7   :  { %v7930_v42 = vsel %vm555_vm1, %v2094_v19, 0.0 }
 0x3f8   :  { %2307 = vrot.lane.b32.xlu1 %v7885_v61, %s5527_s15  ;;  %v7890_v53 = vpop.permute.xlu0 %2581  ;;  %v7918_v17 = vadd.f32 %v1943_v9, %v1927_v57 }
 0x3fa   :  { %v7895_v39 = vpop.permute.xlu1 %2671  ;;  %2309 = vrot.lane.b32.xlu0 %v7893_v25, %s5527_s15  ;;  %9747 = vst [vmem:[#allocation73_spill] sm:$0xff] %v7918_v17  ;;  %v2031_v9 = vrot.slane %v7918_v17, 7  ;;  %v2007_v36 = vcombine.high %v7918_v17, %v7918_v17 }
 0x3fc   :  { %2391 = vrot.lane.b32.xlu1 %v7783_v37, %s5542_s6  ;;  %v2674_v29 = vpop.permute.xlu0 %2673 }
 0x3fe   :  { %v7904_v49 = vpop.permute.xlu1 %2295  ;;  %2393 = vrot.lane.b32.xlu0 %v7830_v59, %s5542_s6 }
 0x3ff   :  { %9745 = vst [vmem:[#allocation66_spill] sm:$0xff] %v7904_v49  ;;  %v2095_v49 = vsel %vm521_vm0, 0.0, %v2031_v9 }
 0x400   :  { %2687 = vrot.lane.b32.xlu1 %v7760_v38, %s5545_s9  ;;  %v7912_v44 = vpop.permute.xlu0 %2297 }
 0x401   :  { %9746 = vst [vmem:[#allocation67_spill] sm:$0xff] %v7912_v44  ;;  %v9751_v44 = vrot.slane %v7760_v38, 1 }
 0x402   :  { %v7914_v62 = vpop.permute.xlu1 %2375  ;;  %2755 = vrot.lane.b32.xlu0 %v7698_v50, %s5546_s8 }
 0x404   :  { %2757 = vrot.lane.b32.xlu1 %v7704_v30, %s5546_s8  ;;  %v7922_v63 = vpop.permute.xlu0 %2377  ;;  %v9748_v30 = vrot.slane %v7783_v37, 1 }
 0x406   :  { %v7925_v43 = vpop.permute.xlu1 %2675  ;;  %2395 = vrot.lane.b32.xlu0 %v7837_v31, %s5542_s6 }
 0x408   :  { %2397 = vrot.lane.b32.xlu1 %v7930_v42, %s5542_s6  ;;  %v2744_v57 = vpop.permute.xlu0 %2743 }
 0x40a   :  { %v2746_v50 = vpop.permute.xlu1 %2745  ;;  %2495 = vrot.lane.b32.xlu0 %v9748_v30, %s5543_s27  ;;  %v7952_v30 = vsel %vm555_vm1, %v2095_v49, 0.0 }
 0x40b   :  { %9752 = vst [vmem:[#allocation76_spill] sm:$0xff] %v7952_v30  ;;  %v2179_v49 = vrot.slane %v7952_v30, 1 }
 0x40c   :  { %2497 = vrot.lane.b32.xlu1 %v7845_v56, %s5543_s27  ;;  %v7940_v1 = vpop.permute.xlu0 %2379 }
 0x40d   :  { %9749 = vst [vmem:[#allocation74_spill] sm:$0xff] %v7940_v1 }
 0x40e   :  { %v4804_v19 = vpop.f32.mrb[12].mxu1  ;;  %v7943_v54 = vpop.permute.xlu1 %2381  ;;  %2759 = vrot.lane.b32.xlu0 %v9751_v44, %s5546_s8  ;;  %v2887_v44 = vsel %vm1351_vm4, %v7495_v46, %v7750_v4 }
 0x40f   :  { %9750 = vst [vmem:[#allocation75_spill] sm:$0xff] %v7943_v54  ;;  %v1819_v23 = vadd.f32 %v4804_v19, %v7387_v47  ;;  %v7949_v7 = vpop.f32.mrb[13].mxu1  ;;  %v2911_v19 = vsel %vm1377_vm5, %v2887_v44, %v7770_v32 }
 0x410   :  { %2827 = vrot.lane.b32.xlu1 %v7725_v27, %s5531_s1  ;;  %v7958_v9 = vpop.permute.xlu0 %2479  ;;  %v2032_v27 = vrot.slane %v2007_v36, 7  ;;  %v2936_v46 = vsel %vm1403_vm6, %v2911_v19, %v7796_v52  ;;  %v2466_v19 = vrot.slane %v7930_v42, 1 }
 0x411   :  { %v1845_v1 = vmul.f32 0.999995, %v1819_v23  ;;  %v2935_v23 = vsel %vm1403_vm6, %v6288_v22, %v7787_v13  ;;  %v2968_v32 = vsel %vm296_vm2, %v2936_v46, %v7821_v8 }
 0x412   :  { %v7963_v54 = vpop.permute.xlu1 %2481  ;;  %2829 = vrot.lane.b32.xlu0 %v7731_v21, %s5531_s1  ;;  %v2967_v21 = vsel %vm296_vm2, %v2935_v23, %v7812_v28  ;;  %v3000_v52 = vsel %vm1468_vm7, %v2968_v32, %v7859_v48  ;;  %v2889_v23 = vsel %vm1351_vm4, %v7503_v16, %v7762_v58  ;;  %v9754_v32 = vld [vmem:[#allocation72_spill] sm:$0xff] }
 0x413   :  { %v1894_v17 = vmul.f32 %v7217_v35, %v1845_v1  ;;  %v2033_v1 = vrot.slane %v7671_v12, 7  ;;  %v2999_v13 = vsel %vm1468_vm7, %v2967_v21, %v7856_v33  ;;  %v3032_v8 = vsel %vm1501_vm8, %v3000_v52, %v2674_v29  ;;  %v9753_v29 = vld [vmem:[#allocation71_spill] sm:$0xff] }
 0x414   :  { %v2748_v4 = vpop.permute.xlu0 %2747  ;;  %2215 = vrot.lane.b32.xlu1 %v2179_v49, %s5536_s0  ;;  %v3031_v28 = vsel %vm1501_vm8, %v2999_v13, %v7895_v39  ;;  %v3064_v48 = vsel %vm1534_vm9, %v3032_v8, %v2746_v50  ;;  %v2096_v21 = vsel %vm521_vm0, 0.0, %v2032_v27  ;;  %v2913_v39 = vsel %vm1377_vm5, %v2889_v23, %v7780_v10 }
 0x415   :  { %v1916_v36 = vadd.f32 %v7659_v24, %v1894_v17  ;;  %v3063_v33 = vsel %vm1534_vm9, %v3031_v28, %v2744_v57  ;;  %v2938_v57 = vsel %vm1403_vm6, %v2913_v39, %v7808_v40  ;;  %v9757_v27 = vrot.slane %v7783_v37, 2 }
 0x416   :  { %v2816_v44 = vpop.permute.xlu1 %2815  ;;  %2499 = vrot.lane.b32.xlu0 %v7852_v41, %s5543_s27  ;;  %v2097_v10 = vsel %vm521_vm0, 0.0, %v2033_v1  ;;  %v2970_v28 = vsel %vm296_vm2, %v2938_v57, %v7847_v18  ;;  %v8024_v8 = vsel %vm555_vm1, %v2096_v21, 0.0  ;;  %v2888_v18 = vsel %vm1351_vm4, %v7500_v55, %v7757_v60 }
 0x417   :  { %v1932_v17 = vmax.f32 %v1916_v36, 0.0  ;;  %v9755_v36 = vcombine.low %v9753_v29, %v9754_v32  ;;  %v3095_v16 = vsel %vm1567_vm10, %v3063_v33, %v2816_v44  ;;  %9758 = vst [vmem:[#allocation72_spill] sm:$0xff] %v8024_v8  ;;  %v3002_v44 = vsel %vm1468_vm7, %v2970_v28, %v7890_v53 }
 0x418   :  { %v2818_v46 = vpop.permute.xlu0 %2817  ;;  %2501 = vrot.lane.b32.xlu1 %v2466_v19, %s5543_s27  ;;  %v9760_v23 = vrot.slane %v7760_v38, 2  ;;  %v8045_v53 = vrot.slane %v8024_v8, 1  ;;  %v2912_v33 = vsel %vm1377_vm5, %v2888_v18, %v7772_v15  ;;  %v9588_v39 = vrot.slane %v7952_v30, 2 }
 0x419   :  { %v8009_v13 = vadd.f32 %v9755_v36, %v1932_v17  ;;  %v3096_v58 = vsel %vm1567_vm10, %v3064_v48, %v2818_v46  ;;  %v8034_v17 = vsel %vm555_vm1, %v2097_v10, 0.0  ;;  %v3034_v48 = vsel %vm1501_vm8, %v3002_v44, %v6259_v14 }
 0x41a   :  { %v3165_v50 = vcombine.low %v3095_v16, %v3096_v58  ;;  %v8015_v52 = vpop.permute.xlu1 %2203  ;;  %2599 = vrot.lane.b32.xlu0 %v9757_v27, %s5544_s29  ;;  %9759 = vst [vmem:[#allocation77_spill] sm:$0xff] %v8034_v17  ;;  %v2937_v46 = vsel %vm1403_vm6, %v2912_v33, %v7799_v3  ;;  %v8058_v55 = vrot.slane %v8034_v17, 1  ;;  %v3066_v3 = vsel %vm1534_vm9, %v3034_v48, %v6320_v5 }
 0x41b   :  { %9756 = vst [vmem:[#allocation71_spill] sm:$0xff] %v8009_v13  ;;  %v2969_v60 = vsel %vm296_vm2, %v2937_v46, %v7842_v26  ;;  %v3098_v58 = vsel %vm1567_vm10, %v3066_v3, %v6396_v11  ;;  %v9587_v10 = vrot.slane %v7930_v42, 2  ;;  %v8107_v48 = vrot.slane %v8024_v8, 2 }
 0x41c   :  { %4826 = vmatprep.mubr.msk.f32.mxu0 %vm1654_vm11, %v3165_v50  ;;  %v8029_v40 = vpop.permute.xlu0 %2483  ;;  %2601 = vrot.lane.b32.xlu1 %v7885_v61, %s5544_s29  ;;  %v3001_v38 = vsel %vm1468_vm7, %v2969_v60, %v7880_v20  ;;  %v9761_v60 = vcombine.low %v6642_v45, %v6645_v2  ;;  %v2008_v45 = vcombine.high %v7671_v12, %v7671_v12 }
 0x41d   :  { %v3033_v29 = vsel %vm1501_vm8, %v3001_v38, %v7925_v43  ;;  %v1804_v43 = vadd.f32 %v7387_v47, %v7792_v51 }
 0x41e   :  { %v8039_v1 = vpop.permute.xlu1 %2485  ;;  %2831 = vrot.lane.b32.xlu0 %v9760_v23, %s5531_s1  ;;  %v3065_v36 = vsel %vm1534_vm9, %v3033_v29, %v2748_v4  ;;  %v8120_v29 = vrot.slane %v8034_v17, 2 }
 0x420   :  { %v8053_v21 = vpop.permute.xlu0 %2583  ;;  %2217 = vrot.lane.b32.xlu1 %v8045_v53, %s5536_s0 }
 0x422   :  { %v8064_v15 = vpop.permute.xlu1 %2585  ;;  %2219 = vrot.lane.b32.xlu0 %v8058_v55, %s5536_s0 }
 0x424   :  { %v2820_v20 = vpop.permute.xlu0 %2819  ;;  %2311 = vrot.lane.b32.xlu1 %v9588_v39, %s5527_s15 }
 0x425   :  { %v4807_v32 = vpop.f32.mrb[14].mxu1  ;;  %v3097_v57 = vsel %vm1567_vm10, %v3065_v36, %v2820_v20 }
 0x426   :  { %v1829_v26 = vadd.f32 %v4807_v32, %v7387_v47  ;;  %v8075_v16 = vpop.f32.mrb[15].mxu1  ;;  %v3166_v27 = vcombine.low %v3097_v57, %v3098_v58  ;;  %v8085_v4 = vpop.permute.xlu1 %2205  ;;  %2603 = vrot.lane.b32.xlu0 %v7893_v25, %s5544_s29  ;;  %v1842_v47 = vmul.f32 0.999995, %v1804_v43  ;;  %v5161_v58 = vld [vmem:[%s5563_s5 + $0x50] sm:$0xf] }
 0x427   :  { %v5162_v57 = vld [vmem:[%s5563_s5 + $0x54] sm:$0xf] }
 0x428   :  { %v1847_v50 = vmul.f32 0.999995, %v1829_v26  ;;  %4827 = vmatmul.mubr.msk.f32.vlgmr.msra.gmra.mrb[2].mxu0 %vm1654_vm11, %v3166_v27  ;;  %v8092_v44 = vpop.permute.xlu0 %2207  ;;  %2605 = vrot.lane.b32.xlu1 %v9587_v10, %s5544_s29  ;;  %v1891_v46 = vmul.f32 %v7217_v35, %v1842_v47  ;;  %v1945_v43 = vcombine.low %v5161_v58, %v5162_v57  ;;  %v2034_v27 = vrot.slane %v2008_v45, 7 }
 0x429   :  { %v2939_v10 = vsel %vm1403_vm6, %v6288_v22, %v7914_v62 }
 0x42a   :  { %v1896_v28 = vmul.f32 %v7217_v35, %v1847_v50  ;;  %v8098_v18 = vpop.permute.xlu1 %2299  ;;  %2689 = vrot.lane.b32.xlu0 %v7830_v59, %s5545_s9  ;;  %v1913_v36 = vadd.f32 %v7659_v24, %v1891_v46 }
 0x42c   :  { %v1918_v51 = vadd.f32 %v7659_v24, %v1896_v28  ;;  %v8102_v33 = vpop.permute.xlu0 %2587  ;;  %2691 = vrot.lane.b32.xlu1 %v7837_v31, %s5545_s9  ;;  %v1929_v20 = vmax.f32 %v1913_v36, 0.0 }
 0x42e   :  { %v1934_v23 = vmax.f32 %v1918_v51, 0.0  ;;  %v8115_v3 = vpop.permute.xlu1 %2589  ;;  %2313 = vrot.lane.b32.xlu0 %v8107_v48, %s5527_s15  ;;  %v8143_v47 = vadd.f32 %v1945_v43, %v1929_v20 }
 0x430   :  { %v8113_v38 = vadd.f32 %v9761_v60, %v1934_v23  ;;  %v2678_v32 = vpop.permute.xlu0 %2677  ;;  %2315 = vrot.lane.b32.xlu1 %v8120_v29, %s5527_s15  ;;  %9763 = vst [vmem:[#allocation79_spill] sm:$0xff] %v8143_v47  ;;  %v2098_v23 = vsel %vm521_vm0, 0.0, %v2034_v27  ;;  %v2009_v43 = vcombine.high %v8143_v47, %v8143_v47  ;;  %v2890_v27 = vsel %vm1351_vm4, %v7550_v6, %v7832_v0 }
 0x431   :  { %v8155_v60 = vsel %vm555_vm1, %v2098_v23, 0.0  ;;  %v2971_v6 = vsel %vm296_vm2, %v2939_v10, %v7958_v9  ;;  %v9766_v10 = vld [vmem:[#allocation63_spill] sm:$0xff] }
 0x432   :  { %9762 = vst [vmem:[#allocation78_spill] sm:$0xff] %v8113_v38  ;;  %v2680_v26 = vpop.permute.xlu1 %2679  ;;  %2399 = vrot.lane.b32.xlu0 %v7952_v30, %s5542_s6 }
 0x434   :  { %v8129_v2 = vpop.permute.xlu0 %2301  ;;  %2401 = vrot.lane.b32.xlu1 %v8024_v8, %s5542_s6 }
 0x436   :  { %v8135_v50 = vpop.permute.xlu1 %2303  ;;  %2693 = vrot.lane.b32.xlu0 %v7930_v42, %s5545_s9 }
 0x438   :  { %v8139_v28 = vpop.permute.xlu0 %2383  ;;  %2761 = vrot.lane.b32.xlu1 %v7845_v56, %s5546_s8  ;;  %v2035_v56 = vrot.slane %v8143_v47, 7 }
 0x43a   :  { %v8145_v51 = vpop.permute.xlu1 %2385  ;;  %2763 = vrot.lane.b32.xlu0 %v7852_v41, %s5546_s8  ;;  %v2099_v20 = vsel %vm521_vm0, 0.0, %v2035_v56  ;;  %v2914_v56 = vsel %vm1377_vm5, %v2890_v27, %v7878_v34  ;;  %v9765_v34 = vld [vmem:[#allocation58_spill] sm:$0xff]  ;;  %v9592_v27 = vrot.slane %v8155_v60, 1 }
 0x43b   :  { %v8174_v57 = vsel %vm555_vm1, %v2099_v20, 0.0  ;;  %v2036_v20 = vrot.slane %v2009_v43, 7  ;;  %v3003_v43 = vsel %vm1468_vm7, %v2971_v6, %v8053_v21 }
 0x43c   :  { %v8150_v46 = vpop.permute.xlu0 %2681  ;;  %2403 = vrot.lane.b32.xlu1 %v8034_v17, %s5542_s6  ;;  %9764 = vst [vmem:[#allocation80_spill] sm:$0xff] %v8174_v57 }
 0x43e   :  { %v2750_v36 = vpop.permute.xlu1 %2749  ;;  %2405 = vrot.lane.b32.xlu0 %v8155_v60, %s5542_s6 }
 0x440   :  { %v2752_v45 = vpop.permute.xlu0 %2751  ;;  %2503 = vrot.lane.b32.xlu1 %v2179_v49, %s5543_s27 }
 0x442   :  { %v8163_v41 = vpop.permute.xlu1 %2387  ;;  %2505 = vrot.lane.b32.xlu0 %v8045_v53, %s5543_s27 }
 0x444   :  { %v8168_v58 = vpop.permute.xlu0 %2389  ;;  %2765 = vrot.lane.b32.xlu1 %v2466_v19, %s5546_s8  ;;  %v9589_v19 = vrot.slane %v8174_v57, 1 }
 0x446   :  { %v8178_v49 = vpop.permute.xlu1 %2487  ;;  %2833 = vrot.lane.b32.xlu0 %v7885_v61, %s5531_s1  ;;  %v2940_v61 = vsel %vm1403_vm6, %v2914_v56, %v7922_v63  ;;  %v3035_v56 = vsel %vm1501_vm8, %v3003_v43, %v2678_v32 }
 0x447   :  { %v2972_v0 = vsel %vm296_vm2, %v2940_v61, %v7963_v54  ;;  %v9767_v54 = vld [vmem:[#allocation51_spill] sm:$0xff] }
 0x448   :  { %v8185_v23 = vpop.permute.xlu0 %2489  ;;  %2835 = vrot.lane.b32.xlu1 %v7893_v25, %s5531_s1  ;;  %v2037_v25 = vrot.slane %v9765_v34, 7  ;;  %v3004_v62 = vsel %vm1468_vm7, %v2972_v0, %v8064_v15  ;;  %v2892_v61 = vsel %vm1351_vm4, %v9767_v54, %v9766_v10  ;;  %v2100_v15 = vsel %vm521_vm0, 0.0, %v2036_v20  ;;  %v9768_v0 = vld [vmem:[#allocation67_spill] sm:$0xff] }
 0x449   :  { %v3036_v9 = vsel %vm1501_vm8, %v3004_v62, %v2680_v26  ;;  %v2916_v32 = vsel %vm1377_vm5, %v2892_v61, %v9768_v0  ;;  %v9769_v62 = vld [vmem:[#allocation75_spill] sm:$0xff]  ;;  %v8238_v54 = vsel %vm555_vm1, %v2100_v15, 0.0  ;;  %v9775_v15 = vrot.slane %v7930_v42, 2  ;;  %v9776_v0 = vld [vmem:[#allocation66_spill] sm:$0xff] }
 0x44a   :  { %v2754_v39 = vpop.permute.xlu1 %2753  ;;  %2221 = vrot.lane.b32.xlu0 %v9589_v19, %s5536_s0  ;;  %v3067_v19 = vsel %vm1534_vm9, %v3035_v56, %v2750_v36  ;;  %v3068_v21 = vsel %vm1534_vm9, %v3036_v9, %v2752_v45  ;;  %v2942_v10 = vsel %vm1403_vm6, %v2916_v32, %v9769_v62  ;;  %v9770_v45 = vrot.slane %v7952_v30, 2  ;;  %9771 = vst [vmem:[#allocation63_spill] sm:$0xff] %v8238_v54 }
 0x44b   :  { %v2101_v9 = vsel %vm521_vm0, 0.0, %v2037_v25  ;;  %v2974_v20 = vsel %vm296_vm2, %v2942_v10, %v8039_v1  ;;  %v9773_v25 = vld [vmem:[#allocation62_spill] sm:$0xff] }
 0x44c   :  { %v2822_v63 = vpop.permute.xlu0 %2821  ;;  %2507 = vrot.lane.b32.xlu1 %v8058_v55, %s5543_s27  ;;  %v8248_v61 = vsel %vm555_vm1, %v2101_v9, 0.0 }
 0x44d   :  { %v3099_v26 = vsel %vm1567_vm10, %v3067_v19, %v2822_v63  ;;  %v3006_v19 = vsel %vm1468_vm7, %v2974_v20, %v8115_v3  ;;  %9772 = vst [vmem:[#allocation51_spill] sm:$0xff] %v8248_v61  ;;  %v8259_v3 = vrot.slane %v8238_v54, 1  ;;  %v8272_v42 = vrot.slane %v8248_v61, 1 }
 0x44e   :  { %v2824_v6 = vpop.permute.xlu1 %2823  ;;  %2509 = vrot.lane.b32.xlu0 %v9592_v27, %s5543_s27 }
 0x44f   :  { %v3100_v43 = vsel %vm1567_vm10, %v3068_v21, %v2824_v6  ;;  %v9774_v21 = vld [vmem:[#allocation50_spill] sm:$0xff] }
 0x450   :  { %v3167_v36 = vcombine.low %v3099_v26, %v3100_v43  ;;  %v8229_v56 = vpop.permute.xlu0 %2209  ;;  %2607 = vrot.lane.b32.xlu1 %v9770_v45, %s5544_s29  ;;  %v2891_v1 = vsel %vm1351_vm4, %v9774_v21, %v9773_v25  ;;  %v3038_v26 = vsel %vm1501_vm8, %v3006_v19, %v6259_v14  ;;  %v9777_v43 = vld [vmem:[#allocation74_spill] sm:$0xff]  ;;  %v9591_v19 = vrot.slane %v8174_v57, 2 }
 0x451   :  { %v2915_v32 = vsel %vm1377_vm5, %v2891_v1, %v9776_v0  ;;  %v3070_v20 = vsel %vm1534_vm9, %v3038_v26, %v6320_v5 }
 0x452   :  { %v8242_v63 = vpop.permute.xlu1 %2491  ;;  %4829 = vmatprep.mubr.msk.f32.mxu0 %vm1654_vm11, %v3167_v36  ;;  %2609 = vrot.lane.b32.xlu0 %v8107_v48, %s5544_s29  ;;  %v2941_v62 = vsel %vm1403_vm6, %v2915_v32, %v9777_v43 }
 0x453   :  { %v2973_v36 = vsel %vm296_vm2, %v2941_v62, %v8029_v40 }
 0x454   :  { %v8253_v6 = vpop.permute.xlu0 %2493  ;;  %2837 = vrot.lane.b32.xlu1 %v9775_v15, %s5531_s1  ;;  %v3005_v45 = vsel %vm1468_vm7, %v2973_v36, %v8102_v33  ;;  %v3102_v33 = vsel %vm1567_vm10, %v3070_v20, %v6396_v11  ;;  %v5163_v15 = vld [vmem:[#allocation18] ss:$0 sm:$0xff]  ;;  %v8315_v36 = vrot.slane %v8238_v54, 2 }
 0x455   :  { %v3037_v25 = vsel %vm1501_vm8, %v3005_v45, %v8150_v46  ;;  %v1814_v0 = vadd.f32 %v5163_v15, %v7949_v7  ;;  %v1824_v27 = vadd.f32 %v5163_v15, %v8075_v16 }
 0x456   :  { %v8267_v10 = vpop.permute.xlu1 %2591  ;;  %2223 = vrot.lane.b32.xlu0 %v8259_v3, %s5536_s0  ;;  %v3069_v21 = vsel %vm1534_vm9, %v3037_v25, %v2754_v39  ;;  %v9590_v39 = vrot.slane %v8155_v60, 2  ;;  %v8323_v25 = vrot.slane %v8248_v61, 2 }
 0x457   :  { %v1844_v43 = vmul.f32 0.999995, %v1814_v0 }
 0x458   :  { %v8278_v9 = vpop.permute.xlu0 %2593  ;;  %2225 = vrot.lane.b32.xlu1 %v8272_v42, %s5536_s0 }
 0x459   :  { %v1893_v45 = vmul.f32 %v7217_v35, %v1844_v43  ;;  %v5164_v43 = vld [vmem:[%s5563_s5 + $0x60] sm:$0xf] }
 0x45a   :  { %v2826_v1 = vpop.permute.xlu1 %2825  ;;  %2317 = vrot.lane.b32.xlu0 %v9591_v19, %s5527_s15 }
 0x45b   :  { %v3101_v40 = vsel %vm1567_vm10, %v3069_v21, %v2826_v1  ;;  %v1915_v1 = vadd.f32 %v7659_v24, %v1893_v45 }
 0x45c   :  { %v3168_v32 = vcombine.low %v3101_v40, %v3102_v33  ;;  %v8295_v26 = vpop.permute.xlu0 %2211  ;;  %2611 = vrot.lane.b32.xlu1 %v8120_v29, %s5544_s29  ;;  %v2010_v33 = vcombine.high %v9765_v34, %v9765_v34 }
 0x45e   :  { %v8300_v46 = vpop.permute.xlu1 %2213  ;;  %4830 = vmatmul.mubr.msk.f32.gmra.mrb[4].mxu0 %vm1654_vm11, %v3168_v32  ;;  %2613 = vrot.lane.b32.xlu0 %v9590_v39, %s5544_s29  ;;  %v1931_v32 = vmax.f32 %v1915_v1, 0.0  ;;  %v5165_v39 = vld [vmem:[%s5563_s5 + $0x64] sm:$0xf]  ;;  %v2038_v47 = vrot.slane %v2010_v33, 7 }
 0x45f   :  { %v1947_v19 = vcombine.low %v5164_v43, %v5165_v39 }
 0x460   :  { %v8306_v62 = vpop.permute.xlu0 %2305  ;;  %2695 = vrot.lane.b32.xlu1 %v8024_v8, %s5545_s9  ;;  %v1846_v8 = vmul.f32 0.999995, %v1824_v27  ;;  %v2102_v16 = vsel %vm521_vm0, 0.0, %v2038_v47  ;;  %v9780_v47 = vrot.slane %v8174_v57, 1 }
 0x461   :  { %v8351_v34 = vadd.f32 %v1947_v19, %v1931_v32  ;;  %v8363_v39 = vsel %vm555_vm1, %v2102_v16, 0.0  ;;  %v9782_v16 = vrot.slane %v8155_v60, 1 }
 0x462   :  { %v8310_v7 = vpop.permute.xlu1 %2595  ;;  %2697 = vrot.lane.b32.xlu0 %v8034_v17, %s5545_s9  ;;  %v5167_v17 = vld [vmem:[%s5563_s5 + $0x74] sm:$0xf] }
 0x463   :  { %9779 = vst [vmem:[#allocation75_spill] sm:$0xff] %v8351_v34 }
 0x464   :  { %v8318_v20 = vpop.permute.xlu0 %2597  ;;  %2319 = vrot.lane.b32.xlu1 %v8315_v36, %s5527_s15 }
 0x466   :  { %v8325_v21 = vpop.permute.xlu1 %2683  ;;  %2321 = vrot.lane.b32.xlu0 %v8323_v25, %s5527_s15 }
 0x468   :  { %v8330_v40 = vpop.permute.xlu0 %2685  ;;  %2407 = vrot.lane.b32.xlu1 %v8174_v57, %s5542_s6 }
 0x46a   :  { %v8336_v0 = vpop.permute.xlu1 %2307  ;;  %2409 = vrot.lane.b32.xlu0 %v8238_v54, %s5542_s6 }
 0x46b   :  { %9778 = vst [vmem:[#allocation67_spill] sm:$0xff] %v8336_v0 }
 0x46c   :  { %v8343_v45 = vpop.permute.xlu0 %2309  ;;  %2699 = vrot.lane.b32.xlu1 %v8155_v60, %s5545_s9 }
 0x46e   :  { %v8347_v12 = vpop.permute.xlu1 %2391  ;;  %2767 = vrot.lane.b32.xlu0 %v8045_v53, %s5546_s8  ;;  %v1895_v53 = vmul.f32 %v7217_v35, %v1846_v8  ;;  %v2011_v35 = vcombine.high %v8351_v34, %v8351_v34 }
 0x470   :  { %v8353_v1 = vpop.permute.xlu0 %2393  ;;  %2769 = vrot.lane.b32.xlu1 %v8058_v55, %s5546_s8  ;;  %v2039_v55 = vrot.slane %v8351_v34, 7  ;;  %v1917_v33 = vadd.f32 %v7659_v24, %v1895_v53  ;;  %v5166_v24 = vld [vmem:[%s5563_s5 + $0x70] sm:$0xf]  ;;  %s9809_s5 = sld [smem:[#allocation35_spill]] }
 0x471   :  { %v1949_v30 = vcombine.low %v5166_v24, %v5167_v17 }
 0x472   :  { %v8358_v15 = vpop.permute.xlu1 %2687  ;;  %2411 = vrot.lane.b32.xlu0 %v8248_v61, %s5542_s6  ;;  %v2103_v8 = vsel %vm521_vm0, 0.0, %v2039_v55  ;;  %v1933_v53 = vmax.f32 %v1917_v33, 0.0  ;;  %v9783_v55 = vld [vmem:[#allocation52_spill] sm:$0xff]  ;;  %v2040_v33 = vrot.slane %v2011_v35, 7 }
 0x473   :  { %v2893_v0 = vsel %vm1351_vm4, %v9783_v55, %v8015_v52 }
 0x474   :  { %v2756_v27 = vpop.permute.xlu0 %2755  ;;  %2413 = vrot.lane.b32.xlu1 %v8363_v39, %s5542_s6  ;;  %v2917_v24 = vsel %vm1377_vm5, %v2893_v0, %v8098_v18  ;;  %v8404_v17 = vadd.f32 %v1949_v30, %v1933_v53  ;;  %v2041_v30 = vrot.slane %v8009_v13, 7  ;;  %v9607_v0 = vrot.slane %v8363_v39, 1 }
 0x475   :  { %v2944_v52 = vsel %vm1403_vm6, %v2917_v24, %v8145_v51  ;;  %v2104_v53 = vsel %vm521_vm0, 0.0, %v2040_v33  ;;  %v9785_v24 = vld [vmem:[#allocation56_spill] sm:$0xff] }
 0x476   :  { %v2758_v19 = vpop.permute.xlu1 %2757  ;;  %2511 = vrot.lane.b32.xlu0 %v9780_v47, %s5543_s27  ;;  %v8386_v47 = vsel %vm555_vm1, %v2103_v8, 0.0  ;;  %9784 = vst [vmem:[#allocation50_spill] sm:$0xff] %v8404_v17  ;;  %v2976_v18 = vsel %vm296_vm2, %v2944_v52, %v8185_v23 }
 0x477   :  { %v9608_v8 = vrot.slane %v8386_v47, 1 }
 0x478   :  { %v8373_v32 = vpop.permute.xlu0 %2395  ;;  %2513 = vrot.lane.b32.xlu1 %v8259_v3, %s5543_s27 }
 0x479   :  { %9781 = vst [vmem:[#allocation62_spill] sm:$0xff] %v8373_v32 }
 0x47a   :  { %v8378_v43 = vpop.permute.xlu1 %2397  ;;  %2771 = vrot.lane.b32.xlu0 %v9782_v16, %s5546_s8 }
 0x47c   :  { %v8390_v32 = vpop.permute.xlu0 %2495  ;;  %2839 = vrot.lane.b32.xlu1 %v8107_v48, %s5531_s1  ;;  %v2943_v48 = vsel %vm1403_vm6, %v6288_v22, %v8139_v28  ;;  %v3008_v28 = vsel %vm1468_vm7, %v2976_v18, %v8278_v9 }
 0x47d   :  { %v2975_v35 = vsel %vm296_vm2, %v2943_v48, %v8178_v49  ;;  %v3040_v23 = vsel %vm1501_vm8, %v3008_v28, %v8330_v40 }
 0x47e   :  { %v8397_v16 = vpop.permute.xlu1 %2497  ;;  %2841 = vrot.lane.b32.xlu0 %v8120_v29, %s5531_s1  ;;  %v3007_v29 = vsel %vm1468_vm7, %v2975_v35, %v8267_v10  ;;  %v2895_v10 = vsel %vm1351_vm4, %v9785_v24, %v8092_v44  ;;  %v3072_v48 = vsel %vm1534_vm9, %v3040_v23, %v2758_v19  ;;  %v9786_v19 = vrot.slane %v8174_v57, 2 }
 0x47f   :  { %v3039_v49 = vsel %vm1501_vm8, %v3007_v29, %v8325_v21  ;;  %v2043_v21 = vrot.slane %v8404_v17, 7  ;;  %v2919_v40 = vsel %vm1377_vm5, %v2895_v10, %v8135_v50  ;;  %v2105_v29 = vsel %vm521_vm0, 0.0, %v2041_v30 }
 0x480   :  { %v2760_v55 = vpop.permute.xlu0 %2759  ;;  %2227 = vrot.lane.b32.xlu1 %v9608_v8, %s5536_s0  ;;  %v3071_v9 = vsel %vm1534_vm9, %v3039_v49, %v2756_v27  ;;  %v2946_v44 = vsel %vm1403_vm6, %v2919_v40, %v8168_v58  ;;  %v8455_v50 = vsel %vm555_vm1, %v2104_v53, 0.0  ;;  %v8466_v30 = vsel %vm555_vm1, %v2105_v29, 0.0 }
 0x481   :  { %v2978_v28 = vsel %vm296_vm2, %v2946_v44, %v8253_v6  ;;  %v2107_v49 = vsel %vm521_vm0, 0.0, %v2043_v21  ;;  %v9787_v6 = vld [vmem:[#allocation55_spill] sm:$0xff]  ;;  %v8477_v24 = vrot.slane %v8455_v50, 1  ;;  %v8495_v21 = vrot.slane %v8466_v30, 1 }
 0x482   :  { %v2828_v51 = vpop.permute.xlu1 %2827  ;;  %2515 = vrot.lane.b32.xlu0 %v8272_v42, %s5543_s27  ;;  %v2894_v23 = vsel %vm1351_vm4, %v9787_v6, %v8085_v4  ;;  %v2013_v4 = vcombine.high %v8404_v17, %v8404_v17  ;;  %v9603_v6 = vrot.slane %v8363_v39, 2  ;;  %v2947_v57 = vsel %vm1403_vm6, %v6288_v22, %v8347_v12 }
 0x483   :  { %v3103_v33 = vsel %vm1567_vm10, %v3071_v9, %v2828_v51  ;;  %v3010_v51 = vsel %vm1468_vm7, %v2978_v28, %v8318_v20  ;;  %v9788_v20 = vrot.slane %v8155_v60, 2  ;;  %v2918_v10 = vsel %vm1377_vm5, %v2894_v23, %v8129_v2 }
 0x484   :  { %v2830_v52 = vpop.permute.xlu0 %2829  ;;  %2517 = vrot.lane.b32.xlu1 %v9607_v0, %s5543_s27  ;;  %v3042_v9 = vsel %vm1501_vm8, %v3010_v51, %v6259_v14  ;;  %v2045_v51 = vrot.slane %v8113_v38, 7 }
 0x485   :  { %v3104_v35 = vsel %vm1567_vm10, %v3072_v48, %v2830_v52  ;;  %v8484_v48 = vsel %vm555_vm1, %v2107_v49, 0.0  ;;  %v2945_v52 = vsel %vm1403_vm6, %v2918_v10, %v8163_v41  ;;  %v3074_v41 = vsel %vm1534_vm9, %v3042_v9, %v6320_v5 }
 0x486   :  { %v3169_v27 = vcombine.low %v3103_v33, %v3104_v35  ;;  %v8446_v18 = vpop.permute.xlu1 %2215  ;;  %2615 = vrot.lane.b32.xlu0 %v9786_v19, %s5544_s29  ;;  %v2977_v2 = vsel %vm296_vm2, %v2945_v52, %v8242_v63  ;;  %v9605_v35 = vrot.slane %v8484_v48, 1  ;;  %v3106_v29 = vsel %vm1567_vm10, %v3074_v41, %v6396_v11 }
 0x487   :  { %v3009_v40 = vsel %vm1468_vm7, %v2977_v2, %v8310_v7  ;;  %v9604_v7 = vrot.slane %v8386_v47, 2  ;;  %v2109_v10 = vsel %vm521_vm0, 0.0, %v2045_v51  ;;  %v9606_v51 = vrot.slane %v8484_v48, 2 }
 0x488   :  { %4832 = vmatprep.mubr.msk.f32.mxu0 %vm1654_vm11, %v3169_v27  ;;  %v8460_v58 = vpop.permute.xlu0 %2499  ;;  %2617 = vrot.lane.b32.xlu1 %v8315_v36, %s5544_s29  ;;  %v3041_v44 = vsel %vm1501_vm8, %v3009_v40, %v8358_v15  ;;  %v2044_v27 = vrot.slane %v2013_v4, 7  ;;  %v8545_v52 = vsel %vm555_vm1, %v2109_v10, 0.0 }
 0x489   :  { %v3073_v19 = vsel %vm1534_vm9, %v3041_v44, %v2760_v55  ;;  %v8557_v44 = vrot.slane %v8545_v52, 1  ;;  %v8607_v34 = vrot.slane %v8545_v52, 2 }
 0x48a   :  { %v8471_v53 = vpop.permute.xlu1 %2501  ;;  %2843 = vrot.lane.b32.xlu0 %v9788_v20, %s5531_s1  ;;  %v2108_v23 = vsel %vm521_vm0, 0.0, %v2044_v27 }
 0x48b   :  { %v8538_v9 = vsel %vm555_vm1, %v2108_v23, 0.0 }
 0x48c   :  { %v8490_v60 = vpop.permute.xlu0 %2599  ;;  %2229 = vrot.lane.b32.xlu1 %v8477_v24, %s5536_s0  ;;  %v8552_v40 = vrot.slane %v8538_v9, 1  ;;  %v8600_v0 = vrot.slane %v8538_v9, 2 }
 0x48e   :  { %v8501_v33 = vpop.permute.xlu1 %2601  ;;  %2231 = vrot.lane.b32.xlu0 %v8495_v21, %s5536_s0 }
 0x490   :  { %v2832_v63 = vpop.permute.xlu0 %2831  ;;  %2233 = vrot.lane.b32.xlu1 %v9605_v35, %s5536_s0 }
 0x491   :  { %v3105_v28 = vsel %vm1567_vm10, %v3073_v19, %v2832_v63  ;;  %v8562_v19 = vrot.slane %v8455_v50, 2 }
 0x492   :  { %v3170_v49 = vcombine.low %v3105_v28, %v3106_v29  ;;  %2323 = vrot.lane.b32.xlu0 %v9604_v7, %s5527_s15  ;;  %v8522_v15 = vpop.permute.xlu1 %2217  ;;  %v8569_v29 = vrot.slane %v8466_v30, 2  ;;  %v2012_v7 = vcombine.high %v8009_v13, %v8009_v13  ;;  %v2896_v13 = vsel %vm1351_vm4, %v7783_v37, %v8229_v56 }
 0x493   :  { %v2979_v56 = vsel %vm296_vm2, %v2947_v57, %v8390_v32  ;;  %v2898_v57 = vsel %vm1351_vm4, %v7837_v31, %v8300_v46  ;;  %v9789_v46 = vrot.slane %v8386_v47, 1 }
 0x494   :  { %4833 = vmatmul.mubr.msk.f32.gmra.mrb[6].mxu0 %vm1654_vm11, %v3170_v49  ;;  %v8525_v55 = vpop.permute.xlu0 %2219  ;;  %2619 = vrot.lane.b32.xlu1 %v8323_v25, %s5544_s29  ;;  %v2042_v8 = vrot.slane %v2012_v7, 7 }
 0x496   :  { %2621 = vrot.lane.b32.xlu0 %v9603_v6, %s5544_s29  ;;  %v8534_v20 = vpop.permute.xlu1 %2311 }
 0x498   :  { %v8540_v4 = vpop.permute.xlu0 %2603  ;;  %2701 = vrot.lane.b32.xlu1 %v8238_v54, %s5545_s9  ;;  %v2920_v54 = vsel %vm1377_vm5, %v2896_v13, %v8306_v62  ;;  %v3011_v62 = vsel %vm1468_vm7, %v2979_v56, %v8490_v60 }
 0x49a   :  { %2703 = vrot.lane.b32.xlu0 %v8248_v61, %s5545_s9  ;;  %v8549_v2 = vpop.permute.xlu1 %2605 }
 0x49c   :  { %v2690_v41 = vpop.permute.xlu0 %2689  ;;  %2235 = vrot.lane.b32.xlu1 %v8552_v40, %s5536_s0 }
 0x49e   :  { %2237 = vrot.lane.b32.xlu0 %v8557_v44, %s5536_s0  ;;  %v2692_v27 = vpop.permute.xlu1 %2691 }
 0x4a0   :  { %v8564_v63 = vpop.permute.xlu0 %2313  ;;  %2325 = vrot.lane.b32.xlu1 %v8562_v19, %s5527_s15 }
 0x4a2   :  { %2327 = vrot.lane.b32.xlu0 %v8569_v29, %s5527_s15  ;;  %v8573_v28 = vpop.permute.xlu1 %2315 }
 0x4a4   :  { %v8576_v49 = vpop.permute.xlu0 %2399  ;;  %2329 = vrot.lane.b32.xlu1 %v9606_v51, %s5527_s15 }
 0x4a6   :  { %2415 = vrot.lane.b32.xlu0 %v8386_v47, %s5542_s6  ;;  %v8583_v23 = vpop.permute.xlu1 %2401 }
 0x4a8   :  { %v8585_v10 = vpop.permute.xlu0 %2693  ;;  %2417 = vrot.lane.b32.xlu1 %v8455_v50, %s5542_s6 }
 0x4aa   :  { %2705 = vrot.lane.b32.xlu0 %v8363_v39, %s5545_s9  ;;  %v2762_v6 = vpop.permute.xlu1 %2761 }
 0x4ac   :  { %v2764_v35 = vpop.permute.xlu0 %2763  ;;  %2773 = vrot.lane.b32.xlu1 %v8259_v3, %s5546_s8 }
 0x4ae   :  { %2775 = vrot.lane.b32.xlu0 %v8272_v42, %s5546_s8  ;;  %v8597_v51 = vpop.permute.xlu1 %2403  ;;  %v2106_v42 = vsel %vm521_vm0, 0.0, %v2042_v8  ;;  %v2948_v8 = vsel %vm1403_vm6, %v2920_v54, %v8353_v1  ;;  %v3043_v54 = vsel %vm1501_vm8, %v3011_v62, %v2690_v41 }
 0x4af   :  { %v8624_v61 = vsel %vm555_vm1, %v2106_v42, 0.0  ;;  %v2980_v13 = vsel %vm296_vm2, %v2948_v8, %v8397_v16  ;;  %v3075_v32 = vsel %vm1534_vm9, %v3043_v54, %v2762_v6 }
 0x4b0   :  { %v8602_v17 = vpop.permute.xlu0 %2405  ;;  %2331 = vrot.lane.b32.xlu1 %v8600_v0, %s5527_s15  ;;  %v3012_v42 = vsel %vm1468_vm7, %v2980_v13, %v8501_v33  ;;  %v2922_v33 = vsel %vm1377_vm5, %v2898_v57, %v8343_v45  ;;  %v2897_v13 = vsel %vm1351_vm4, %v7830_v59, %v8295_v26 }
 0x4b1   :  { %v3044_v1 = vsel %vm1501_vm8, %v3012_v42, %v2692_v27  ;;  %v2950_v27 = vsel %vm1403_vm6, %v2922_v33, %v8378_v43  ;;  %v9790_v42 = vrot.slane %v8363_v39, 1 }
 0x4b2   :  { %2333 = vrot.lane.b32.xlu0 %v8607_v34, %s5527_s15  ;;  %v8611_v3 = vpop.permute.xlu1 %2503  ;;  %v3076_v16 = vsel %vm1534_vm9, %v3044_v1, %v2764_v35  ;;  %v2014_v35 = vcombine.high %v8113_v38, %v8113_v38  ;;  %v2982_v45 = vsel %vm296_vm2, %v2950_v27, %v8471_v53  ;;  %v9792_v1 = vld [vmem:[#allocation62_spill] sm:$0xff] }
 0x4b3   :  { %v3014_v6 = vsel %vm1468_vm7, %v2982_v45, %v8549_v2 }
 0x4b4   :  { %v8617_v7 = vpop.permute.xlu0 %2505  ;;  %2419 = vrot.lane.b32.xlu1 %v8466_v30, %s5542_s6  ;;  %v2046_v53 = vrot.slane %v2014_v35, 7  ;;  %v3046_v54 = vsel %vm1501_vm8, %v3014_v6, %v6259_v14  ;;  %v9793_v35 = vrot.slane %v8484_v48, 1 }
 0x4b6   :  { %2421 = vrot.lane.b32.xlu0 %v8624_v61, %s5542_s6  ;;  %v2766_v37 = vpop.permute.xlu1 %2765  ;;  %v2110_v33 = vsel %vm521_vm0, 0.0, %v2046_v53  ;;  %vm4008_vm0 = vcmask 257024  }
 0x4b8   :  { %v2834_v12 = vpop.permute.xlu0 %2833  ;;  %2423 = vrot.lane.b32.xlu1 %v8484_v48, %s5542_s6 }
 0x4b9   :  { %v3107_v8 = vsel %vm1567_vm10, %v3075_v32, %v2834_v12  ;;  %v9791_v12 = vld [vmem:[#allocation67_spill] sm:$0xff] }
 0x4ba   :  { %2425 = vrot.lane.b32.xlu0 %v8538_v9, %s5542_s6  ;;  %v2836_v60 = vpop.permute.xlu1 %2835  ;;  %v2921_v2 = vsel %vm1377_vm5, %v2897_v13, %v9791_v12  ;;  %v9794_v13 = vrot.slane %v8386_v47, 2  ;;  %v9795_v12 = vrot.slane %v8363_v39, 2  ;;  %v9615_v39 = vrot.slane %v8624_v61, 2 }
 0x4bb   :  { %v3108_v41 = vsel %vm1567_vm10, %v3076_v16, %v2836_v60  ;;  %v2949_v57 = vsel %vm1403_vm6, %v2921_v2, %v9792_v1  ;;  %v3078_v60 = vsel %vm1534_vm9, %v3046_v54, %v6320_v5 }
 0x4bc   :  { %v3171_v56 = vcombine.low %v3107_v8, %v3108_v41  ;;  %v8658_v31 = vpop.permute.xlu0 %2221  ;;  %2519 = vrot.lane.b32.xlu1 %v9789_v46, %s5543_s27  ;;  %v2981_v26 = vsel %vm296_vm2, %v2949_v57, %v8460_v58 }
 0x4bd   :  { %v3013_v32 = vsel %vm1468_vm7, %v2981_v26, %v8540_v4  ;;  %v3110_v4 = vsel %vm1567_vm10, %v3078_v60, %v6396_v11 }
 0x4be   :  { %2521 = vrot.lane.b32.xlu0 %v8477_v24, %s5543_s27  ;;  %4835 = vmatprep.mubr.msk.f32.mxu0 %vm1654_vm11, %v3171_v56  ;;  %v8672_v43 = vpop.permute.xlu1 %2507 }
 0x4c0   :  { %v8677_v62 = vpop.permute.xlu0 %2509  ;;  %2777 = vrot.lane.b32.xlu1 %v9790_v42, %s5546_s8 }
 0x4c2   :  { %2845 = vrot.lane.b32.xlu0 %v8315_v36, %s5531_s1  ;;  %v8690_v59 = vpop.permute.xlu1 %2607  ;;  %v3045_v36 = vsel %vm1501_vm8, %v3013_v32, %v8585_v10 }
 0x4c3   :  { %v3077_v8 = vsel %vm1534_vm9, %v3045_v36, %v2766_v37  ;;  %v2469_v37 = vrot.slane %v8624_v61, 1 }
 0x4c4   :  { %v8696_v16 = vpop.permute.xlu0 %2609  ;;  %2847 = vrot.lane.b32.xlu1 %v8323_v25, %s5531_s1  ;;  %v8712_v25 = vsel %vm555_vm1, %v2110_v33, 0.0  ;;  %v9796_v33 = vrot.slane %v8484_v48, 2 }
 0x4c5   :  { %v9616_v1 = vrot.slane %v8712_v25, 1 }
 0x4c6   :  { %2427 = vrot.lane.b32.xlu0 %v8545_v52, %s5542_s6  ;;  %v2838_v58 = vpop.permute.xlu1 %2837 }
 0x4c7   :  { %v3109_v41 = vsel %vm1567_vm10, %v3077_v8, %v2838_v58 }
 0x4c8   :  { %v3172_v27 = vcombine.low %v3109_v41, %v3110_v4  ;;  %v8714_v56 = vpop.permute.xlu0 %2223  ;;  %2429 = vrot.lane.b32.xlu1 %v8712_v25, %s5542_s6  ;;  %v9617_v41 = vrot.slane %v8712_v25, 2 }
 0x4ca   :  { %2523 = vrot.lane.b32.xlu0 %v8495_v21, %s5543_s27  ;;  %4836 = vmatmul.mubr.msk.f32.gmra.mrb[8].mxu0 %vm1654_vm11, %v3172_v27  ;;  %v8721_v10 = vpop.permute.xlu1 %2225  ;;  %v9797_v27 = vld [vmem:[#allocation76_spill] sm:$0xff] }
 0x4cc   :  { %v8724_v46 = vpop.permute.xlu0 %2317  ;;  %2525 = vrot.lane.b32.xlu1 %v2469_v37, %s5543_s27 }
 0x4ce   :  { %2527 = vrot.lane.b32.xlu0 %v9793_v35, %s5543_s27  ;;  %v8732_v45 = vpop.permute.xlu1 %2611  ;;  %v2899_v35 = vsel %vm1351_vm4, %v9797_v27, %v8446_v18 }
 0x4d0   :  { %v2614_v6 = vpop.permute.xlu0 %2613  ;;  %2529 = vrot.lane.b32.xlu1 %v8552_v40, %s5543_s27 }
 0x4d2   :  { %2623 = vrot.lane.b32.xlu0 %v9794_v13, %s5544_s29  ;;  %v2696_v42 = vpop.permute.xlu1 %2695 }
 0x4d4   :  { %v2698_v53 = vpop.permute.xlu0 %2697  ;;  %2625 = vrot.lane.b32.xlu1 %v8562_v19, %s5544_s29 }
 0x4d6   :  { %2849 = vrot.lane.b32.xlu0 %v9795_v12, %s5531_s1  ;;  %v8744_v2 = vpop.permute.xlu1 %2319  ;;  %v2923_v12 = vsel %vm1377_vm5, %v2899_v35, %v8534_v20 }
 0x4d8   :  { %v8746_v54 = vpop.permute.xlu0 %2321  ;;  %2531 = vrot.lane.b32.xlu1 %v8557_v44, %s5543_s27 }
 0x4da   :  { %2533 = vrot.lane.b32.xlu0 %v9616_v1, %s5543_s27  ;;  %v8754_v57 = vpop.permute.xlu1 %2407 }
 0x4dc   :  { %v8756_v26 = vpop.permute.xlu0 %2409  ;;  %2627 = vrot.lane.b32.xlu1 %v8569_v29, %s5544_s29 }
 0x4de   :  { %2629 = vrot.lane.b32.xlu0 %v9615_v39, %s5544_s29  ;;  %v2700_v32 = vpop.permute.xlu1 %2699  ;;  %v2952_v39 = vsel %vm1403_vm6, %v2923_v12, %v8583_v23 }
 0x4df   :  { %v2984_v27 = vsel %vm296_vm2, %v2952_v39, %v8617_v7 }
 0x4e0   :  { %v2768_v60 = vpop.permute.xlu0 %2767  ;;  %2631 = vrot.lane.b32.xlu1 %v9796_v33, %s5544_s29  ;;  %v2951_v33 = vsel %vm1403_vm6, %v6288_v22, %v8576_v49  ;;  %v3016_v35 = vsel %vm1468_vm7, %v2984_v27, %v8696_v16 }
 0x4e1   :  { %v2983_v18 = vsel %vm296_vm2, %v2951_v33, %v8611_v3  ;;  %v3048_v12 = vsel %vm1501_vm8, %v3016_v35, %v2698_v53 }
 0x4e2   :  { %2633 = vrot.lane.b32.xlu0 %v8600_v0, %s5544_s29  ;;  %v2770_v36 = vpop.permute.xlu1 %2769  ;;  %v3015_v20 = vsel %vm1468_vm7, %v2983_v18, %v8690_v59 }
 0x4e3   :  { %v3047_v23 = vsel %vm1501_vm8, %v3015_v20, %v2696_v42  ;;  %v3080_v39 = vsel %vm1534_vm9, %v3048_v12, %v2770_v36 }
 0x4e4   :  { %v8769_v8 = vpop.permute.xlu0 %2411  ;;  %2707 = vrot.lane.b32.xlu1 %v8455_v50, %s5545_s9  ;;  %v3079_v7 = vsel %vm1534_vm9, %v3047_v23, %v2768_v60 }
 0x4e6   :  { %2709 = vrot.lane.b32.xlu0 %v8466_v30, %s5545_s9  ;;  %v8775_v58 = vpop.permute.xlu1 %2413 }
 0x4e8   :  { %v8777_v4 = vpop.permute.xlu0 %2511  ;;  %2635 = vrot.lane.b32.xlu1 %v8607_v34, %s5544_s29 }
 0x4ea   :  { %2637 = vrot.lane.b32.xlu0 %v9617_v41, %s5544_s29  ;;  %v8788_v13 = vpop.permute.xlu1 %2513  ;;  %v9798_v41 = vld [vmem:[#allocation77_spill] sm:$0xff] }
 0x4eb   :  { %v2901_v3 = vsel %vm1351_vm4, %v9798_v41, %v8525_v55 }
 0x4ec   :  { %v2772_v1 = vpop.permute.xlu0 %2771  ;;  %2711 = vrot.lane.b32.xlu1 %v8624_v61, %s5545_s9  ;;  %v2925_v16 = vsel %vm1377_vm5, %v2901_v3, %v8573_v28 }
 0x4ed   :  { %v2954_v53 = vsel %vm1403_vm6, %v2925_v16, %v8602_v17  ;;  %v9799_v17 = vld [vmem:[#allocation72_spill] sm:$0xff] }
 0x4ee   :  { %2713 = vrot.lane.b32.xlu0 %v8538_v9, %s5545_s9  ;;  %v2840_v49 = vpop.permute.xlu1 %2839  ;;  %v2986_v60 = vsel %vm296_vm2, %v2954_v53, %v8677_v62  ;;  %v2900_v28 = vsel %vm1351_vm4, %v9799_v17, %v8522_v15  ;;  %v9802_v53 = vrot.slane %v8712_v25, 2 }
 0x4ef   :  { %v3111_v33 = vsel %vm1567_vm10, %v3079_v7, %v2840_v49  ;;  %v3018_v36 = vsel %vm1468_vm7, %v2986_v60, %v2614_v6  ;;  %v2924_v62 = vsel %vm1377_vm5, %v2900_v28, %v8564_v63  ;;  %v8885_v7 = vld [vmem:[#allocation18 + $0x1] ss:$0 sm:$0xff] }
 0x4f0   :  { %v2842_v59 = vpop.permute.xlu0 %2841  ;;  %2715 = vrot.lane.b32.xlu1 %v8545_v52, %s5545_s9  ;;  %v3050_v6 = vsel %vm1501_vm8, %v3018_v36, %v6259_v14 }
 0x4f1   :  { %v3112_v42 = vsel %vm1567_vm10, %v3080_v39, %v2842_v59 }
 0x4f2   :  { %v3173_v18 = vcombine.low %v3111_v33, %v3112_v42  ;;  %2779 = vrot.lane.b32.xlu0 %v8477_v24, %s5546_s8  ;;  %v8826_v55 = vpop.permute.xlu1 %2227 }
 0x4f4   :  { %v8831_v41 = vpop.permute.xlu0 %2515  ;;  %2781 = vrot.lane.b32.xlu1 %v8495_v21, %s5546_s8  ;;  %4838 = vmatprep.mubr.msk.f32.mxu0 %vm1654_vm11, %v3173_v18  ;;  %v2953_v21 = vsel %vm1403_vm6, %v2924_v62, %v8597_v51  ;;  %v3082_v51 = vsel %vm1534_vm9, %v3050_v6, %v6320_v5 }
 0x4f5   :  { %v2985_v15 = vsel %vm296_vm2, %v2953_v21, %v8672_v43 }
 0x4f6   :  { %2717 = vrot.lane.b32.xlu0 %v8712_v25, %s5545_s9  ;;  %v8841_v24 = vpop.permute.xlu1 %2517  ;;  %v3017_v20 = vsel %vm1468_vm7, %v2985_v15, %v8732_v45 }
 0x4f7   :  { %v3049_v35 = vsel %vm1501_vm8, %v3017_v20, %v2700_v32 }
 0x4f8   :  { %v8849_v27 = vpop.permute.xlu0 %2615  ;;  %2783 = vrot.lane.b32.xlu1 %v2469_v37, %s5546_s8  ;;  %v3081_v23 = vsel %vm1534_vm9, %v3049_v35, %v2772_v1 }
 0x4fa   :  { %2785 = vrot.lane.b32.xlu0 %v8552_v40, %s5546_s8  ;;  %v8860_v63 = vpop.permute.xlu1 %2617  ;;  %v3114_v40 = vsel %vm1567_vm10, %v3082_v51, %v6396_v11 }
 0x4fb   :  { %v4828_v49 = vpop.f32.mrb[2].mxu0 }
 0x4fc   :  { %v2844_v37 = vpop.permute.xlu0 %2843  ;;  %2787 = vrot.lane.b32.xlu1 %v8557_v44, %s5546_s8  ;;  %v3279_v43 = vpop.f32.mrb[3].mxu0  ;;  %v9800_v44 = vrot.slane %v8712_v25, 1  ;;  %v3285_v16 = vadd.f32 %v4828_v49, %v8885_v7 }
 0x4fd   :  { %v3113_v45 = vsel %vm1567_vm10, %v3081_v23, %v2844_v37  ;;  %v3280_v59 = vadd.f32 %v8885_v7, %v3279_v43 }
 0x4fe   :  { %v3174_v12 = vcombine.low %v3113_v45, %v3114_v40  ;;  %2851 = vrot.lane.b32.xlu0 %v8562_v19, %s5531_s1  ;;  %v8873_v3 = vpop.permute.xlu1 %2229  ;;  %v9801_v19 = vrot.slane %v8624_v61, 2  ;;  %v3359_v18 = vmul.f32 0.999995, %v3285_v16  ;;  %v9804_v45 = vld [vmem:[#allocation80_spill] sm:$0xff] }
 0x4ff   :  { %v3358_v42 = vmul.f32 0.999995, %v3280_v59  ;;  %v2902_v40 = vsel %vm1351_vm4, %v9804_v45, %v8658_v31  ;;  %v2955_v59 = vsel %vm1403_vm6, %v6288_v22, %v8754_v57 }
 0x500   :  { %v8875_v32 = vpop.permute.xlu0 %2231  ;;  %2853 = vrot.lane.b32.xlu1 %v8569_v29, %s5531_s1  ;;  %4839 = vmatmul.mubr.msk.f32.gmra.mrb[10].mxu0 %vm1654_vm11, %v3174_v12  ;;  %v2987_v31 = vsel %vm296_vm2, %v2955_v59, %v8777_v4 }
 0x502   :  { %2789 = vrot.lane.b32.xlu0 %v9800_v44, %s5546_s8  ;;  %v8883_v1 = vpop.permute.xlu1 %2233  ;;  %v2926_v44 = vsel %vm1377_vm5, %v2902_v40, %v8724_v46  ;;  %v3019_v40 = vsel %vm1468_vm7, %v2987_v31, %v8849_v27 }
 0x503   :  { %v2956_v16 = vsel %vm1403_vm6, %v2926_v44, %v8756_v26 }
 0x504   :  { %v8887_v39 = vpop.permute.xlu0 %2323  ;;  %2855 = vrot.lane.b32.xlu1 %v9801_v19, %s5531_s1  ;;  %v2988_v45 = vsel %vm296_vm2, %v2956_v16, %v8788_v13 }
 0x505   :  { %v3020_v57 = vsel %vm1468_vm7, %v2988_v45, %v8860_v63 }
 0x506   :  { %2857 = vrot.lane.b32.xlu0 %v8600_v0, %s5531_s1  ;;  %v8895_v29 = vpop.permute.xlu1 %2619 }
 0x508   :  { %v8898_v33 = vpop.permute.xlu0 %2621  ;;  %2859 = vrot.lane.b32.xlu1 %v8607_v34, %s5531_s1 }
 0x50a   :  { %2861 = vrot.lane.b32.xlu0 %v9802_v53, %s5531_s1  ;;  %v2702_v61 = vpop.permute.xlu1 %2701 }
 0x50b   :  { %v3051_v44 = vsel %vm1501_vm8, %v3019_v40, %v2702_v61  ;;  %v9806_v40 = vld [vmem:[#allocation63_spill] sm:$0xff] }
 0x50c   :  { %v2704_v60 = vpop.permute.xlu0 %2703  ;;  %3390 = vrot.lane.b32.xlu1 %v3358_v42, %s5527_s15 }
 0x50e   :  { %v8906_v0 = vpop.permute.xlu1 %2235  ;;  %3392 = vrot.lane.b32.xlu0 %v3359_v18, %s5527_s15 }
 0x510   :  { %v8909_v36 = vpop.permute.xlu0 %2237 }
 0x512   :  { %v8911_v17 = vpop.permute.xlu1 %2325 }
 0x514   :  { %v8913_v28 = vpop.permute.xlu0 %2327 }
 0x516   :  { %v8915_v34 = vpop.permute.xlu1 %2329 }
 0x518   :  { %v8917_v62 = vpop.permute.xlu0 %2415 }
 0x51a   :  { %v8919_v25 = vpop.permute.xlu1 %2417 }
 0x51c   :  { %v2706_v6 = vpop.permute.xlu0 %2705 }
 0x51e   :  { %v2774_v21 = vpop.permute.xlu1 %2773 }
 0x51f   :  { %v3083_v4 = vsel %vm1534_vm9, %v3051_v44, %v2774_v21 }
 0x520   :  { %v2776_v15 = vpop.permute.xlu0 %2775 }
 0x522   :  { %v8921_v20 = vpop.permute.xlu1 %2331 }
 0x524   :  { %v8923_v51 = vpop.permute.xlu0 %2333 }
 0x526   :  { %v8925_v35 = vpop.permute.xlu1 %2419 }
 0x528   :  { %v8927_v49 = vpop.permute.xlu0 %2421 }
 0x52a   :  { %v8929_v23 = vpop.permute.xlu1 %2423 }
 0x52c   :  { %v8931_v37 = vpop.permute.xlu0 %2425 }
 0x52d   :  { %9803 = vst [vmem:[#allocation66_spill] sm:$0xff] %v8931_v37 }
 0x52e   :  { %v8933_v43 = vpop.permute.xlu1 %2519 }
 0x530   :  { %v8938_v12 = vpop.permute.xlu0 %2521 }
 0x531   :  { %v4831_v19 = vpop.f32.mrb[4].mxu0 }
 0x532   :  { %v3295_v42 = vadd.f32 %v4831_v19, %v8885_v7  ;;  %v2778_v53 = vpop.permute.xlu1 %2777  ;;  %v3289_v18 = vpop.f32.mrb[5].mxu0  ;;  %v3052_v19 = vsel %vm1501_vm8, %v3020_v57, %v2704_v60  ;;  %v9805_v60 = vld [vmem:[#allocation51_spill] sm:$0xff] }
 0x533   :  { %v3290_v46 = vadd.f32 %v8885_v7, %v3289_v18  ;;  %v3084_v59 = vsel %vm1534_vm9, %v3052_v19, %v2776_v15  ;;  %v2904_v21 = vsel %vm1351_vm4, %v9805_v60, %v8721_v10  ;;  %v2903_v10 = vsel %vm1351_vm4, %v9806_v40, %v8714_v56 }
 0x534   :  { %v3361_v38 = vmul.f32 0.999995, %v3295_v42  ;;  %v2846_v26 = vpop.permute.xlu0 %2845 }
 0x535   :  { %v3360_v37 = vmul.f32 0.999995, %v3290_v46  ;;  %v3115_v16 = vsel %vm1567_vm10, %v3083_v4, %v2846_v26 }
 0x536   :  { %v2848_v13 = vpop.permute.xlu1 %2847  ;;  %3396 = vrot.lane.b32.xlu0 %v3361_v38, %s5527_s15  ;;  %v2928_v38 = vsel %vm1377_vm5, %v2904_v21, %v8746_v54  ;;  %v2927_v54 = vsel %vm1377_vm5, %v2903_v10, %v8744_v2 }
 0x537   :  { %v3116_v27 = vsel %vm1567_vm10, %v3084_v59, %v2848_v13  ;;  %3394 = vrot.lane.b32.xlu1 %v3360_v37, %s5527_s15  ;;  %v2958_v18 = vsel %vm1403_vm6, %v2928_v38, %v8775_v58 }
 0x538   :  { %v3175_v63 = vcombine.low %v3115_v16, %v3116_v27  ;;  %v8965_v42 = vpop.permute.xlu0 %2427  ;;  %v2990_v31 = vsel %vm296_vm2, %v2958_v18, %v8841_v24  ;;  %v2957_v24 = vsel %vm1403_vm6, %v2927_v54, %v8769_v8 }
 0x539   :  { %v3022_v45 = vsel %vm1468_vm7, %v2990_v31, %v8898_v33  ;;  %v2989_v33 = vsel %vm296_vm2, %v2957_v24, %v8831_v41 }
 0x53a   :  { %4841 = vmatprep.mubr.msk.f32.mxu0 %vm1654_vm11, %v3175_v63  ;;  %v8968_v61 = vpop.permute.xlu1 %2429  ;;  %v3054_v58 = vsel %vm1501_vm8, %v3022_v45, %v6259_v14  ;;  %v3021_v44 = vsel %vm1468_vm7, %v2989_v33, %v8895_v29 }
 0x53b   :  { %v3086_v56 = vsel %vm1534_vm9, %v3054_v58, %v6320_v5  ;;  %v3053_v4 = vsel %vm1501_vm8, %v3021_v44, %v2706_v6  ;;  %v2907_v44 = vsel %vm1351_vm4, %v8466_v30, %v8875_v32  ;;  %v2959_v30 = vsel %vm1403_vm6, %v6288_v22, %v8917_v62 }
 0x53c   :  { %v8973_v15 = vpop.permute.xlu0 %2523  ;;  %v3085_v2 = vsel %vm1534_vm9, %v3053_v4, %v2778_v53  ;;  %v3118_v8 = vsel %vm1567_vm10, %v3086_v56, %v6396_v11  ;;  %v2931_v4 = vsel %vm1377_vm5, %v2907_v44, %v8913_v28 }
 0x53e   :  { %v2526_v37 = vpop.permute.xlu1 %2525 }
 0x540   :  { %v8983_v46 = vpop.permute.xlu0 %2527 }
 0x542   :  { %v8988_v57 = vpop.permute.xlu1 %2529 }
 0x544   :  { %v2624_v26 = vpop.permute.xlu0 %2623 }
 0x546   :  { %v2626_v19 = vpop.permute.xlu1 %2625 }
 0x548   :  { %v2850_v59 = vpop.permute.xlu0 %2849 }
 0x549   :  { %v3117_v13 = vsel %vm1567_vm10, %v3085_v2, %v2850_v59  ;;  %v2905_v2 = vsel %vm1351_vm4, %v8386_v47, %v8826_v55  ;;  %v2962_v59 = vsel %vm1403_vm6, %v2931_v4, %v8927_v49  ;;  %v2906_v47 = vsel %vm1351_vm4, %v8455_v50, %v8873_v3 }
 0x54a   :  { %v3176_v16 = vcombine.low %v3117_v13, %v3118_v8  ;;  %v9007_v27 = vpop.permute.xlu1 %2531  ;;  %v2929_v8 = vsel %vm1377_vm5, %v2905_v2, %v8887_v39  ;;  %v2908_v55 = vsel %vm1351_vm4, %v8484_v48, %v8883_v1  ;;  %v2991_v39 = vsel %vm296_vm2, %v2959_v30, %v8933_v43 }
 0x54b   :  { %v2960_v32 = vsel %vm1403_vm6, %v2929_v8, %v8919_v25  ;;  %v2910_v25 = vsel %vm1351_vm4, %v8545_v52, %v8909_v36  ;;  %v2930_v49 = vsel %vm1377_vm5, %v2906_v47, %v8911_v17 }
 0x54c   :  { %v2534_v41 = vpop.permute.xlu0 %2533  ;;  %4842 = vmatmul.mubr.msk.f32.gmra.mrb[12].mxu0 %vm1654_vm11, %v3176_v16  ;;  %v2994_v16 = vsel %vm296_vm2, %v2962_v59, %v2526_v37  ;;  %v2992_v62 = vsel %vm296_vm2, %v2960_v32, %v8938_v12  ;;  %v3023_v37 = vsel %vm1468_vm7, %v2991_v39, %v2624_v26  ;;  %v2934_v48 = vsel %vm1377_vm5, %v2910_v25, %v8923_v51  ;;  %v9807_v59 = vld [vmem:[#allocation66_spill] sm:$0xff] }
 0x54d   :  { %v3024_v50 = vsel %vm1468_vm7, %v2992_v62, %v2626_v19  ;;  %v2961_v52 = vsel %vm1403_vm6, %v2930_v49, %v8925_v35  ;;  %v2966_v36 = vsel %vm1403_vm6, %v2934_v48, %v8968_v61  ;;  %v9808_v39 = vmov 0.0  }
 0x54e   :  { %v2628_v29 = vpop.permute.xlu1 %2627  ;;  %v2993_v51 = vsel %vm296_vm2, %v2961_v52, %v8973_v15  ;;  %v2932_v15 = vsel %vm1377_vm5, %v2908_v55, %v8915_v34 }
 0x54f   :  { %v3025_v4 = vsel %vm1468_vm7, %v2993_v51, %v2628_v29  ;;  %v2964_v8 = vsel %vm1403_vm6, %v2932_v15, %v9807_v59 }
 0x550   :  { %v2630_v63 = vpop.permute.xlu0 %2629  ;;  %v2996_v34 = vsel %vm296_vm2, %v2964_v8, %v8988_v57 }
 0x551   :  { %v3026_v28 = vsel %vm1468_vm7, %v2994_v16, %v2630_v63  ;;  %v2998_v63 = vsel %vm296_vm2, %v2966_v36, %v2534_v41  ;;  %v2963_v41 = vsel %vm1403_vm6, %v6288_v22, %v8929_v23 }
 0x552   :  { %v9010_v60 = vpop.permute.xlu1 %2631  ;;  %v3058_v1 = vsel %vm1501_vm8, %v3026_v28, %v6259_v14  ;;  %v2995_v16 = vsel %vm296_vm2, %v2963_v41, %v8983_v46 }
 0x553   :  { %v3027_v46 = vsel %vm1468_vm7, %v2995_v16, %v9010_v60 }
 0x554   :  { %v9012_v21 = vpop.permute.xlu0 %2633 }
 0x556   :  { %v2708_v6 = vpop.permute.xlu1 %2707 }
 0x557   :  { %v3055_v43 = vsel %vm1501_vm8, %v3023_v37, %v2708_v6 }
 0x558   :  { %v2710_v53 = vpop.permute.xlu0 %2709 }
 0x559   :  { %v3056_v12 = vsel %vm1501_vm8, %v3024_v50, %v2710_v53 }
 0x55a   :  { %v9014_v38 = vpop.permute.xlu1 %2635 }
 0x55c   :  { %v2638_v18 = vpop.permute.xlu0 %2637 }
 0x55d   :  { %v3030_v35 = vsel %vm1468_vm7, %v2998_v63, %v2638_v18 }
 0x55e   :  { %v2712_v31 = vpop.permute.xlu1 %2711  ;;  %v3062_v22 = vsel %vm1501_vm8, %v3030_v35, %v6259_v14 }
 0x55f   :  { %v3057_v29 = vsel %vm1501_vm8, %v3025_v4, %v2712_v31  ;;  %v3094_v55 = vsel %vm1534_vm9, %v3062_v22, %v6320_v5  ;;  %v9814_v22 = vld [vmem:[#allocation54_spill] sm:$0xff] }
 0x560   :  { %v9016_v45 = vpop.permute.xlu0 %2713  ;;  %v3126_v25 = vsel %vm1567_vm10, %v3094_v55, %v6396_v11 }
 0x561   :  { %v3059_v14 = vsel %vm1501_vm8, %v3027_v46, %v9016_v45  ;;  %v9818_v46 = vld [vmem:[#allocation48_spill] sm:$0xff] }
 0x562   :  { %v9018_v40 = vpop.permute.xlu1 %2715 }
 0x564   :  { %v2780_v10 = vpop.permute.xlu0 %2779 }
 0x565   :  { %v3087_v17 = vsel %vm1534_vm9, %v3055_v43, %v2780_v10  ;;  %v3090_v10 = vsel %vm1534_vm9, %v3058_v1, %v6320_v5 }
 0x566   :  { %v2782_v54 = vpop.permute.xlu1 %2781 }
 0x567   :  { %v9020_v58 = vpop.f32.mrb[6].mxu0  ;;  %v3088_v26 = vsel %vm1534_vm9, %v3056_v12, %v2782_v54  ;;  %v2909_v54 = vsel %vm1351_vm4, %v8538_v9, %v8906_v0 }
 0x568   :  { %v9022_v24 = vpop.permute.xlu0 %2717  ;;  %v9024_v33 = vpop.f32.mrb[7].mxu0  ;;  %v2933_v18 = vsel %vm1377_vm5, %v2909_v54, %v8921_v20  ;;  %v3122_v20 = vsel %vm1567_vm10, %v3090_v10, %v6396_v11 }
 0x569   :  { %v2965_v31 = vsel %vm1403_vm6, %v2933_v18, %v8965_v42  ;;  %vm4029_vm6 = vcmask 25600  }
 0x56a   :  { %v2784_v56 = vpop.permute.xlu1 %2783  ;;  %v2997_v57 = vsel %vm296_vm2, %v2965_v31, %v9007_v27  ;;  %v9817_v31 = vld [vmem:[#allocation79_spill] sm:$0xff] }
 0x56b   :  { %v3089_v9 = vsel %vm1534_vm9, %v3057_v29, %v2784_v56  ;;  %v3028_v56 = vsel %vm1468_vm7, %v2996_v34, %v9012_v21  ;;  %v3029_v42 = vsel %vm1468_vm7, %v2997_v57, %v9014_v38  ;;  %v9813_v34 = vld [vmem:[#allocation46_spill] sm:$0xff]  ;;  %v9822_v57 = vld [vmem:[#allocation49_spill] sm:$0xff] }
 0x56c   :  { %v2786_v13 = vpop.permute.xlu0 %2785  ;;  %v3060_v28 = vsel %vm1501_vm8, %v3028_v56, %v9018_v40  ;;  %v3061_v27 = vsel %vm1501_vm8, %v3029_v42, %v9022_v24  ;;  %v9819_v56 = vld [vmem:[#allocation47_spill] sm:$0xff] }
 0x56d   :  { %v3091_v47 = vsel %vm1534_vm9, %v3059_v14, %v2786_v13  ;;  %v9823_v14 = vld [vmem:[#allocation57_spill] sm:$0xff]  ;;  %v3789_v42 = vld [vmem:[%s9809_s5 + $0x18] sm:$0xff] }
 0x56e   :  { %v2788_v44 = vpop.permute.xlu1 %2787 }
 0x56f   :  { %v3092_v60 = vsel %vm1534_vm9, %v3060_v28, %v2788_v44  ;;  %v3788_v28 = vld [vmem:[%s9809_s5 + $0x10] sm:$0xff] }
 0x570   :  { %v2852_v3 = vpop.permute.xlu0 %2851  ;;  %v5114_v55 = vpack.i.bf16 %v3789_v42, %v3788_v28 }
 0x571   :  { %v3119_v6 = vsel %vm1567_vm10, %v3087_v17, %v2852_v3  ;;  %v3305_v17 = vadd.f32 %v9020_v58, %v8885_v7 }
 0x572   :  { %v2854_v19 = vpop.permute.xlu1 %2853 }
 0x573   :  { %v3120_v53 = vsel %vm1567_vm10, %v3088_v26, %v2854_v19  ;;  %v3300_v19 = vadd.f32 %v8885_v7, %v9024_v33  ;;  %v3363_v63 = vmul.f32 0.999995, %v3305_v17 }
 0x574   :  { %v3177_v2 = vcombine.low %v3119_v6, %v3120_v53  ;;  %v2790_v61 = vpop.permute.xlu0 %2789 }
 0x575   :  { %v3093_v38 = vsel %vm1534_vm9, %v3061_v27, %v2790_v61  ;;  %v3362_v6 = vmul.f32 0.999995, %v3300_v19  ;;  %v9825_v27 = vld [vmem:[#allocation50_spill] sm:$0xff]  ;;  %vm3958_vm9 = vcmask 58368  }
 0x576   :  { %4844 = vmatprep.mubr.msk.f32.mxu0 %vm1654_vm11, %v3177_v2  ;;  %v2856_v0 = vpop.permute.xlu1 %2855 }
 0x577   :  { %v3121_v23 = vsel %vm1567_vm10, %v3089_v9, %v2856_v0  ;;  %v9810_v9 = vld [vmem:[#allocation68_spill] sm:$0xff]  ;;  %v9811_v0 = vld [vmem:[#allocation70_spill] sm:$0xff] }
 0x578   :  { %v3178_v30 = vcombine.low %v3121_v23, %v3122_v20  ;;  %v2858_v32 = vpop.permute.xlu0 %2857  ;;  %v9815_v20 = vld [vmem:[#allocation73_spill] sm:$0xff]  ;;  %v9816_v23 = vld [vmem:[#allocation58_spill] sm:$0xff] }
 0x579   :  { %v3123_v45 = vsel %vm1567_vm10, %v3091_v47, %v2858_v32  ;;  %v9821_v32 = vld [vmem:[#allocation75_spill] sm:$0xff]  ;;  %v3786_v47 = vld [vmem:[%s9809_s5] sm:$0xff] }
 0x57a   :  { %4845 = vmatmul.mubr.msk.f32.gmra.mrb[14].mxu0 %vm1654_vm11, %v3178_v30  ;;  %v2860_v21 = vpop.permute.xlu1 %2859  ;;  %v9820_v30 = vld [vmem:[#allocation71_spill] sm:$0xff] }
 0x57b   :  { %v3124_v40 = vsel %vm1567_vm10, %v3092_v60, %v2860_v21  ;;  %4865 = vmatprep.mubr.msk.f32.mxu0 %vm5548_vm3, %v9808_v39  ;;  %v3787_v60 = vld [vmem:[%s9809_s5 + $0x8] sm:$0xff] }
 0x57c   :  { %v3179_v13 = vcombine.low %v3123_v45, %v3124_v40  ;;  %v2862_v44 = vpop.permute.xlu0 %2861  ;;  %v9824_v21 = vld [vmem:[#allocation78_spill] sm:$0xff]  ;;  %v5109_v45 = vpack.i.bf16 %v3787_v60, %v3786_v47 }
 0x57d   :  { %v3125_v62 = vsel %vm1567_vm10, %v3093_v38, %v2862_v44 }
 0x57e   :  { %v3180_v5 = vcombine.low %v3125_v62, %v3126_v25  ;;  %4847 = vmatprep.mubr.msk.f32.mxu1 %vm1654_vm11, %v3179_v13  ;;  %v3391_v38 = vpop.permute.xlu1 %3390 }
 0x580   :  { %4848 = vmatmul.mubr.msk.f32.vlgmr.msra.gmra.mrb[16].mxu1 %vm1654_vm11, %v3180_v5  ;;  %v3393_v40 = vpop.permute.xlu0 %3392  ;;  %vm4088_vm11 = vcmask 785408  }
 0x59d   :  { %v4837_v24 = vpop.f32.mrb[8].mxu0 }
 0x59e   :  { %v3309_v49 = vpop.f32.mrb[9].mxu0  ;;  %v3315_v2 = vadd.f32 %v4837_v24, %v8885_v7 }
 0x59f   :  { %v3310_v61 = vadd.f32 %v8885_v7, %v3309_v49 }
 0x5a0   :  { %v3365_v15 = vmul.f32 0.999995, %v3315_v2 }
 0x5a1   :  { %v3364_v18 = vmul.f32 0.999995, %v3310_v61 }
 0x5a8   :  { %v3397_v13 = vpop.permute.xlu0 %3396 }
 0x5a9   :  { %v3395_v44 = vpop.permute.xlu1 %3394 }
 0x5d3   :  { %v4840_v37 = vpop.f32.mrb[10].mxu0 }
 0x5d4   :  { %v3325_v50 = vadd.f32 %v4840_v37, %v8885_v7  ;;  %v3319_v3 = vpop.f32.mrb[11].mxu0 }
 0x5d5   :  { %v3320_v48 = vadd.f32 %v8885_v7, %v3319_v3 }
 0x5d6   :  { %v3367_v1 = vmul.f32 0.999995, %v3325_v50 }
 0x5d7   :  { %v3366_v43 = vmul.f32 0.999995, %v3320_v48  ;;  %v9826_v48 = vld [vmem:[#allocation64_spill] sm:$0xff] }
 0x5d8   :  { %3408 = vrot.lane.b32.xlu0 %v3367_v1, %s5527_s15  ;;  %v3439_v1 = vmul.f32 %v3393_v40, %v9826_v48  ;;  %v3441_v17 = vmul.f32 %v3397_v13, %v9826_v48  ;;  %v3440_v19 = vmul.f32 %v3395_v44, %v9826_v48 }
 0x5d9   :  { %3406 = vrot.lane.b32.xlu1 %v3366_v43, %s5527_s15  ;;  %v3438_v43 = vmul.f32 %v3391_v38, %v9826_v48 }
 0x61f   :  { %v4843_v11 = vpop.f32.mrb[12].mxu0 }
 0x620   :  { %v3335_v12 = vadd.f32 %v4843_v11, %v8885_v7  ;;  %v3329_v52 = vpop.f32.mrb[13].mxu0 }
 0x621   :  { %v3330_v36 = vadd.f32 %v8885_v7, %v3329_v52  ;;  %v9827_v52 = vld [vmem:[#allocation69_spill] sm:$0xff] }
 0x622   :  { %v3369_v26 = vmul.f32 0.999995, %v3335_v12  ;;  %v3456_v2 = vadd.f32 %v3440_v19, %v9827_v52 }
 0x623   :  { %v3368_v51 = vmul.f32 0.999995, %v3330_v36  ;;  %v3455_v36 = vadd.f32 %v3439_v1, %v9827_v52 }
 0x624   :  { %3412 = vrot.lane.b32.xlu0 %v3369_v26, %s5527_s15  ;;  %v3454_v26 = vadd.f32 %v3438_v43, %v9827_v52 }
 0x625   :  { %3410 = vrot.lane.b32.xlu1 %v3368_v51, %s5527_s15 }
 0x626   :  { %v3470_v61 = vmax.f32 %v3454_v26, 0.0 }
 0x628   :  { %3400 = vrot.lane.b32.xlu0 %v3363_v63, %s5527_s15 }
 0x629   :  { %3398 = vrot.lane.b32.xlu1 %v3362_v6, %s5527_s15  ;;  %v9828_v6 = vld [vmem:[#allocation65_spill] sm:$0xff] }
 0x64a   :  { %v3409_v62 = vpop.permute.xlu0 %3408 }
 0x64b   :  { %v3407_v25 = vpop.permute.xlu1 %3406 }
 0x64d   :  { %v4846_v53 = vpop.f32.mrb[14].mxu0 }
 0x64e   :  { %v3345_v4 = vadd.f32 %v4846_v53, %v8885_v7  ;;  %v3339_v35 = vpop.f32.mrb[15].mxu0  ;;  %v3447_v53 = vmul.f32 %v3409_v62, %v9828_v6 }
 0x64f   :  { %v3340_v58 = vadd.f32 %v8885_v7, %v3339_v35  ;;  %v3457_v35 = vadd.f32 %v3441_v17, %v9827_v52 }
 0x650   :  { %v3371_v33 = vmul.f32 0.999995, %v3345_v4  ;;  %v3446_v4 = vmul.f32 %v3407_v25, %v9828_v6 }
 0x651   :  { %v3370_v10 = vmul.f32 0.999995, %v3340_v58  ;;  %v3471_v58 = vmax.f32 %v3455_v36, 0.0 }
 0x652   :  { %3416 = vrot.lane.b32.xlu0 %v3371_v33, %s5527_s15 }
 0x653   :  { %v4849_v54 = vpop.f32.mrb[16].mxu1  ;;  %3414 = vrot.lane.b32.xlu1 %v3370_v10, %s5527_s15 }
 0x654   :  { %v3355_v41 = vadd.f32 %v4849_v54, %v8885_v7  ;;  %v3349_v29 = vpop.f32.mrb[17].mxu1 }
 0x655   :  { %v3350_v59 = vadd.f32 %v8885_v7, %v3349_v29  ;;  %v9812_v7 = vld [vmem:[#allocation45_spill] sm:$0xff] }
 0x656   :  { %3404 = vrot.lane.b32.xlu0 %v3365_v15, %s5527_s15  ;;  %v3373_v8 = vmul.f32 0.999995, %v3355_v41  ;;  %v9829_v15 = vld [vmem:[#allocation53_spill] sm:$0xff] }
 0x657   :  { %3402 = vrot.lane.b32.xlu1 %v3364_v18, %s5527_s15  ;;  %v3372_v16 = vmul.f32 0.999995, %v3350_v59  ;;  %v3463_v41 = vadd.f32 %v3447_v53, %v9829_v15  ;;  %v3462_v29 = vadd.f32 %v3446_v4, %v9829_v15 }
 0x65a   :  { %3420 = vrot.lane.b32.xlu0 %v3373_v8, %s5527_s15  ;;  %v3473_v8 = vmax.f32 %v3457_v35, 0.0 }
 0x65b   :  { %3418 = vrot.lane.b32.xlu1 %v3372_v16, %s5527_s15 }
 0x65e   :  { %3488 = vrot.lane.b32.xlu0 %v9810_v9, %s5527_s15 }
 0x65f   :  { %3486 = vrot.lane.b32.xlu1 %v9811_v0, %s5527_s15 }
 0x662   :  { %3492 = vrot.lane.b32.xlu0 %v9812_v7, %s5527_s15 }
 0x663   :  { %3490 = vrot.lane.b32.xlu1 %v9813_v34, %s5527_s15  ;;  %v3472_v34 = vmax.f32 %v3456_v2, 0.0 }
 0x666   :  { %3504 = vrot.lane.b32.xlu0 %v9814_v22, %s5527_s15 }
 0x667   :  { %3502 = vrot.lane.b32.xlu1 %v9815_v20, %s5527_s15 }
 0x66a   :  { %3508 = vrot.lane.b32.xlu0 %v9816_v23, %s5527_s15 }
 0x66b   :  { %3506 = vrot.lane.b32.xlu1 %v9817_v31, %s5527_s15  ;;  %v3479_v31 = vmax.f32 %v3463_v41, 0.0 }
 0x66e   :  { %3496 = vrot.lane.b32.xlu0 %v9818_v46, %s5527_s15  ;;  %v3478_v46 = vmax.f32 %v3462_v29, 0.0 }
 0x66f   :  { %3494 = vrot.lane.b32.xlu1 %v9819_v56, %s5527_s15 }
 0x672   :  { %3512 = vrot.lane.b32.xlu0 %v9820_v30, %s5527_s15 }
 0x673   :  { %3510 = vrot.lane.b32.xlu1 %v9821_v32, %s5527_s15 }
 0x676   :  { %3500 = vrot.lane.b32.xlu0 %v9822_v57, %s5527_s15 }
 0x677   :  { %3498 = vrot.lane.b32.xlu1 %v9823_v14, %s5527_s15 }
 0x67a   :  { %3516 = vrot.lane.b32.xlu0 %v9824_v21, %s5527_s15 }
 0x67b   :  { %3514 = vrot.lane.b32.xlu1 %v9825_v27, %s5527_s15 }
 0x67e   :  { %5115 = vrot.lane.b32.xlu0 %v5114_v55, %s5543_s27 }
 0x67f   :  { %5110 = vrot.lane.b32.xlu1 %v5109_v45, %s5543_s27 }
 0x696   :  { %v3413_v5 = vpop.permute.xlu0 %3412 }
 0x697   :  { %v3411_v24 = vpop.permute.xlu1 %3410  ;;  %v3449_v59 = vmul.f32 %v3413_v5, %v9828_v6 }
 0x698   :  { %v3448_v16 = vmul.f32 %v3411_v24, %v9828_v6 }
 0x699   :  { %v3465_v56 = vadd.f32 %v3449_v59, %v9829_v15 }
 0x69a   :  { %v3401_v49 = vpop.permute.xlu0 %3400  ;;  %v3464_v14 = vadd.f32 %v3448_v16, %v9829_v15 }
 0x69b   :  { %v3399_v37 = vpop.permute.xlu1 %3398  ;;  %v3443_v30 = vmul.f32 %v3401_v49, %v9826_v48  ;;  %v3481_v44 = vmax.f32 %v3465_v56, 0.0 }
 0x69c   :  { %v3442_v28 = vmul.f32 %v3399_v37, %v9826_v48  ;;  %v3480_v49 = vmax.f32 %v3464_v14, 0.0 }
 0x69d   :  { %v3459_v38 = vadd.f32 %v3443_v30, %v9827_v52 }
 0x69e   :  { %v3458_v62 = vadd.f32 %v3442_v28, %v9827_v52 }
 0x69f   :  { %v3475_v4 = vmax.f32 %v3459_v38, 0.0 }
 0x6c4   :  { %v3417_v50 = vpop.permute.xlu0 %3416 }
 0x6c5   :  { %v3415_v3 = vpop.permute.xlu1 %3414  ;;  %v3451_v42 = vmul.f32 %v3417_v50, %v9828_v6 }
 0x6c6   :  { %v3450_v21 = vmul.f32 %v3415_v3, %v9828_v6 }
 0x6c7   :  { %v3467_v25 = vadd.f32 %v3451_v42, %v9829_v15 }
 0x6c8   :  { %v3405_v11 = vpop.permute.xlu0 %3404  ;;  %v3466_v37 = vadd.f32 %v3450_v21, %v9829_v15 }
 0x6c9   :  { %v3403_v12 = vpop.permute.xlu1 %3402  ;;  %v3445_v36 = vmul.f32 %v3405_v11, %v9826_v48  ;;  %v3483_v41 = vmax.f32 %v3467_v25, 0.0 }
 0x6ca   :  { %v3444_v26 = vmul.f32 %v3403_v12, %v9826_v48  ;;  %v3482_v29 = vmax.f32 %v3466_v37, 0.0 }
 0x6cc   :  { %v9208_v51 = vpop.permute.xlu0 %3420  ;;  %v3460_v59 = vadd.f32 %v3444_v26, %v9827_v52 }
 0x6cd   :  { %v9210_v63 = vpop.permute.xlu1 %3418  ;;  %v3453_v11 = vmul.f32 %v9208_v51, %v9828_v6 }
 0x6cf   :  { %v3469_v51 = vadd.f32 %v3453_v11, %v9829_v15 }
 0x6d0   :  { %v3489_v33 = vpop.permute.xlu0 %3488 }
 0x6d1   :  { %v3535_v10 = vadd.f32 %v3489_v33, %v3471_v58  ;;  %v3487_v54 = vpop.permute.xlu1 %3486 }
 0x6d2   :  { %v3534_v18 = vadd.f32 %v3487_v54, %v3470_v61  ;;  %v3474_v61 = vmax.f32 %v3458_v62, 0.0 }
 0x6d3   :  { %v3552_v9 = vsel %vm3550_vm12, %v3535_v10, 0.0 }
 0x6d4   :  { %v3551_v0 = vsel %vm3550_vm12, %v3534_v18, 0.0  ;;  %v3493_v7 = vpop.permute.xlu0 %3492  ;;  %v3461_v18 = vadd.f32 %v3445_v36, %v9827_v52 }
 0x6d5   :  { %v3537_v22 = vadd.f32 %v3493_v7, %v3473_v8  ;;  %v3491_v20 = vpop.permute.xlu1 %3490  ;;  %v3553_v32 = vadd.f32 %v3552_v9, %v3551_v0  ;;  %v3452_v8 = vmul.f32 %v9210_v63, %v9828_v6 }
 0x6d6   :  { %v3536_v23 = vadd.f32 %v3491_v20, %v3472_v34  ;;  %v3477_v52 = vmax.f32 %v3461_v18, 0.0 }
 0x6d7   :  { %v3561_v57 = vsel %vm3550_vm12, %v3537_v22, 0.0  ;;  %v3554_v13 = vrot.slane %v3553_v32, 4 }
 0x6d8   :  { %v3560_v47 = vsel %vm3550_vm12, %v3536_v23, 0.0  ;;  %v3505_v60 = vpop.permute.xlu0 %3504 }
 0x6d9   :  { %v3562_v55 = vadd.f32 %v3561_v57, %v3560_v47  ;;  %v3543_v27 = vadd.f32 %v3505_v60, %v3479_v31  ;;  %v3503_v45 = vpop.permute.xlu1 %3502  ;;  %v3555_v19 = vadd.f32 %v3554_v13, %v3553_v32  ;;  %v3468_v32 = vadd.f32 %v3452_v8, %v9829_v15  ;;  %v3784_v8 = vld [vmem:[%s9830_s16 + $0x10] sm:$0xff] }
 0x6da   :  { %v3542_v40 = vadd.f32 %v3503_v45, %v3478_v46  ;;  %v3476_v57 = vmax.f32 %v3460_v59, 0.0  ;;  %v3485_v13 = vmax.f32 %v3469_v51, 0.0 }
 0x6db   :  { %v3563_v5 = vrot.slane %v3562_v55, 4  ;;  %v3588_v50 = vsel %vm3550_vm12, %v3543_v27, 0.0  ;;  %v3556_v16 = vrot.slane %v3555_v19, 2  ;;  %v3484_v25 = vmax.f32 %v3468_v32, 0.0 }
 0x6dc   :  { %v3509_v24 = vpop.permute.xlu0 %3508  ;;  %v3587_v3 = vsel %vm3550_vm12, %v3542_v40, 0.0 }
 0x6dd   :  { %v3545_v1 = vadd.f32 %v3509_v24, %v3481_v44  ;;  %v3507_v43 = vpop.permute.xlu1 %3506  ;;  %v3564_v35 = vadd.f32 %v3563_v5, %v3562_v55  ;;  %v3589_v58 = vadd.f32 %v3588_v50, %v3587_v3  ;;  %v3557_v63 = vadd.f32 %v3556_v16, %v3555_v19  ;;  %v3785_v16 = vld [vmem:[%s9830_s16 + $0x18] sm:$0xff] }
 0x6de   :  { %v3544_v17 = vadd.f32 %v3507_v43, %v3480_v49 }
 0x6df   :  { %v3597_v53 = vsel %vm3550_vm12, %v3545_v1, 0.0  ;;  %v3565_v0 = vrot.slane %v3564_v35, 2  ;;  %v3590_v7 = vrot.slane %v3589_v58, 4  ;;  %v3558_v44 = vrot.slane %v3557_v63, 1 }
 0x6e0   :  { %v3596_v2 = vsel %vm3550_vm12, %v3544_v17, 0.0  ;;  %v3497_v33 = vpop.permute.xlu0 %3496 }
 0x6e1   :  { %v3598_v10 = vadd.f32 %v3597_v53, %v3596_v2  ;;  %v3495_v54 = vpop.permute.xlu1 %3494  ;;  %v3539_v48 = vadd.f32 %v3497_v33, %v3475_v4  ;;  %v3566_v14 = vadd.f32 %v3565_v0, %v3564_v35  ;;  %v3591_v28 = vadd.f32 %v3590_v7, %v3589_v58 }
 0x6e2   :  { %v3538_v12 = vadd.f32 %v3495_v54, %v3474_v61  ;;  %v3559_v53 = vadd.f32 %v3558_v44, %v3557_v63  ;;  %v3782_v54 = vld [vmem:[%s9830_s16] sm:$0xff]  ;;  %v3672_v44 = vld [vmem:[#allocation20] sm:$0xff] }
 0x6e3   :  { %v3599_v9 = vrot.slane %v3598_v10, 4  ;;  %v3570_v34 = vsel %vm3550_vm12, %v3539_v48, 0.0  ;;  %v3567_v5 = vrot.slane %v3566_v14, 1  ;;  %v3592_v24 = vrot.slane %v3591_v28, 2 }
 0x6e4   :  { %v3569_v22 = vsel %vm3550_vm12, %v3538_v12, 0.0  ;;  %v3513_v20 = vpop.permute.xlu0 %3512  ;;  %v3783_v12 = vld [vmem:[%s9830_s16 + $0x8] sm:$0xff] }
 0x6e5   :  { %v3600_v23 = vadd.f32 %v3599_v9, %v3598_v10  ;;  %v3571_v31 = vadd.f32 %v3570_v34, %v3569_v22  ;;  %v3511_v46 = vpop.permute.xlu1 %3510  ;;  %v3547_v56 = vadd.f32 %v3513_v20, %v3483_v41  ;;  %v3568_v2 = vadd.f32 %v3567_v5, %v3566_v14 }
 0x6e6   :  { %v3546_v30 = vadd.f32 %v3511_v46, %v3482_v29  ;;  %v3593_v33 = vadd.f32 %v3592_v24, %v3591_v28 }
 0x6e7   :  { %v3572_v6 = vrot.slane %v3571_v31, 4  ;;  %v3606_v42 = vsel %vm3550_vm12, %v3547_v56, 0.0  ;;  %v3601_v21 = vrot.slane %v3600_v23, 2 }
 0x6e8   :  { %v3605_v47 = vsel %vm3550_vm12, %v3546_v30, 0.0  ;;  %v3501_v60 = vpop.permute.xlu0 %3500 }
 0x6e9   :  { %v3573_v55 = vadd.f32 %v3572_v6, %v3571_v31  ;;  %v3607_v27 = vadd.f32 %v3606_v42, %v3605_v47  ;;  %v3499_v45 = vpop.permute.xlu1 %3498  ;;  %v3541_v40 = vadd.f32 %v3501_v60, %v3477_v52  ;;  %v3602_v3 = vadd.f32 %v3601_v21, %v3600_v23 }
 0x6ea   :  { %v3540_v38 = vadd.f32 %v3499_v45, %v3476_v57  ;;  %v3594_v52 = vrot.slane %v3593_v33, 1  ;;  %v3625_v57 = vmul.f32 0.0625, %v3568_v2  ;;  %v3624_v60 = vmul.f32 0.0625, %v3559_v53  ;;  %v9832_v2 = vld [vmem:[#allocation59_spill] sm:$0xff] }
 0x6eb   :  { %v3574_v62 = vrot.slane %v3573_v55, 2  ;;  %v3608_v15 = vrot.slane %v3607_v27, 4  ;;  %v3579_v49 = vsel %vm3550_vm12, %v3541_v40, 0.0  ;;  %v3603_v29 = vrot.slane %v3602_v3, 1 }
 0x6ec   :  { %v3578_v37 = vsel %vm3550_vm12, %v3540_v38, 0.0  ;;  %v3517_v50 = vpop.permute.xlu0 %3516  ;;  %v3595_v45 = vadd.f32 %v3594_v52, %v3593_v33  ;;  %v9287_v33 = vsub.s32 1, %v9832_v2 }
 0x6ed   :  { %v3575_v1 = vadd.f32 %v3574_v62, %v3573_v55  ;;  %v3609_v43 = vadd.f32 %v3608_v15, %v3607_v27  ;;  %v3580_v36 = vadd.f32 %v3579_v49, %v3578_v37  ;;  %v3515_v17 = vpop.permute.xlu1 %3514  ;;  %v3549_v26 = vadd.f32 %v3517_v50, %v3485_v13  ;;  %v3673_v62 = vld [vmem:[#allocation20 + $0x8] sm:$0xff] }
 0x6ee   :  { %v3548_v19 = vadd.f32 %v3515_v17, %v3484_v25  ;;  %v3604_v14 = vadd.f32 %v3603_v29, %v3602_v3  ;;  %v9831_v27 = vmov 0.0|0.0   ;;  %v3643_v13 = vsel %vm3642_vm13, %v3625_v57, %v3624_v60  ;;  %v9835_v57 = vld [vmem:[#allocation60_spill] sm:$0xff] }
 0x6ef   :  { %v3576_v4 = vrot.slane %v3575_v1, 1  ;;  %v3610_v35 = vrot.slane %v3609_v43, 2  ;;  %v3581_v58 = vrot.slane %v3580_v36, 4  ;;  %v3615_v61 = vsel %vm3550_vm12, %v3549_v26, 0.0 }
 0x6f0   :  { %v3614_v10 = vsel %vm3550_vm12, %v3548_v19, 0.0  ;;  %v5116_v41 = vpop.permute.xlu0 %5115  ;;  %v3629_v15 = vmul.f32 0.0625, %v3604_v14  ;;  %v4979_v24 = vpack.c.bf16 %v3673_v62, %v3672_v44  ;;  %v3628_v50 = vmul.f32 0.0625, %v3595_v45 }
 0x6f1   :  { %v3611_v18 = vadd.f32 %v3610_v35, %v3609_v43  ;;  %v3582_v11 = vadd.f32 %v3581_v58, %v3580_v36  ;;  %v3616_v48 = vadd.f32 %v3615_v61, %v3614_v10  ;;  %v5111_v59 = vpop.permute.xlu1 %5110  ;;  %v5118_v7 = vunpack.i.h.bf16 %v5116_v41  ;;  %v9270_v43 = vld [vmem:[#allocation8] sm:$0x3]  ;;  %v3632_v36 = vld [vmem:[#allocation3] sm:$0xf] }
 0x6f2   :  { %v5113_v9 = vunpack.i.h.bf16 %v5111_v59  ;;  %v5112_v0 = vunpack.i.l.bf16 %v5111_v59  ;;  %v5117_v34 = vunpack.i.l.bf16 %v5116_v41  ;;  %v3577_v22 = vadd.f32 %v3576_v4, %v3575_v1  ;;  %4980 = vmatprep.subr.bf16.mxu1 %v4979_v24  ;;  %v3633_v4 = vld [vmem:[#allocation3 + $0x4] sm:$0xf]  ;;  %v4643_v35 = vld [vmem:[#allocation23] ss:$0 sm:$0xff] }
 0x6f3   :  { %v3612_v20 = vrot.slane %v3611_v18, 1  ;;  %v3583_v23 = vrot.slane %v3582_v11, 2  ;;  %v3617_v31 = vrot.slane %v3616_v48, 4  ;;  %v3809_v56 = vsel %vm296_vm2, %v3785_v16, %v5118_v7  ;;  %4982 = vmatpush3.bf16.msra.mxu1 %v4979_v24  ;;  %v9284_v58 = vld [vmem:[#allocation14] sm:$0x3]  ;;  %v9833_v61 = vld [vmem:[#allocation61_spill] sm:$0xff] }
 0x6f4   :  { %v3807_v46 = vsel %vm296_vm2, %v3783_v12, %v5113_v9  ;;  %v3806_v51 = vsel %vm296_vm2, %v3782_v54, %v5112_v0  ;;  %v3808_v30 = vsel %vm296_vm2, %v3784_v8, %v5117_v34  ;;  %v3626_v21 = vmul.f32 0.0625, %v3577_v22  ;;  %4989 = vmatprep.subr.bf16.mxu1 %v9831_v27  ;;  %v3668_v9 = vld [vmem:[#allocation6] sm:$0x3] }
 0x6f5   :  { %v3584_v32 = vadd.f32 %v3583_v23, %v3582_v11  ;;  %v3618_v63 = vadd.f32 %v3617_v31, %v3616_v48  ;;  %v4984_v6 = vpack.c.bf16 %v3807_v46, %v3806_v51  ;;  %v4987_v47 = vpack.c.bf16 %v3809_v56, %v3808_v30  ;;  %v3810_v51 = vld [vmem:[%s9834_s22] sm:$0x1] }
 0x6f6   :  { %v3613_v55 = vadd.f32 %v3612_v20, %v3611_v18  ;;  %v3645_v37 = vsel %vm3644_vm14, %v3626_v21, %v3643_v13  ;;  %v3648_v26 = vsel %vm3642_vm13, %v3629_v15, %v3628_v50  ;;  %v3769_v10 = vrot.slane %v9284_v58, %v9833_v61  ;;  %v3895_v15 = vld [vmem:[#allocation11] sm:$0xff] }
 0x6f7   :  { %v3585_v28 = vrot.slane %v3584_v32, 1  ;;  %v3619_v42 = vrot.slane %v3618_v63, 2  ;;  %4985 = vmatpush3.bf16.msra.mxu0 %v4984_v6  ;;  %v3776_v54 = vrot.slane %v9284_v58, %v9287_v33  ;;  %vm4015_vm1 = vcmp.gt.f32.partialorder %v9284_v58, 0.0 }
 0x6f8   :  { %4986 = vmatprep.subr.bf16.mxu0 %v9831_v27  ;;  %v3630_v49 = vmul.f32 0.0625, %v3613_v55  ;;  %v4640_v55 = vld [vmem:[#allocation21] ss:$0 sm:$0xff]  ;;  %vm4535_vm12 = vcmask 883712  }
 0x6f9   :  { %v3620_v40 = vadd.f32 %v3619_v42, %v3618_v63  ;;  %v3586_v38 = vadd.f32 %v3585_v28, %v3584_v32 }
 0x6fa   :  { %v3649_v19 = vsel %vm3644_vm14, %v3630_v49, %v3648_v26  ;;  %vm4537_vm14 = vcmask 916480  }
 0x6fb   :  { %v3621_v25 = vrot.slane %v3620_v40, 1  ;;  %v3627_v5 = vmul.f32 0.0625, %v3586_v38  ;;  %4988 = vmatpush3.bf16.msra.mxu0 %v4987_v47 }
 0x6fc   :  { %5013 = vmatprep.subr.bf16.mxu0 %v9831_v27 }
 0x6fd   :  { %v3647_v3 = vsel %vm3646_vm15, %v3627_v5, %v3645_v37  ;;  %v3622_v1 = vadd.f32 %v3621_v25, %v3620_v40  ;;  %v3897_v25 = vld [vmem:[#allocation15] sm:$0xff] }
 0x6fe   :  { %3651 = vrot.lane.b32.xlu1 %v3647_v3, %s5551_s18  ;;  %4866 = vmatmul.mubr.msk.f32.vlgmr.msra.gmra.mrb[16].mxu0 %vm296_vm2, %v9270_v43  ;;  %v9325_v50 = vadd.f32 %v3897_v25, %v3895_v15 }
 0x6ff   :  { %v3631_v17 = vmul.f32 0.0625, %v3622_v1  ;;  %4919 = vmatprep.mubr.msk.f32.mxu0 %vm5548_vm3, %v9808_v39  ;;  %v3896_v1 = vld [vmem:[#allocation11 + $0x8] sm:$0xff] }
 0x701   :  { %v3650_v53 = vsel %vm3646_vm15, %v3631_v17, %v3649_v19  ;;  %vm4539_vm15 = vcmask 924672  }
 0x702   :  { %3659 = vrot.lane.b32.xlu1 %v3632_v36, %s5536_s0  ;;  %3653 = vrot.lane.b32.xlu0 %v3650_v53, %s5551_s18 }
 0x706   :  { %3661 = vrot.lane.b32.xlu0 %v3633_v4, %s5536_s0  ;;  %3817 = vrot.lane.b32.xlu1 %v4643_v35, %s5543_s27  ;;  %v9333_v4 = vadd.f32 %v3897_v25, %v3896_v1  ;;  %v4091_v1 = vld [vmem:[%s9837_s25 + $0x8] sm:$0xff] }
 0x70a   :  { %3771 = vbcast.lane.b32.xlu0 %v3769_v10, 256  ;;  %3778 = vbcast.lane.b32.xlu1 %v3776_v54, 256 }
 0x770   :  { %v3652_v41 = vpop.permute.xlu1 %3651 }
 0x774   :  { %v3654_v29 = vpop.permute.xlu0 %3653  ;;  %v3660_v18 = vpop.permute.xlu1 %3659 }
 0x775   :  { %v3665_v11 = vsel %vm1351_vm4, %v3652_v41, %v3660_v18 }
 0x776   :  { %v4482_v59 = vrot.slane %v3665_v11, 1  ;;  %v4487_v0 = vrot.slane %v3665_v11, 2  ;;  %v4493_v22 = vrot.slane %v3665_v11, 3 }
 0x778   :  { %v3662_v48 = vpop.permute.xlu0 %3661  ;;  %v3818_v56 = vpop.permute.xlu1 %3817 }
 0x779   :  { %v3666_v12 = vsel %vm1351_vm4, %v3654_v29, %v3662_v48  ;;  %v3820_v30 = vsel %vm296_vm2, %v3810_v51, %v3818_v56  ;;  %v9836_v29 = vlaneseq }
 0x77a   :  { %v4479_v8 = vrot.slane %v3666_v12, 7  ;;  %v3671_v16 = vcombine.low %v3665_v11, %v3666_v12  ;;  %v4488_v7 = vrot.slane %v3666_v12, 1  ;;  %v9296_v34 = vsel %vm3642_vm13, %v3666_v12, %v4482_v59 }
 0x77b   :  { %v4494_v20 = vrot.slane %v3666_v12, 2  ;;  %v3824_v52 = vrot.slane %v3820_v30, %v9833_v61  ;;  %v9340_v18 = vand.u32 127, %v9836_v29 }
 0x77c   :  { %4854 = vmatprep.mubr.msk.f32.mxu1 %vm1377_vm5, %v3671_v16  ;;  %v9300_v23 = vsel %vm3642_vm13, %v4488_v7, %v4487_v0  ;;  %v9303_v31 = vsel %vm3642_vm13, %v4479_v8, %v3665_v11  ;;  %v3772_v45 = vpop.permute.xlu0 %3771  ;;  %v3779_v44 = vpop.permute.xlu1 %3778  ;;  %v3941_v7 = vld [vmem:[#allocation12] sm:$0x3] }
 0x77d   :  { %4855 = vmatmul.mubr.msk.f32.vlgmr.msra.gmra.mrb[18].mxu1 %vm1377_vm5, %v3668_v9  ;;  %v9307_v46 = vsel %vm3642_vm13, %v4494_v20, %v4493_v22  ;;  %v3949_v11 = vsub.s32 %v9340_v18, %v9832_v2  ;;  %vm3942_vm7 = vcmp.gt.f32.partialorder %v3941_v7, 0.0 }
 0x77e   :  { %4900 = vmatprep.mubr.msk.f32.mxu1 %vm5548_vm3, %v9808_v39 }
 0x7d1   :  { %v3891_v32 = vpop.f32.mrb[16].mxu0 }
 0x7d2   :  { %v3892_v63 = vadd.f32 %v3891_v32, %v3824_v52  ;;  %v4867_v6 = vpop.f32.mrb[17].mxu0 }
 0x7d4   :  { %v3907_v14 = vrot.slane %v3892_v63, %v9835_v57 }
 0x7d6   :  { %v3908_v28 = vcombine.high %v3907_v14, %v3907_v14  ;;  %v3915_v42 = vrot.slane %v3907_v14, %v9835_v57 }
 0x7d8   :  { %v3922_v47 = vrot.slane %v3908_v28, %v9835_v57  ;;  %v3926_v60 = vrot.slane %v3915_v42, %v9833_v61 }
 0x7da   :  { %4000 = vrot.lane.b32.xlu0 %v3926_v60, %s5552_s23  ;;  %v3930_v21 = vrot.slane %v3922_v47, %v9833_v61  ;;  %v3933_v53 = vmul.f32 %v3926_v60, %v9325_v50 }
 0x7dc   :  { %4002 = vrot.lane.b32.xlu1 %v3930_v21, %s5552_s23  ;;  %v3935_v10 = vsel %vm296_vm2, %v3933_v53, 0.0  ;;  %v3934_v54 = vmul.f32 %v3930_v21, %v9333_v4 }
 0x7de   :  { %v3938_v41 = vsel %vm296_vm2, %v3934_v54, 0.0 }
 0x84c   :  { %v4001_v24 = vpop.permute.xlu0 %4000 }
 0x84e   :  { %v4003_v3 = vpop.permute.xlu1 %4002 }
 0x850   :  { %v4856_v40 = vpop.f32.mrb[18].mxu1 }
 0x851   :  { %v9321_v38 = vadd.f32 %v4856_v40, %v4640_v55  ;;  %v3752_v13 = vpop.f32.mrb[19].mxu1 }
 0x852   :  { %v3753_v62 = vadd.f32 %v4640_v55, %v3752_v13 }
 0x854   :  { %v3761_v5 = vmax.f32 %v3753_v62, 0.0 }
 0x856   :  { %v9323_v49 = vmul.f32 %v3772_v45, %v3761_v5  ;;  %v3764_v37 = vcombine.high %v3761_v5, %v3761_v5 }
 0x858   :  { %v9327_v36 = vmul.f32 %v3779_v44, %v3764_v37  ;;  %v4006_v17 = vmul.f32 %v4001_v24, %v9323_v49 }
 0x85a   :  { %v4007_v26 = vmul.f32 %v4003_v3, %v9327_v36  ;;  %v4009_v19 = vsel %vm4008_vm0, %v4006_v17, 0.0  ;;  %v4090_v3 = vld [vmem:[%s9837_s25] sm:$0xff]  ;;  %v4092_v17 = vld [vmem:[%s9837_s25 + $0x10] sm:$0xff] }
 0x85b   :  { %4010 = vadd.xlane.f32.xlu0 %v4009_v19  ;;  %v4093_v19 = vld [vmem:[%s9837_s25 + $0x18] sm:$0xff] }
 0x85c   :  { %v4012_v35 = vsel %vm4008_vm0, %v4007_v26, 0.0  ;;  %v4990_v26 = vpack.c.bf16 %v4091_v1, %v4090_v3  ;;  %v4993_v53 = vpack.c.bf16 %v4093_v19, %v4092_v17 }
 0x85d   :  { %4013 = vadd.xlane.f32.xlu1 %v4012_v35  ;;  %v4094_v35 = vld [vmem:[%s9837_s25 + $0x20] sm:$0xff] }
 0x85e   :  { %4991 = vmatpush3.bf16.msra.mxu1 %v4990_v26 }
 0x85f   :  { %3936 = vadd.xlane.f32.xlu0 %v3935_v10  ;;  %4992 = vmatprep.subr.bf16.mxu1 %v9831_v27  ;;  %v4095_v10 = vld [vmem:[%s9837_s25 + $0x28] sm:$0xff] }
 0x860   :  { %v4996_v54 = vpack.c.bf16 %v4095_v10, %v4094_v35 }
 0x862   :  { %4994 = vmatpush3.bf16.msra.mxu1 %v4993_v53 }
 0x863   :  { %3939 = vadd.xlane.f32.xlu0 %v3938_v41  ;;  %4995 = vmatprep.subr.bf16.mxu1 %v9831_v27  ;;  %v4097_v41 = vld [vmem:[%s9837_s25 + $0x38] sm:$0xff] }
 0x866   :  { %4997 = vmatpush3.bf16.msra.mxu1 %v4996_v54 }
 0x867   :  { %4998 = vmatprep.subr.bf16.mxu1 %v9831_v27 }
 0x8e8   :  { %v4011_v48 = vpop.xlane.xlu0 %4010 }
 0x8e9   :  { %v4021_v59 = vrot.slane %v4011_v48, %v3949_v11  ;;  %v4099_v48 = vld [vmem:[%s9837_s25 + $0x48] sm:$0xff] }
 0x8ea   :  { %v4014_v12 = vpop.xlane.xlu1 %4013 }
 0x8eb   :  { %v4025_v8 = vrot.slane %v4014_v12, %v3949_v11 }
 0x8ec   :  { %v3937_v16 = vpop.xlane.xlu0 %3936 }
 0x8ed   :  { %v4026_v9 = vsel %vm3642_vm13, %v4025_v8, %v4021_v59  ;;  %v3950_v51 = vrot.slane %v3937_v16, %v3949_v11 }
 0x8ee   :  { %v4028_v0 = vsel %vm4015_vm1, %v4026_v9, -1e+30 }
 0x8ef   :  { %v4030_v22 = vsel %vm4029_vm6, %v4028_v0, -inf }
 0x8f0   :  { %4031 = vmax.xlane.f32.xlu1 %v4030_v22  ;;  %v3940_v20 = vpop.xlane.xlu0 %3939 }
 0x8f1   :  { %v3954_v56 = vrot.slane %v3940_v20, %v3949_v11  ;;  %v4098_v11 = vld [vmem:[%s9837_s25 + $0x40] sm:$0xff] }
 0x8f2   :  { %v5002_v12 = vpack.c.bf16 %v4099_v48, %v4098_v11 }
 0x8f3   :  { %v3955_v30 = vsel %vm3642_vm13, %v3954_v56, %v3950_v51  ;;  %v4100_v51 = vld [vmem:[%s9837_s25 + $0x50] sm:$0xff]  ;;  %v4101_v56 = vld [vmem:[%s9837_s25 + $0x58] sm:$0xff] }
 0x8f4   :  { %v3957_v52 = vsel %vm3942_vm7, %v3955_v30, -1e+30  ;;  %v4102_v30 = vld [vmem:[%s9838_s13] sm:$0xff] }
 0x8f5   :  { %v3959_v32 = vsel %vm3958_vm9, %v3957_v52, -inf }
 0x8f6   :  { %3960 = vmax.xlane.f32.xlu0 %v3959_v32  ;;  %v4103_v32 = vld [vmem:[%s9838_s13 + $0x8] sm:$0xff] }
 0x97d   :  { %v4032_v58 = vpop.xlane.xlu1 %4031 }
 0x97e   :  { %v4033_v63 = vsub.f32 %v4028_v0, %v4032_v58 }
 0x980   :  { %v4034_v6 = vmul.f32 1.442695, %v4033_v63 }
 0x982   :  { %5135 = vpow2.f32 %v4034_v6 }
 0x983   :  { %v3961_v14 = vpop.xlane.xlu0 %3960 }
 0x984   :  { %v3962_v28 = vsub.f32 %v3957_v52, %v3961_v14  ;;  %v5005_v52 = vpack.c.bf16 %v4101_v56, %v4100_v51  ;;  %v4646_v56 = vld [vmem:[%s9840_s3] ss:$0 sm:$0xff] }
 0x986   :  { %v3963_v42 = vmul.f32 1.442695, %v3962_v28  ;;  %v5008_v28 = vpack.c.bf16 %v4103_v32, %v4102_v30 }
 0x988   :  { %5137 = vpow2.f32 %v3963_v42 }
 0x98c   :  { %v5136_v47 = vpop.eup %5135 }
 0x98d   :  { %v4036_v60 = vsel %vm4029_vm6, %v5136_v47, 0.0 }
 0x98e   :  { %4037 = vadd.xlane.f32.xlu1 %v4036_v60  ;;  %v4104_v60 = vld [vmem:[%s9838_s13 + $0x10] sm:$0xff] }
 0x992   :  { %v5138_v21 = vpop.eup %5137 }
 0x993   :  { %v3965_v55 = vsel %vm3958_vm9, %v5138_v21, 0.0 }
 0x994   :  { %3966 = vadd.xlane.f32.xlu0 %v3965_v55 }
 0xa1b   :  { %v4038_v45 = vpop.xlane.xlu1 %4037 }
 0xa1c   :  { %5139 = vrcp.f32 %v4038_v45 }
 0xa21   :  { %v3967_v40 = vpop.xlane.xlu0 %3966 }
 0xa22   :  { %5141 = vrcp.f32 %v3967_v40 }
 0xa26   :  { %v5140_v13 = vpop.eup %5139 }
 0xa27   :  { %v9351_v44 = vmul.f32 %v5140_v13, %v5136_v47 }
 0xa29   :  { %v4044_v62 = vrot.slane %v9351_v44, %v9833_v61  ;;  %v4051_v15 = vrot.slane %v9351_v44, %v9287_v33 }
 0xa2b   :  { %4046 = vbcast.lane.b32.xlu1 %v4044_v62, 256  ;;  %4053 = vbcast.lane.b32.xlu0 %v4051_v15, 256 }
 0xa2c   :  { %v5142_v25 = vpop.eup %5141 }
 0xa2d   :  { %v9357_v5 = vmul.f32 %v5142_v25, %v5138_v21  ;;  %v4105_v21 = vld [vmem:[%s9838_s13 + $0x18] sm:$0xff] }
 0xa2e   :  { %v5011_v25 = vpack.c.bf16 %v4105_v21, %v4104_v60 }
 0xa2f   :  { %v3973_v24 = vrot.slane %v9357_v5, %v9833_v61  ;;  %v3980_v37 = vrot.slane %v9357_v5, %v9287_v33  ;;  %v4096_v33 = vld [vmem:[%s9837_s25 + $0x30] sm:$0xff] }
 0xa30   :  { %v4999_v29 = vpack.c.bf16 %v4097_v41, %v4096_v33 }
 0xa31   :  { %3975 = vbcast.lane.b32.xlu1 %v3973_v24, 256 }
 0xa32   :  { %5000 = vmatpush3.bf16.msra.mxu1 %v4999_v29  ;;  %v284_v29 = vld [vmem:[#allocation9] sm:$0x3] }
 0xa33   :  { %5001 = vmatprep.subr.bf16.mxu1 %v9831_v27 }
 0xa35   :  { %3982 = vbcast.lane.b32.xlu1 %v3980_v37, 256 }
 0xa36   :  { %5003 = vmatpush3.bf16.msra.mxu1 %v5002_v12 }
 0xa37   :  { %5004 = vmatprep.subr.bf16.mxu1 %v9831_v27 }
 0xa3a   :  { %5006 = vmatpush3.bf16.msra.mxu1 %v5005_v52 }
 0xa3b   :  { %5007 = vmatprep.subr.bf16.mxu1 %v9831_v27 }
 0xa3e   :  { %5009 = vmatpush3.bf16.msra.mxu1 %v5008_v28 }
 0xa3f   :  { %5010 = vmatprep.subr.bf16.mxu1 %v9831_v27 }
 0xa42   :  { %5012 = vmatpush3.bf16.msra.mxu1 %v5011_v25 }
 0xa9d   :  { %v4047_v59 = vpop.permute.xlu1 %4046  ;;  %v4054_v8 = vpop.permute.xlu0 %4053 }
 0xa9e   :  { %v4055_v16 = vmul.f32 %v4047_v59, %v9323_v49  ;;  %v4056_v9 = vmul.f32 %v4054_v8, %v9327_v36  ;;  %v3762_v8 = vmax.f32 %v9321_v38, 0.0 }
 0xaa0   :  { %v4057_v0 = vsel %vm4008_vm0, %v4055_v16, 0.0  ;;  %v4064_v7 = vsel %vm4008_vm0, %v4056_v9, 0.0 }
 0xaa1   :  { %v4058_v22 = vrot.slane %v4057_v0, 4  ;;  %v4065_v20 = vrot.slane %v4064_v7, 4 }
 0xaa3   :  { %v4059_v58 = vadd.f32 %v4058_v22, %v4057_v0  ;;  %v4066_v63 = vadd.f32 %v4065_v20, %v4064_v7  ;;  %v3976_v6 = vpop.permute.xlu1 %3975  ;;  %v4645_v20 = vld [vmem:[%s9839_s30] ss:$0 sm:$0xff] }
 0xaa4   :  { %v3984_v14 = vmul.f32 %v3976_v6, %v9325_v50 }
 0xaa5   :  { %v4060_v42 = vrot.slane %v4059_v58, 2  ;;  %v4067_v47 = vrot.slane %v4066_v63, 2 }
 0xaa6   :  { %v3986_v55 = vsel %vm296_vm2, %v3984_v14, 0.0 }
 0xaa7   :  { %v4061_v45 = vadd.f32 %v4060_v42, %v4059_v58  ;;  %v4068_v40 = vadd.f32 %v4067_v47, %v4066_v63  ;;  %v3987_v13 = vrot.slane %v3986_v55, 4  ;;  %v3983_v62 = vpop.permute.xlu1 %3982 }
 0xaa8   :  { %v3985_v15 = vmul.f32 %v3983_v62, %v9333_v4 }
 0xaa9   :  { %v4062_v24 = vrot.slane %v4061_v45, 1  ;;  %v4069_v50 = vrot.slane %v4068_v40, 1  ;;  %v3988_v37 = vadd.f32 %v3987_v13, %v3986_v55  ;;  %v4227_v13 = vld [vmem:[%s9841_s26 + $0x10] sm:$0xff] }
 0xaaa   :  { %v3993_v3 = vsel %vm296_vm2, %v3985_v15, 0.0  ;;  %v4228_v15 = vld [vmem:[%s9841_s26 + $0x18] sm:$0xff] }
 0xaab   :  { %v4063_v1 = vadd.f32 %v4062_v24, %v4061_v45  ;;  %v4070_v17 = vadd.f32 %v4069_v50, %v4068_v40  ;;  %v3989_v26 = vrot.slane %v3988_v37, 2  ;;  %v3994_v19 = vrot.slane %v3993_v3, 4  ;;  %v4225_v45 = vld [vmem:[%s9841_s26] sm:$0xff]  ;;  %v4226_v40 = vld [vmem:[%s9841_s26 + $0x8] sm:$0xff] }
 0xaac   :  { %v5014_v62 = vpack.c.bf16 %v4226_v40, %v4225_v45  ;;  %v5017_v25 = vpack.c.bf16 %v4228_v15, %v4227_v13  ;;  %v4229_v24 = vld [vmem:[%s9841_s26 + $0x20] sm:$0xff]  ;;  %v4230_v50 = vld [vmem:[%s9841_s26 + $0x28] sm:$0xff] }
 0xaad   :  { %v3990_v53 = vadd.f32 %v3989_v26, %v3988_v37  ;;  %v3995_v35 = vadd.f32 %v3994_v19, %v3993_v3  ;;  %v4073_v10 = vsel %vm3642_vm13, %v4070_v17, %v4063_v1  ;;  %v5020_v37 = vpack.c.bf16 %v4230_v50, %v4229_v24  ;;  %v4231_v3 = vld [vmem:[%s9841_s26 + $0x30] sm:$0xff]  ;;  %v4232_v1 = vld [vmem:[%s9841_s26 + $0x38] sm:$0xff]  ;;  %v4653_v40 = vld [vmem:[%s5698_s20] ss:$0 sm:$0xff]  ;;  %s5554_s20 = smov [#allocation24]  }
 0xaae   :  { %4074 = vrot.lane.b32.xlu0 %v4073_v10, %s5543_s27  ;;  %5015 = vmatpush3.bf16.msra.mxu0 %v5014_v62  ;;  %v5023_v26 = vpack.c.bf16 %v4232_v1, %v4231_v3  ;;  %v4356_v10 = vld [vmem:[%s9842_s28 + $0x8] sm:$0xff] }
 0xaaf   :  { %v3996_v4 = vrot.slane %v3995_v35, 2  ;;  %v3991_v54 = vrot.slane %v3990_v53, 1  ;;  %5016 = vmatprep.subr.bf16.mxu0 %v9831_v27 }
 0xab1   :  { %v3997_v33 = vadd.f32 %v3996_v4, %v3995_v35  ;;  %v3992_v11 = vadd.f32 %v3991_v54, %v3990_v53  ;;  %v4355_v35 = vld [vmem:[%s9842_s28] sm:$0xff] }
 0xab2   :  { %4083 = vrot.lane.b32.xlu0 %v9270_v43, %s5552_s23  ;;  %5018 = vmatpush3.bf16.msra.mxu0 %v5017_v25  ;;  %v5026_v4 = vpack.c.bf16 %v4356_v10, %v4355_v35 }
 0xab3   :  { %v3998_v41 = vrot.slane %v3997_v33, 1  ;;  %5019 = vmatprep.subr.bf16.mxu0 %v9831_v27 }
 0xab5   :  { %v3999_v48 = vadd.f32 %v3998_v41, %v3997_v33  ;;  %v4357_v33 = vld [vmem:[%s9842_s28 + $0x10] sm:$0xff]  ;;  %v4358_v41 = vld [vmem:[%s9842_s28 + $0x18] sm:$0xff] }
 0xab6   :  { %4199 = vrot.lane.b32.xlu0 %v284_v29, %s5543_s27  ;;  %5021 = vmatpush3.bf16.msra.mxu0 %v5020_v37 }
 0xab7   :  { %v9400_v12 = vsel %vm3642_vm13, %v3999_v48, %v3992_v11  ;;  %5022 = vmatprep.subr.bf16.mxu0 %v9831_v27  ;;  %v5029_v11 = vpack.c.bf16 %v4358_v41, %v4357_v33  ;;  %v4359_v48 = vld [vmem:[%s9842_s28 + $0x20] sm:$0xff] }
 0xab8   :  { %4080 = vrot.lane.b32.xlu1 %v9400_v12, %s5531_s1 }
 0xaba   :  { %5024 = vmatpush3.bf16.msra.mxu0 %v5023_v26 }
 0xabb   :  { %5025 = vmatprep.subr.bf16.mxu0 %v9831_v27 }
 0xb20   :  { %v9404_v59 = vpop.permute.xlu0 %4074 }
 0xb21   :  { %v4086_v9 = vsel %vm296_vm2, %v3762_v8, %v9404_v59  ;;  %v4360_v8 = vld [vmem:[%s9842_s28 + $0x28] sm:$0xff] }
 0xb24   :  { %v4084_v16 = vpop.permute.xlu0 %4083 }
 0xb28   :  { %v4200_v47 = vpop.permute.xlu0 %4199 }
 0xb2a   :  { %v9409_v0 = vpop.permute.xlu1 %4080 }
 0xb2b   :  { %v4087_v7 = vsel %vm1567_vm10, %v4086_v9, %v9409_v0  ;;  %v4361_v9 = vld [vmem:[%s9842_s28 + $0x30] sm:$0xff] }
 0xb2c   :  { %v4089_v22 = vsel %vm4088_vm11, %v4087_v7, %v4084_v16  ;;  %v5032_v16 = vpack.c.bf16 %v4360_v8, %v4359_v48  ;;  %v4362_v7 = vld [vmem:[%s9842_s28 + $0x38] sm:$0xff] }
 0xb2d   :  { %4901 = vmatmul.mubr.f32.vlgmr.msra.gmra.mrb[20].mxu1 %v4089_v22 }
 0xc00   :  { %v4179_v51 = vpop.f32.mrb[20].mxu1 }
 0xc01   :  { %v4180_v30 = vadd.f32 %v4645_v20, %v4179_v51  ;;  %v4902_v52 = vpop.f32.mrb[21].mxu1  ;;  %v4650_v51 = vld [vmem:[%s5693_s14] ss:$0 sm:$0xff]  ;;  %s5553_s14 = smov 104  }
 0xc03   :  { %v4190_v32 = vadd.f32 %v4646_v56, %v4180_v30 }
 0xc05   :  { %5143 = vtanh.f32 %v4190_v32  ;;  %v4647_v58 = vmul.f32 -1.442695, %v4190_v32 }
 0xc07   :  { %5145 = vpow2.f32 %v4647_v58 }
 0xc0f   :  { %v5144_v38 = vpop.eup %5143 }
 0xc10   :  { %4204 = vrot.lane.b32.xlu1 %v5144_v38, %s5531_s1 }
 0xc11   :  { %v5146_v63 = vpop.eup %5145 }
 0xc12   :  { %v4194_v6 = vadd.f32 1.0, %v5146_v63 }
 0xc14   :  { %5147 = vrcp.f32 %v4194_v6 }
 0xc1e   :  { %v5148_v14 = vpop.eup %5147 }
 0xc1f   :  { %v4202_v60 = vmul.f32 %v5148_v14, %v4200_v47 }
 0xc82   :  { %v4205_v28 = vpop.permute.xlu1 %4204 }
 0xc83   :  { %v4207_v42 = vmul.f32 %v5148_v14, %v4205_v28 }
 0xc85   :  { %4209 = vrot.lane.b32.xlu1 %v4207_v42, %s5543_s27 }
 0xcf7   :  { %v4210_v21 = vpop.permute.xlu1 %4209 }
 0xcf8   :  { %v9418_v55 = vadd.f32 %v4210_v21, %v4202_v60 }
 0xcfa   :  { %5149 = vtanh.f32 %v9418_v55 }
 0xd04   :  { %v5150_v17 = vpop.eup %5149 }
 0xd05   :  { %4215 = vrot.lane.b32.xlu0 %v5150_v17, %s5531_s1 }
 0xd09   :  { %4449 = vrot.lane.b32.xlu0 %v5150_v17, %s5552_s23  ;;  %v4515_v17 = vadd.s32 4294967188, %v9340_v18 }
 0xd77   :  { %v4216_v19 = vpop.permute.xlu0 %4215 }
 0xd78   :  { %v4218_v53 = vmul.f32 %v5148_v14, %v4216_v19 }
 0xd7a   :  { %4221 = vrot.lane.b32.xlu1 %v4218_v53, %s5531_s1  ;;  %s9843_s1 = sld [smem:[#allocation43_spill]] }
 0xd7b   :  { %v4450_v63 = vpop.permute.xlu0 %4449 }
 0xdec   :  { %v4222_v54 = vpop.permute.xlu1 %4221 }
 0xded   :  { %v4224_v29 = vsel %vm296_vm2, %v9400_v12, %v4222_v54  ;;  %v5035_v12 = vpack.c.bf16 %v4362_v7, %v4361_v9 }
 0xdee   :  { %4920 = vmatmul.mubr.msk.f32.vlgmr.msra.gmra.mrb[18].mxu0 %vm1567_vm10, %v4224_v29 }
 0xdef   :  { %5027 = vmatpush3.bf16.msra.mxu0 %v5026_v4  ;;  %4938 = vmatprep.mubr.msk.f32.mxu0 %vm5548_vm3, %v9808_v39  ;;  %v4354_v39 = vsel %vm296_vm2, %v9270_v43, %v9404_v59  ;;  %v4648_v43 = vld [vmem:[%s9843_s1] ss:$0 sm:$0xff]  ;;  %vm4466_vm3 = vcmask 320512  }
 0xdf0   :  { %5028 = vmatprep.subr.bf16.mxu0 %v9831_v27 }
 0xdf3   :  { %5030 = vmatpush3.bf16.msra.mxu0 %v5029_v11 }
 0xdf4   :  { %5031 = vmatprep.subr.bf16.mxu0 %v9831_v27 }
 0xdf7   :  { %5033 = vmatpush3.bf16.msra.mxu0 %v5032_v16 }
 0xdf8   :  { %5034 = vmatprep.subr.bf16.mxu0 %v9831_v27 }
 0xdfb   :  { %5036 = vmatpush3.bf16.msra.mxu0 %v5035_v12 }
 0xdfe   :  { %4939 = vmatmul.mubr.msk.f32.vlgmr.msra.gmra.mrb[20].mxu0 %vm1567_vm10, %v4354_v39 }
 0xec1   :  { %v4309_v22 = vpop.f32.mrb[18].mxu0 }
 0xec2   :  { %v4921_v20 = vpop.f32.mrb[19].mxu0  ;;  %v4310_v59 = vadd.f32 %v4648_v43, %v4309_v22 }
 0xec4   :  { %v4320_v14 = vrot.slane %v4310_v59, %v9835_v57 }
 0xec6   :  { %v4328_v28 = vrot.slane %v4320_v14, %v9835_v57  ;;  %v4321_v21 = vcombine.high %v4320_v14, %v4320_v14 }
 0xec8   :  { %v4339_v42 = vrot.slane %v4328_v28, %v9833_v61  ;;  %v4335_v45 = vrot.slane %v4321_v21, %v9835_v57 }
 0xeca   :  { %v4346_v47 = vmul.f32 %v4339_v42, %v9323_v49  ;;  %v4343_v62 = vrot.slane %v4335_v45, %v9833_v61  ;;  %v4654_v61 = vld [vmem:[#allocation2] ss:$0 sm:$0xff] }
 0xecc   :  { %v4348_v60 = vsel %vm4008_vm0, %v4346_v47, 0.0  ;;  %v4347_v24 = vmul.f32 %v4343_v62, %v9327_v36 }
 0xece   :  { %v4351_v50 = vsel %vm4008_vm0, %v4347_v24, 0.0 }
 0xed1   :  { %v4439_v56 = vpop.f32.mrb[20].mxu0 }
 0xed2   :  { %v4440_v30 = vadd.f32 %v4650_v51, %v4439_v56  ;;  %v4940_v52 = vpop.f32.mrb[21].mxu0 }
 0xed4   :  { %v4652_v32 = vmul.f32 -1.442695, %v4440_v30 }
 0xed6   :  { %5151 = vpow2.f32 %v4652_v32 }
 0xee0   :  { %v5152_v38 = vpop.eup %5151 }
 0xee1   :  { %v4446_v58 = vadd.f32 1.0, %v5152_v38 }
 0xee3   :  { %5153 = vrcp.f32 %v4446_v58 }
 0xeed   :  { %v5154_v27 = vpop.eup %5153 }
 0xeee   :  { %v4452_v6 = vmul.f32 %v5154_v27, %v4450_v63 }
 0xef0   :  { %4454 = vrot.lane.b32.xlu1 %v4452_v6, %s5536_s0 }
 0xf14   :  { %4349 = vadd.xlane.f32.xlu1 %v4348_v60 }
 0xf25   :  { %4502 = vrot.lane.b32.xlu1 %v4218_v53, %s5543_s27 }
 0xf29   :  { %4506 = vrot.lane.b32.xlu1 %v9357_v5, %s5552_s23 }
 0xf2d   :  { %4490 = vrot.lane.b32.xlu1 %v9300_v23, %s5543_s27 }
 0xf62   :  { %v4455_v13 = vpop.permute.xlu1 %4454 }
 0xf63   :  { %v4457_v49 = vsel %vm1351_vm4, %v9357_v5, %v4455_v13  ;;  %vm4533_vm4 = vcmask 850944  }
 0xf64   :  { %v4465_v15 = vmul.f32 %v4653_v40, %v4457_v49 }
 0xf66   :  { %v4467_v25 = vsel %vm4466_vm3, %v4465_v15, 0.0 }
 0xf67   :  { %4468 = vadd.xlane.f32.xlu0 %v4467_v25 }
 0xf6b   :  { %4352 = vadd.xlane.f32.xlu0 %v4351_v50 }
 0xf81   :  { %4484 = vrot.lane.b32.xlu0 %v9296_v34, %s5527_s15  ;;  %s4560_s15 = sshll.u32 %s5554_s20, 4  ;;  %s4561_s15 = int_to_ptr.vmem [resolvable:$true] %s4560_s15 }
 0xf82   :  { %s5455_s0 = scalar_lea.vmem %s4561_s15, 64  ;;  %p5460_p7 = scmp.lt.s32.totalorder %s4561_s15, %s4561_s15 }
 0xf83   :  { %p5456_p6 = scmp.ne.s32.totalorder %s4561_s15, %s5455_s0  ;;  %p5461_p8 = scmp.lt.s32.totalorder %s5455_s0, %s5455_s0 }
 0xf85   :  { %4510 = vrot.lane.b32.xlu0 %v9351_v44, %s5553_s14  ;;  %p5462_p9 = por %p5461_p8, %p5460_p7 }
 0xf87   :  { %p5463_p10 = pnand %p5462_p9, %p5456_p6 }
 0xf89   :  { %4496 = vrot.lane.b32.xlu0 %v9307_v46, %s5545_s9  ;;  %v4518_v46 = vsub.s32 %v4515_v17, %v9832_v2 }
 0xfa1   :  { %v4350_v36 = vpop.xlane.xlu1 %4349 }
 0xfa2   :  { %v4519_v18 = vrot.slane %v4350_v36, %v4518_v46 }
 0xfa5   :  { %v4503_v3 = vpop.permute.xlu1 %4502 }
 0xfa6   :  { %v4530_v44 = vsel %vm296_vm2, %v4503_v3, %v9418_v55 }
 0xfa7   :  { %v4531_v19 = vsel %vm1567_vm10, %v4530_v44, %v9409_v0 }
 0xfa9   :  { %v4507_v34 = vpop.permute.xlu1 %4506 }
 0xfaa   :  { %v4532_v10 = vsel %vm4088_vm11, %v4531_v19, %v4507_v34 }
 0xfad   :  { %v4491_v4 = vpop.permute.xlu1 %4490 }
 0xff4   :  { %v4469_v23 = vpop.xlane.xlu0 %4468 }
 0xff5   :  { %v4477_v57 = vadd.f32 %v4654_v61, %v4469_v23 }
 0xff7   :  { %5155 = vtanh.f32 %v4477_v57 }
 0xff8   :  { %v4353_v37 = vpop.xlane.xlu0 %4352 }
 0xff9   :  { %v4523_v53 = vrot.slane %v4353_v37, %v4518_v46 }
 0xffb   :  { %v4524_v2 = vsel %vm3642_vm13, %v4523_v53, %v4519_v18 }
 0xffc   :  { %v4485_v1 = vpop.permute.xlu0 %4484 }
 0xffd   :  { %v4499_v35 = vsel %vm1377_vm5, %v9303_v31, %v4485_v1 }
 0xffe   :  { %v4500_v41 = vsel %vm296_vm2, %v4499_v35, %v4491_v4 }
0x1000   :  { %v4511_v26 = vpop.permute.xlu0 %4510 }
0x1001   :  { %v5156_v5 = vpop.eup %5155  ;;  %v4534_v33 = vsel %vm4533_vm4, %v4532_v10, %v4511_v26 }
0x1002   :  { %4527 = vrot.lane.b32.xlu1 %v5156_v5, %s5551_s18  ;;  %v4536_v0 = vsel %vm4535_vm12, %v4534_v33, %v4524_v2 }
0x1004   :  { %v4497_v54 = vpop.permute.xlu0 %4496 }
0x1005   :  { %v4501_v55 = vsel %vm1501_vm8, %v4500_v41, %v4497_v54 }
0x1006   :  { %v4541_v11 = vsel %vm1567_vm10, %v4501_v55, 0.0 }
0x1074   :  { %v4528_v29 = vpop.permute.xlu1 %4527 }
0x1075   :  { %v4538_v31 = vsel %vm4537_vm14, %v4536_v0, %v4528_v29 }
0x1076   :  { %v4540_v48 = vsel %vm4539_vm15, %v4538_v31, 0.0 }
0x1077   :  { %v4544_v8 = vcombine.low %v4540_v48, %v4541_v11 }
0x1079   :  { %4655 = vst.sshfl [vmem:[#allocation24] sm:$0x33 pattern:$0x76325410] %v4544_v8 }
0x107a   :  { %5466 = shalt.err (!%p5463_p10)
}
0x107b   :  { %s5467_s12 = scalar_lea.hbm %s5706_s4, 64 }
0x107c   :  { %p5468_p11 = scmp.ne.s32.totalorder %s5706_s4, %s5467_s12  ;;  %p5471_p12 = scmp.lt.u32.totalorder %s5467_s12, %s5706_s4 }
0x107e   :  { %p5473_p13 = pnand %p5471_p12, %p5468_p11 }
0x1080   :  { %5476 = shalt.err (!%p5473_p13)
}
0x1081   :  { %4563 = dma.vmem_to_hbm [thread:$0]  %s4561_s15, 64, %s5706_s4, [#allocation5]  }
0x1082   :  { %5491 = dma.done.wait [#allocation5], 64  }
0x1083   :  { %5492 = vsyncadd [#allocation5], 4294967232 }
0x1084   :  { %4567 = vsyncpa [#allocation4], 1 }
0x1085   :  { %4568 = vsyncpa [#allocation7], 1 }
0x1086   :  { %4569 = vsyncpa [#allocation10], 1 }
0x1087   :  { %4570 = vsyncpa [#allocation13], 1 }
0x1088   :  { %4571 = vsyncpa [#allocation16], 1 }
0x1089   :  { %4572 = vsyncpa [#allocation19], 1 }
0x108a   :  { %4573 = vsyncpa [#allocation22], 1 }
0x108b   :  { %4574 = vsyncpa [#allocation5], 1 }

</bundles_post_ra>
